<compile_context>
chip_gen: v5e
topology: v5e:2x2
jax: 0.10.0
libtpu: 0.0.40
codegen_flags: <defaults>
</compile_context>

<pallas_src>
import math

import jax
import jax.numpy as jnp
from jax.experimental import pallas as pl
from jax.experimental.pallas import tpu as pltpu

EPS = 1e-5  # nn.LayerNorm default eps


# ---------------------------------------------------------------- kernel ----

def _make_mixer_kernel(BB, N, P, H, EH, PE, use_temporal, approx_gelu=False):
    R = BB * N * P          # rows per grid step
    G = BB * N              # independent temporal P-mixes per step
    inv_sqrt2 = 1.0 / math.sqrt(2.0)

    # vector-pack row indices (must match _pack_params ordering)
    F_G, F_B, F_B2, F_BG, F_B1 = 0, 1, 2, 3, 4
    G_G, G_B, G_B2, G_BG, G_B1 = 5, 6, 7, 8, 9
    T_G, T_B = 10, 11

    def _gelu(z):
        if approx_gelu:
            return jax.nn.gelu(z, approximate=True)          # EUP tanh path
        return 0.5 * z * (1.0 + jax.lax.erf(z * inv_sqrt2))  # torch exact

    def _ln(z, gamma, beta):
        mu = jnp.mean(z, axis=-1, keepdims=True)
        var = jnp.mean(jnp.square(z - mu), axis=-1, keepdims=True)
        return (z - mu) * jax.lax.rsqrt(var + EPS) * gamma + beta

    def kernel(x_ref, agg_ref, fg_w1_ref, fg_w2_ref, vec_ref, *rest):
        if use_temporal:
            t_mat_ref, t_bias_ref, o_ref = rest
        else:
            (o_ref,) = rest

        def vrow(r, width):               # (1, width) slice of the vec pack
            return vec_ref[r:r + 1, :width]

        x0 = x_ref[...].astype(jnp.float32)                   # (R, H)

        # ---- Temporal mixer: LN over H, FFN + gate over P, residual --------
        if use_temporal:
            xn = _ln(x0, vrow(T_G, H), vrow(T_B, H))           # (R, H)
            xn3 = xn.reshape(G, P, H)                          # split rows only
            w1t = t_mat_ref[:PE, :P]                           # (PE, P)
            w2c = t_mat_ref[PE:, :PE]                          # (2P, PE) = [fc2; gate]
            h = jax.lax.dot_general(
                jnp.broadcast_to(w1t[None], (G, PE, P)), xn3,
                dimension_numbers=(((2,), (1,)), ((0,), (0,))),
                preferred_element_type=jnp.float32)            # (G, PE, H)
            h = _gelu(h + t_bias_ref[:, :PE, :])
            yz = jax.lax.dot_general(
                jnp.broadcast_to(w2c[None], (G, 2 * P, PE)), h,
                dimension_numbers=(((2,), (1,)), ((0,), (0,))),
                preferred_element_type=jnp.float32) + t_bias_ref[:, PE:, :]
            y = yz[:, :P, :]                                   # sublane-aligned split
            gate = yz[:, P:, :]
            x1 = (y * (gate * jax.nn.sigmoid(gate))).reshape(R, H) + x0
        else:
            x1 = x0

        # static, sublane-aligned views into the packed weights
        fw1 = fg_w1_ref[:H, :]                                 # (H, EH)
        gw1 = fg_w1_ref[H:, :]
        fw2 = fg_w2_ref[0 * EH:1 * EH, :]                      # (EH, H)
        fwg = fg_w2_ref[1 * EH:2 * EH, :]
        gw2 = fg_w2_ref[2 * EH:3 * EH, :]
        gwg = fg_w2_ref[3 * EH:4 * EH, :]

        def _mix_h(z, w1, b1, w2, b2, wg, bg):
            # fc1 -> GELU -> separate fc2 / gate matmuls (both lane aligned,
            # MXU has slack) -> y * silu(g)
            h = _gelu(jnp.dot(z, w1, preferred_element_type=jnp.float32) + b1)
            y = jnp.dot(h, w2, preferred_element_type=jnp.float32) + b2
            g = jnp.dot(h, wg, preferred_element_type=jnp.float32) + bg
            return y * (g * jax.nn.sigmoid(g))

        # ---- Feature (dimension) mixer: LN + FFN + gate over H, residual ---
        xn = _ln(x1, vrow(F_G, H), vrow(F_B, H))
        x2 = _mix_h(xn, fw1, vrow(F_B1, EH), fw2, vrow(F_B2, H),
                    fwg, vrow(F_BG, H)) + x1

        # ---- Graph mixer: LN, kron-aggregation matmul, FFN + gate, residual
        xn = _ln(x2, vrow(G_G, H), vrow(G_B, H))
        xa = jnp.dot(agg_ref[...], xn, preferred_element_type=jnp.float32)
        out = _mix_h(xa, gw1, vrow(G_B1, EH), gw2, vrow(G_B2, H),
                     gwg, vrow(G_BG, H)) + x2

        o_ref[...] = out.astype(o_ref.dtype)

    return kernel


# ------------------------------------------------------------ param prep ----

def _pick_batch_block(B, rows_per_batch, target_rows=512, min_rows=128):
    """Largest divisor of B with rows/step <= target_rows, preferring to reach
    ~min_rows rows/step first, then >=2 (ideally >=4) grid steps (v7x megacore
    + pipelined input/output DMA), then as many rows as allowed."""
    if rows_per_batch >= target_rows:
        return 1
    divs = [d for d in range(1, B + 1) if B % d == 0]

    def score(d):
        rows = d * rows_per_batch
        steps = B // d
        return (rows <= target_rows, min(rows, min_rows), min(steps, 4), rows)

    return max(divs, key=score)


def _pack_params(params, P, H, EH, use_temporal):
    """Pack ~20 tiny params into a few lane-dense arrays (fewer DMA windows)."""
    def pad_row(v):
        v = v.astype(jnp.float32)
        return jnp.pad(v, (0, EH - v.shape[0]))

    def hidden_rows(p):
        b2g = p["b2"] @ p["wg"] + p["bg"]            # gate bias pre-composed
        return [pad_row(p["g"]), pad_row(p["b"]), pad_row(p["b2"]),
                pad_row(b2g), p["b1"].astype(jnp.float32)]

    pf, pg = params["feature"], params["graph"]
    rows = hidden_rows(pf) + hidden_rows(pg)

    fg_w1 = jnp.concatenate([pf["w1"], pg["w1"]], axis=0).astype(jnp.float32)   # (2H, EH)
    fg_w2 = jnp.concatenate(
        [pf["w2"], pf["w2"] @ pf["wg"], pg["w2"], pg["w2"] @ pg["wg"]],
        axis=0).astype(jnp.float32)                                             # (4EH, H)

    t_args, pe = [], 0
    if use_temporal:
        pt = params["temporal"]
        pe = pt["w1"].shape[1]
        rows += [pad_row(pt["g"]), pad_row(pt["b"])]
        width = max(P, pe)
        w1t = jnp.pad(pt["w1"].T, ((0, 0), (0, width - P)))                     # (PE, width)
        w2c = jnp.concatenate([pt["w2"], pt["w2"] @ pt["wg"]], axis=1).T        # (2P, PE)
        w2c = jnp.pad(w2c, ((0, 0), (0, width - pe)))
        t_mat = jnp.concatenate([w1t, w2c], axis=0).astype(jnp.float32)         # (PE+2P, width)
        b2c = jnp.concatenate([pt["b2"], pt["b2"] @ pt["wg"] + pt["bg"]])       # (2P,)
        t_bias = jnp.concatenate(
            [jnp.broadcast_to(pt["b1"][:, None], (pe, H)),
             jnp.broadcast_to(b2c[:, None], (2 * P, H))],
            axis=0)[None].astype(jnp.float32)                                   # (1, PE+2P, H)
        t_args = [t_mat, t_bias]

    vec = jnp.stack(rows)                                                       # (10|12, EH)
    return [fg_w1, fg_w2, vec, *t_args], pe


# ----------------------------------------------------------- full forward ---

def mixer_layer_wg(x, adj, params, *, approx_gelu=False):
    """Fused Pallas implementation of MixerLayerWG.forward (eval mode)."""
    B, N, P, H = x.shape
    use_temporal = P > 1
    EH = params["feature"]["w1"].shape[1]

    rows_per_batch = N * P
    BB = _pick_batch_block(B, rows_per_batch)
    R = BB * rows_per_batch
    steps = B // BB
    assert R % 8 == 0 or steps == 1, "rows per step must be sublane aligned"

    # Row-normalized adjacency (torch: adj / adj.sum(1).view(-1, 1)), folded
    # with the per-step row layout (bb, n, p) into one block-diagonal
    # aggregation matrix:  xa = kron(I_BB, kron(a, I_P)) @ xn.
    a_norm = (adj / jnp.sum(adj, axis=1, keepdims=True)).astype(jnp.float32)
    agg = jnp.kron(jnp.eye(BB, dtype=jnp.float32),
                   jnp.kron(a_norm, jnp.eye(P, dtype=jnp.float32)))            # (R, R)

    weight_args, PE = _pack_params(params, P, H, EH, use_temporal)

    x2d = x.reshape(B * N * P, H)    # free row-major reshape in the wrapper

    def const_spec(a):
        nd = a.ndim
        return pl.BlockSpec(a.shape, lambda i, _nd=nd: (0,) * _nd)

    in_specs = [pl.BlockSpec((R, H), lambda i: (i, 0)),       # activations
                const_spec(agg)] + [const_spec(a) for a in weight_args]

    out2d = pl.pallas_call(
        _make_mixer_kernel(BB, N, P, H, EH, PE, use_temporal, approx_gelu),
        out_shape=jax.ShapeDtypeStruct((B * N * P, H), x.dtype),
        grid=(steps,),
        in_specs=in_specs,
        out_specs=pl.BlockSpec((R, H), lambda i: (i, 0)),
        compiler_params=pltpu.CompilerParams(
            dimension_semantics=("parallel",)),
    )(x2d, agg, *weight_args)

    return out2d.reshape(B, N, P, H)


# --------------------------------------------------------- pure-JAX check ---

def _ref_forward(x, adj, params):
    def ln(z, g, b):
        mu = z.mean(-1, keepdims=True)
        var = ((z - mu) ** 2).mean(-1, keepdims=True)
        return (z - mu) / jnp.sqrt(var + EPS) * g + b

    def ffn_gate(z, p):
        h = jax.nn.gelu(z @ p["w1"] + p["b1"], approximate=False)
        y = h @ p["w2"] + p["b2"]
        g = y @ p["wg"] + p["bg"]
        return y * (g * jax.nn.sigmoid(g))

    B, N, P, H = x.shape
    if P > 1:
        pt = params["temporal"]
        res = x
        xn = ln(x, pt["g"], pt["b"])
        xt = jnp.swapaxes(xn, 2, 3)
        x = jnp.swapaxes(ffn_gate(xt, pt), 2, 3) + res
    pf = params["feature"]
    x = ffn_gate(ln(x, pf["g"], pf["b"]), pf) + x
    pg = params["graph"]
    res = x
    xn = ln(x, pg["g"], pg["b"])
    a = adj / adj.sum(1)[:, None]
    xa = jnp.einsum('kn,bnph->bkph', a, xn)
    return ffn_gate(xa, pg) + res


# ------------------------------------------------------------------- main ---

def _init_block(key, mix_dim, expansion_factor):
    ks = jax.random.split(key, 8)
    hid = mix_dim * expansion_factor
    return {
        "g": 1.0 + 0.1 * jax.random.normal(ks[0], (mix_dim,), jnp.float32),
        "b": 0.1 * jax.random.normal(ks[1], (mix_dim,), jnp.float32),
        "w1": 0.2 * jax.random.normal(ks[2], (mix_dim, hid), jnp.float32),
        "b1": 0.1 * jax.random.normal(ks[3], (hid,), jnp.float32),
        "w2": 0.2 * jax.random.normal(ks[4], (hid, mix_dim), jnp.float32),
        "b2": 0.1 * jax.random.normal(ks[5], (mix_dim,), jnp.float32),
        "wg": 0.2 * jax.random.normal(ks[6], (mix_dim, mix_dim), jnp.float32),
        "bg": 0.1 * jax.random.normal(ks[7], (mix_dim,), jnp.float32),
    }


if __name__ == "__main__":
    # args: hidden_dim=32, expansion_factor=2, dropout=0.0, gated_attn=True
    B, N, P, H = 2, 4, 8, 32
    EF = 2

    key = jax.random.PRNGKey(0)
    k_x, k_adj, k_t, k_f, k_g = jax.random.split(key, 5)

    x = jax.random.normal(k_x, (B, N, P, H), jnp.float32)
    # positive adjacency with self-loops so row sums are non-zero
    adj = jax.random.uniform(k_adj, (N, N), jnp.float32) + jnp.eye(N, dtype=jnp.float32)

    params = {
        # temporal mixer: LayerNorm over H, FFN/gate over num_patches P
        "temporal": {**_init_block(k_t, P, EF),
                     "g": 1.0 + 0.1 * jax.random.normal(
                         jax.random.fold_in(k_t, 99), (H,), jnp.float32),
                     "b": 0.1 * jax.random.normal(
                         jax.random.fold_in(k_t, 100), (H,), jnp.float32)},
        "feature": _init_block(k_f, H, EF),
        "graph": _init_block(k_g, H, EF),
    }

    fwd = jax.jit(mixer_layer_wg)
    out = jax.block_until_ready(fwd(x, adj, params))

    ref = jax.block_until_ready(_ref_forward(x, adj, params))
    assert out.shape == (B, N, P, H)
    assert jnp.allclose(out, ref, rtol=1e-2, atol=1e-2), (
        f"max abs diff {jnp.max(jnp.abs(out - ref))}")

    print("KERNEL_OK")
</pallas_src>

<mosaic_0001>
module attributes {stable_mosaic.version = 11 : i64} {
  func.func @kernel(%arg0: i32, %arg1: memref<64x32xf32, #tpu.memory_space<vmem>>, %arg2: memref<64x64xf32, #tpu.memory_space<vmem>>, %arg3: memref<64x64xf32, #tpu.memory_space<vmem>>, %arg4: memref<256x32xf32, #tpu.memory_space<vmem>>, %arg5: memref<12x64xf32, #tpu.memory_space<vmem>>, %arg6: memref<32x16xf32, #tpu.memory_space<vmem>>, %arg7: memref<1x32x32xf32, #tpu.memory_space<vmem>>, %arg8: memref<64x32xf32, #tpu.memory_space<vmem>>) attributes {dimension_semantics = [#tpu.dimension_semantics<parallel>], iteration_bounds = array<i64: 1>, scalar_prefetch = 0 : i64, scratch_operands = 0 : i64, tpu.core_type = #tpu.core_type<tc>, window_params = [{transform_indices = @transform_0, window_bounds = array<i64: 64, 32>}, {pipeline_mode = #tpu.pipeline_mode<synchronous>, transform_indices = @transform_1, window_bounds = array<i64: 64, 64>}, {pipeline_mode = #tpu.pipeline_mode<synchronous>, transform_indices = @transform_2, window_bounds = array<i64: 64, 64>}, {pipeline_mode = #tpu.pipeline_mode<synchronous>, transform_indices = @transform_3, window_bounds = array<i64: 256, 32>}, {pipeline_mode = #tpu.pipeline_mode<synchronous>, transform_indices = @transform_4, window_bounds = array<i64: 12, 64>}, {pipeline_mode = #tpu.pipeline_mode<synchronous>, transform_indices = @transform_5, window_bounds = array<i64: 32, 16>}, {pipeline_mode = #tpu.pipeline_mode<synchronous>, transform_indices = @transform_6, window_bounds = array<i64: 1, 32, 32>}, {transform_indices = @transform_7, window_bounds = array<i64: 64, 32>}]} {
    %c0 = arith.constant 0 : index
    %c0_0 = arith.constant 0 : index
    %0 = vector.load %arg1[%c0, %c0_0] : memref<64x32xf32, #tpu.memory_space<vmem>>, vector<64x32xf32>
    %c10 = arith.constant 10 : index
    %c0_1 = arith.constant 0 : index
    %1 = vector.load %arg5[%c10, %c0_1] : memref<12x64xf32, #tpu.memory_space<vmem>>, vector<1x32xf32>
    %c11 = arith.constant 11 : index
    %c0_2 = arith.constant 0 : index
    %2 = vector.load %arg5[%c11, %c0_2] : memref<12x64xf32, #tpu.memory_space<vmem>>, vector<1x32xf32>
    %cst = arith.constant dense<0.000000e+00> : vector<64xf32>
    %3 = vector.multi_reduction <add>, %0, %cst [1] : vector<64x32xf32> to vector<64xf32>
    %4 = vector.shape_cast %3 : vector<64xf32> to vector<64x1xf32>
    %cst_3 = arith.constant 3.200000e+01 : f32
    %5 = vector.broadcast %cst_3 : f32 to vector<64x1xf32>
    %6 = arith.divf %4, %5 : vector<64x1xf32>
    %7 = vector.broadcast %6 : vector<64x1xf32> to vector<64x32xf32>
    %8 = arith.subf %0, %7 : vector<64x32xf32>
    %9 = arith.mulf %8, %8 : vector<64x32xf32>
    %cst_4 = arith.constant dense<0.000000e+00> : vector<64xf32>
    %10 = vector.multi_reduction <add>, %9, %cst_4 [1] : vector<64x32xf32> to vector<64xf32>
    %11 = vector.shape_cast %10 : vector<64xf32> to vector<64x1xf32>
    %cst_5 = arith.constant 3.200000e+01 : f32
    %12 = vector.broadcast %cst_5 : f32 to vector<64x1xf32>
    %13 = arith.divf %11, %12 : vector<64x1xf32>
    %14 = vector.broadcast %6 : vector<64x1xf32> to vector<64x32xf32>
    %15 = arith.subf %0, %14 : vector<64x32xf32>
    %cst_6 = arith.constant 9.99999974E-6 : f32
    %16 = vector.broadcast %cst_6 : f32 to vector<64x1xf32>
    %17 = arith.addf %13, %16 : vector<64x1xf32>
    %18 = math.rsqrt %17 : vector<64x1xf32>
    %19 = vector.broadcast %18 : vector<64x1xf32> to vector<64x32xf32>
    %20 = arith.mulf %15, %19 : vector<64x32xf32>
    %21 = vector.broadcast %1 : vector<1x32xf32> to vector<64x32xf32>
    %22 = arith.mulf %20, %21 : vector<64x32xf32>
    %23 = vector.broadcast %2 : vector<1x32xf32> to vector<64x32xf32>
    %24 = arith.addf %22, %23 : vector<64x32xf32>
    %25 = vector.shape_cast %24 : vector<64x32xf32> to vector<8x8x32xf32>
    %c0_7 = arith.constant 0 : index
    %c0_8 = arith.constant 0 : index
    %26 = vector.load %arg6[%c0_7, %c0_8] : memref<32x16xf32, #tpu.memory_space<vmem>>, vector<16x8xf32>
    %c16 = arith.constant 16 : index
    %c0_9 = arith.constant 0 : index
    %27 = vector.load %arg6[%c16, %c0_9] : memref<32x16xf32, #tpu.memory_space<vmem>>, vector<16x16xf32>
    %28 = vector.shape_cast %26 : vector<16x8xf32> to vector<1x16x8xf32>
    %29 = vector.shape_cast %28 : vector<1x16x8xf32> to vector<1x16x8xf32>
    %30 = vector.broadcast %29 : vector<1x16x8xf32> to vector<8x16x8xf32>
    %cst_10 = arith.constant dense<0.000000e+00> : vector<8x16x32xf32>
    %31 = tpu.matmul %30, %25, %cst_10 {dimension_numbers = #tpu.dot_dimension_numbers<[2], [1], [1], [2], [0, 0, 0, 1, 1, 2], [0], [0]>} : vector<8x16x8xf32>, vector<8x8x32xf32>, vector<8x16x32xf32> -> vector<8x16x32xf32>
    %c0_11 = arith.constant 0 : index
    %c0_12 = arith.constant 0 : index
    %c0_13 = arith.constant 0 : index
    %32 = vector.load %arg7[%c0_11, %c0_12, %c0_13] : memref<1x32x32xf32, #tpu.memory_space<vmem>>, vector<1x16x32xf32>
    %33 = vector.broadcast %32 : vector<1x16x32xf32> to vector<8x16x32xf32>
    %34 = arith.addf %31, %33 : vector<8x16x32xf32>
    %cst_14 = arith.constant 5.000000e-01 : f32
    %35 = vector.broadcast %cst_14 : f32 to vector<8x16x32xf32>
    %36 = arith.mulf %35, %34 : vector<8x16x32xf32>
    %cst_15 = arith.constant 0.707106769 : f32
    %37 = vector.broadcast %cst_15 : f32 to vector<8x16x32xf32>
    %38 = arith.mulf %34, %37 : vector<8x16x32xf32>
    %39 = math.erf %38 : vector<8x16x32xf32>
    %cst_16 = arith.constant 1.000000e+00 : f32
    %40 = vector.broadcast %cst_16 : f32 to vector<8x16x32xf32>
    %41 = arith.addf %40, %39 : vector<8x16x32xf32>
    %42 = arith.mulf %36, %41 : vector<8x16x32xf32>
    %43 = vector.shape_cast %27 : vector<16x16xf32> to vector<1x16x16xf32>
    %44 = vector.shape_cast %43 : vector<1x16x16xf32> to vector<1x16x16xf32>
    %45 = vector.broadcast %44 : vector<1x16x16xf32> to vector<8x16x16xf32>
    %cst_17 = arith.constant dense<0.000000e+00> : vector<8x16x32xf32>
    %46 = tpu.matmul %45, %42, %cst_17 {dimension_numbers = #tpu.dot_dimension_numbers<[2], [1], [1], [2], [0, 0, 0, 1, 1, 2], [0], [0]>} : vector<8x16x16xf32>, vector<8x16x32xf32>, vector<8x16x32xf32> -> vector<8x16x32xf32>
    %c0_18 = arith.constant 0 : index
    %c16_19 = arith.constant 16 : index
    %c0_20 = arith.constant 0 : index
    %47 = vector.load %arg7[%c0_18, %c16_19, %c0_20] : memref<1x32x32xf32, #tpu.memory_space<vmem>>, vector<1x16x32xf32>
    %48 = vector.broadcast %47 : vector<1x16x32xf32> to vector<8x16x32xf32>
    %49 = arith.addf %46, %48 : vector<8x16x32xf32>
    %50 = vector.extract_strided_slice %49 {offsets = [0, 0, 0], sizes = [8, 8, 32], strides = [1, 1, 1]} : vector<8x16x32xf32> to vector<8x8x32xf32>
    %51 = vector.extract_strided_slice %49 {offsets = [0, 8, 0], sizes = [8, 8, 32], strides = [1, 1, 1]} : vector<8x16x32xf32> to vector<8x8x32xf32>
    %52 = arith.negf %51 : vector<8x8x32xf32>
    %53 = math.exp %52 : vector<8x8x32xf32>
    %cst_21 = arith.constant 1.000000e+00 : f32
    %54 = vector.broadcast %cst_21 : f32 to vector<8x8x32xf32>
    %55 = arith.addf %54, %53 : vector<8x8x32xf32>
    %56 = arith.divf %54, %55 : vector<8x8x32xf32>
    %57 = arith.mulf %51, %56 : vector<8x8x32xf32>
    %58 = arith.mulf %50, %57 : vector<8x8x32xf32>
    %59 = vector.shape_cast %58 : vector<8x8x32xf32> to vector<64x32xf32>
    %60 = arith.addf %59, %0 : vector<64x32xf32>
    %c0_22 = arith.constant 0 : index
    %c0_23 = arith.constant 0 : index
    %61 = vector.load %arg3[%c0_22, %c0_23] : memref<64x64xf32, #tpu.memory_space<vmem>>, vector<32x64xf32>
    %c32 = arith.constant 32 : index
    %c0_24 = arith.constant 0 : index
    %62 = vector.load %arg3[%c32, %c0_24] : memref<64x64xf32, #tpu.memory_space<vmem>>, vector<32x64xf32>
    %c0_25 = arith.constant 0 : index
    %c0_26 = arith.constant 0 : index
    %63 = vector.load %arg4[%c0_25, %c0_26] : memref<256x32xf32, #tpu.memory_space<vmem>>, vector<64x32xf32>
    %c64 = arith.constant 64 : index
    %c0_27 = arith.constant 0 : index
    %64 = vector.load %arg4[%c64, %c0_27] : memref<256x32xf32, #tpu.memory_space<vmem>>, vector<64x32xf32>
    %c128 = arith.constant 128 : index
    %c0_28 = arith.constant 0 : index
    %65 = vector.load %arg4[%c128, %c0_28] : memref<256x32xf32, #tpu.memory_space<vmem>>, vector<64x32xf32>
    %c192 = arith.constant 192 : index
    %c0_29 = arith.constant 0 : index
    %66 = vector.load %arg4[%c192, %c0_29] : memref<256x32xf32, #tpu.memory_space<vmem>>, vector<64x32xf32>
    %c0_30 = arith.constant 0 : index
    %c0_31 = arith.constant 0 : index
    %67 = vector.load %arg5[%c0_30, %c0_31] : memref<12x64xf32, #tpu.memory_space<vmem>>, vector<1x32xf32>
    %c1 = arith.constant 1 : index
    %c0_32 = arith.constant 0 : index
    %68 = vector.load %arg5[%c1, %c0_32] : memref<12x64xf32, #tpu.memory_space<vmem>>, vector<1x32xf32>
    %cst_33 = arith.constant dense<0.000000e+00> : vector<64xf32>
    %69 = vector.multi_reduction <add>, %60, %cst_33 [1] : vector<64x32xf32> to vector<64xf32>
    %70 = vector.shape_cast %69 : vector<64xf32> to vector<64x1xf32>
    %cst_34 = arith.constant 3.200000e+01 : f32
    %71 = vector.broadcast %cst_34 : f32 to vector<64x1xf32>
    %72 = arith.divf %70, %71 : vector<64x1xf32>
    %73 = vector.broadcast %72 : vector<64x1xf32> to vector<64x32xf32>
    %74 = arith.subf %60, %73 : vector<64x32xf32>
    %75 = arith.mulf %74, %74 : vector<64x32xf32>
    %cst_35 = arith.constant dense<0.000000e+00> : vector<64xf32>
    %76 = vector.multi_reduction <add>, %75, %cst_35 [1] : vector<64x32xf32> to vector<64xf32>
    %77 = vector.shape_cast %76 : vector<64xf32> to vector<64x1xf32>
    %cst_36 = arith.constant 3.200000e+01 : f32
    %78 = vector.broadcast %cst_36 : f32 to vector<64x1xf32>
    %79 = arith.divf %77, %78 : vector<64x1xf32>
    %80 = vector.broadcast %72 : vector<64x1xf32> to vector<64x32xf32>
    %81 = arith.subf %60, %80 : vector<64x32xf32>
    %cst_37 = arith.constant 9.99999974E-6 : f32
    %82 = vector.broadcast %cst_37 : f32 to vector<64x1xf32>
    %83 = arith.addf %79, %82 : vector<64x1xf32>
    %84 = math.rsqrt %83 : vector<64x1xf32>
    %85 = vector.broadcast %84 : vector<64x1xf32> to vector<64x32xf32>
    %86 = arith.mulf %81, %85 : vector<64x32xf32>
    %87 = vector.broadcast %67 : vector<1x32xf32> to vector<64x32xf32>
    %88 = arith.mulf %86, %87 : vector<64x32xf32>
    %89 = vector.broadcast %68 : vector<1x32xf32> to vector<64x32xf32>
    %90 = arith.addf %88, %89 : vector<64x32xf32>
    %c4 = arith.constant 4 : index
    %c0_38 = arith.constant 0 : index
    %91 = vector.load %arg5[%c4, %c0_38] : memref<12x64xf32, #tpu.memory_space<vmem>>, vector<1x64xf32>
    %c2 = arith.constant 2 : index
    %c0_39 = arith.constant 0 : index
    %92 = vector.load %arg5[%c2, %c0_39] : memref<12x64xf32, #tpu.memory_space<vmem>>, vector<1x32xf32>
    %c3 = arith.constant 3 : index
    %c0_40 = arith.constant 0 : index
    %93 = vector.load %arg5[%c3, %c0_40] : memref<12x64xf32, #tpu.memory_space<vmem>>, vector<1x32xf32>
    %cst_41 = arith.constant dense<0.000000e+00> : vector<64x64xf32>
    %94 = tpu.matmul %90, %61, %cst_41 {dimension_numbers = #tpu.dot_dimension_numbers<[1], [0], [0], [1], [0, 0, 1, 1], [], []>} : vector<64x32xf32>, vector<32x64xf32>, vector<64x64xf32> -> vector<64x64xf32>
    %95 = vector.broadcast %91 : vector<1x64xf32> to vector<64x64xf32>
    %96 = arith.addf %94, %95 : vector<64x64xf32>
    %cst_42 = arith.constant 5.000000e-01 : f32
    %97 = vector.broadcast %cst_42 : f32 to vector<64x64xf32>
    %98 = arith.mulf %97, %96 : vector<64x64xf32>
    %cst_43 = arith.constant 0.707106769 : f32
    %99 = vector.broadcast %cst_43 : f32 to vector<64x64xf32>
    %100 = arith.mulf %96, %99 : vector<64x64xf32>
    %101 = math.erf %100 : vector<64x64xf32>
    %cst_44 = arith.constant 1.000000e+00 : f32
    %102 = vector.broadcast %cst_44 : f32 to vector<64x64xf32>
    %103 = arith.addf %102, %101 : vector<64x64xf32>
    %104 = arith.mulf %98, %103 : vector<64x64xf32>
    %cst_45 = arith.constant dense<0.000000e+00> : vector<64x32xf32>
    %105 = tpu.matmul %104, %63, %cst_45 {dimension_numbers = #tpu.dot_dimension_numbers<[1], [0], [0], [1], [0, 0, 1, 1], [], []>} : vector<64x64xf32>, vector<64x32xf32>, vector<64x32xf32> -> vector<64x32xf32>
    %106 = vector.broadcast %92 : vector<1x32xf32> to vector<64x32xf32>
    %107 = arith.addf %105, %106 : vector<64x32xf32>
    %cst_46 = arith.constant dense<0.000000e+00> : vector<64x32xf32>
    %108 = tpu.matmul %104, %64, %cst_46 {dimension_numbers = #tpu.dot_dimension_numbers<[1], [0], [0], [1], [0, 0, 1, 1], [], []>} : vector<64x64xf32>, vector<64x32xf32>, vector<64x32xf32> -> vector<64x32xf32>
    %109 = vector.broadcast %93 : vector<1x32xf32> to vector<64x32xf32>
    %110 = arith.addf %108, %109 : vector<64x32xf32>
    %111 = arith.negf %110 : vector<64x32xf32>
    %112 = math.exp %111 : vector<64x32xf32>
    %cst_47 = arith.constant 1.000000e+00 : f32
    %113 = vector.broadcast %cst_47 : f32 to vector<64x32xf32>
    %114 = arith.addf %113, %112 : vector<64x32xf32>
    %115 = arith.divf %113, %114 : vector<64x32xf32>
    %116 = arith.mulf %110, %115 : vector<64x32xf32>
    %117 = arith.mulf %107, %116 : vector<64x32xf32>
    %118 = arith.addf %117, %60 : vector<64x32xf32>
    %c5 = arith.constant 5 : index
    %c0_48 = arith.constant 0 : index
    %119 = vector.load %arg5[%c5, %c0_48] : memref<12x64xf32, #tpu.memory_space<vmem>>, vector<1x32xf32>
    %c6 = arith.constant 6 : index
    %c0_49 = arith.constant 0 : index
    %120 = vector.load %arg5[%c6, %c0_49] : memref<12x64xf32, #tpu.memory_space<vmem>>, vector<1x32xf32>
    %cst_50 = arith.constant dense<0.000000e+00> : vector<64xf32>
    %121 = vector.multi_reduction <add>, %118, %cst_50 [1] : vector<64x32xf32> to vector<64xf32>
    %122 = vector.shape_cast %121 : vector<64xf32> to vector<64x1xf32>
    %cst_51 = arith.constant 3.200000e+01 : f32
    %123 = vector.broadcast %cst_51 : f32 to vector<64x1xf32>
    %124 = arith.divf %122, %123 : vector<64x1xf32>
    %125 = vector.broadcast %124 : vector<64x1xf32> to vector<64x32xf32>
    %126 = arith.subf %118, %125 : vector<64x32xf32>
    %127 = arith.mulf %126, %126 : vector<64x32xf32>
    %cst_52 = arith.constant dense<0.000000e+00> : vector<64xf32>
    %128 = vector.multi_reduction <add>, %127, %cst_52 [1] : vector<64x32xf32> to vector<64xf32>
    %129 = vector.shape_cast %128 : vector<64xf32> to vector<64x1xf32>
    %cst_53 = arith.constant 3.200000e+01 : f32
    %130 = vector.broadcast %cst_53 : f32 to vector<64x1xf32>
    %131 = arith.divf %129, %130 : vector<64x1xf32>
    %132 = vector.broadcast %124 : vector<64x1xf32> to vector<64x32xf32>
    %133 = arith.subf %118, %132 : vector<64x32xf32>
    %cst_54 = arith.constant 9.99999974E-6 : f32
    %134 = vector.broadcast %cst_54 : f32 to vector<64x1xf32>
    %135 = arith.addf %131, %134 : vector<64x1xf32>
    %136 = math.rsqrt %135 : vector<64x1xf32>
    %137 = vector.broadcast %136 : vector<64x1xf32> to vector<64x32xf32>
    %138 = arith.mulf %133, %137 : vector<64x32xf32>
    %139 = vector.broadcast %119 : vector<1x32xf32> to vector<64x32xf32>
    %140 = arith.mulf %138, %139 : vector<64x32xf32>
    %141 = vector.broadcast %120 : vector<1x32xf32> to vector<64x32xf32>
    %142 = arith.addf %140, %141 : vector<64x32xf32>
    %c0_55 = arith.constant 0 : index
    %c0_56 = arith.constant 0 : index
    %143 = vector.load %arg2[%c0_55, %c0_56] : memref<64x64xf32, #tpu.memory_space<vmem>>, vector<64x64xf32>
    %cst_57 = arith.constant dense<0.000000e+00> : vector<64x32xf32>
    %144 = tpu.matmul %143, %142, %cst_57 {dimension_numbers = #tpu.dot_dimension_numbers<[1], [0], [0], [1], [0, 0, 1, 1], [], []>} : vector<64x64xf32>, vector<64x32xf32>, vector<64x32xf32> -> vector<64x32xf32>
    %c9 = arith.constant 9 : index
    %c0_58 = arith.constant 0 : index
    %145 = vector.load %arg5[%c9, %c0_58] : memref<12x64xf32, #tpu.memory_space<vmem>>, vector<1x64xf32>
    %c7 = arith.constant 7 : index
    %c0_59 = arith.constant 0 : index
    %146 = vector.load %arg5[%c7, %c0_59] : memref<12x64xf32, #tpu.memory_space<vmem>>, vector<1x32xf32>
    %c8 = arith.constant 8 : index
    %c0_60 = arith.constant 0 : index
    %147 = vector.load %arg5[%c8, %c0_60] : memref<12x64xf32, #tpu.memory_space<vmem>>, vector<1x32xf32>
    %cst_61 = arith.constant dense<0.000000e+00> : vector<64x64xf32>
    %148 = tpu.matmul %144, %62, %cst_61 {dimension_numbers = #tpu.dot_dimension_numbers<[1], [0], [0], [1], [0, 0, 1, 1], [], []>} : vector<64x32xf32>, vector<32x64xf32>, vector<64x64xf32> -> vector<64x64xf32>
    %149 = vector.broadcast %145 : vector<1x64xf32> to vector<64x64xf32>
    %150 = arith.addf %148, %149 : vector<64x64xf32>
    %cst_62 = arith.constant 5.000000e-01 : f32
    %151 = vector.broadcast %cst_62 : f32 to vector<64x64xf32>
    %152 = arith.mulf %151, %150 : vector<64x64xf32>
    %cst_63 = arith.constant 0.707106769 : f32
    %153 = vector.broadcast %cst_63 : f32 to vector<64x64xf32>
    %154 = arith.mulf %150, %153 : vector<64x64xf32>
    %155 = math.erf %154 : vector<64x64xf32>
    %cst_64 = arith.constant 1.000000e+00 : f32
    %156 = vector.broadcast %cst_64 : f32 to vector<64x64xf32>
    %157 = arith.addf %156, %155 : vector<64x64xf32>
    %158 = arith.mulf %152, %157 : vector<64x64xf32>
    %cst_65 = arith.constant dense<0.000000e+00> : vector<64x32xf32>
    %159 = tpu.matmul %158, %65, %cst_65 {dimension_numbers = #tpu.dot_dimension_numbers<[1], [0], [0], [1], [0, 0, 1, 1], [], []>} : vector<64x64xf32>, vector<64x32xf32>, vector<64x32xf32> -> vector<64x32xf32>
    %160 = vector.broadcast %146 : vector<1x32xf32> to vector<64x32xf32>
    %161 = arith.addf %159, %160 : vector<64x32xf32>
    %cst_66 = arith.constant dense<0.000000e+00> : vector<64x32xf32>
    %162 = tpu.matmul %158, %66, %cst_66 {dimension_numbers = #tpu.dot_dimension_numbers<[1], [0], [0], [1], [0, 0, 1, 1], [], []>} : vector<64x64xf32>, vector<64x32xf32>, vector<64x32xf32> -> vector<64x32xf32>
    %163 = vector.broadcast %147 : vector<1x32xf32> to vector<64x32xf32>
    %164 = arith.addf %162, %163 : vector<64x32xf32>
    %165 = arith.negf %164 : vector<64x32xf32>
    %166 = math.exp %165 : vector<64x32xf32>
    %cst_67 = arith.constant 1.000000e+00 : f32
    %167 = vector.broadcast %cst_67 : f32 to vector<64x32xf32>
    %168 = arith.addf %167, %166 : vector<64x32xf32>
    %169 = arith.divf %167, %168 : vector<64x32xf32>
    %170 = arith.mulf %164, %169 : vector<64x32xf32>
    %171 = arith.mulf %161, %170 : vector<64x32xf32>
    %172 = arith.addf %171, %118 : vector<64x32xf32>
    %c0_68 = arith.constant 0 : index
    %c0_69 = arith.constant 0 : index
    %173 = vector.load %arg8[%c0_68, %c0_69] : memref<64x32xf32, #tpu.memory_space<vmem>>, vector<64x32xf32>
    tpu.vector_store %arg8[%c0_68, %c0_69], %172 {strides = array<i32>} : memref<64x32xf32, #tpu.memory_space<vmem>>, vector<64x32xf32>,
    return
  }
  func.func @transform_0(%arg0: i32) -> (i32, i32) {
    %c0_i32 = arith.constant 0 : i32
    %c0_i32_0 = arith.constant 0 : i32
    return %arg0, %c0_i32 : i32, i32
  }
  func.func @transform_1(%arg0: i32) -> (i32, i32) {
    %c0_i32 = arith.constant 0 : i32
    %c0_i32_0 = arith.constant 0 : i32
    %c0_i32_1 = arith.constant 0 : i32
    return %c0_i32, %c0_i32_0 : i32, i32
  }
  func.func @transform_2(%arg0: i32) -> (i32, i32) {
    %c0_i32 = arith.constant 0 : i32
    %c0_i32_0 = arith.constant 0 : i32
    %c0_i32_1 = arith.constant 0 : i32
    return %c0_i32, %c0_i32_0 : i32, i32
  }
  func.func @transform_3(%arg0: i32) -> (i32, i32) {
    %c0_i32 = arith.constant 0 : i32
    %c0_i32_0 = arith.constant 0 : i32
    %c0_i32_1 = arith.constant 0 : i32
    return %c0_i32, %c0_i32_0 : i32, i32
  }
  func.func @transform_4(%arg0: i32) -> (i32, i32) {
    %c0_i32 = arith.constant 0 : i32
    %c0_i32_0 = arith.constant 0 : i32
    %c0_i32_1 = arith.constant 0 : i32
    return %c0_i32, %c0_i32_0 : i32, i32
  }
  func.func @transform_5(%arg0: i32) -> (i32, i32) {
    %c0_i32 = arith.constant 0 : i32
    %c0_i32_0 = arith.constant 0 : i32
    %c0_i32_1 = arith.constant 0 : i32
    return %c0_i32, %c0_i32_0 : i32, i32
  }
  func.func @transform_6(%arg0: i32) -> (i32, i32, i32) {
    %c0_i32 = arith.constant 0 : i32
    %c0_i32_0 = arith.constant 0 : i32
    %c0_i32_1 = arith.constant 0 : i32
    %c0_i32_2 = arith.constant 0 : i32
    return %c0_i32, %c0_i32_0, %c0_i32_1 : i32, i32, i32
  }
  func.func @transform_7(%arg0: i32) -> (i32, i32) {
    %c0_i32 = arith.constant 0 : i32
    %c0_i32_0 = arith.constant 0 : i32
    return %arg0, %c0_i32 : i32, i32
  }
}

</mosaic_0001>

<bundles_post_ra>
// kernel: mixer_layer_wg.1
= control target key start
LH: loop header
LB: loop body
LE: loop exit
PB: predicated region body
PF: predicated region fallthrough
CT: control target
= control target key end

     0   :  { %vm37_vm0 = vcmask 261120   ;;  %s5973_s0 = inlined_call_operand.vmem [shape: f32[64,32], index: 0, kind: input, shape index: {}]   ;;  %s5974_s1 = inlined_call_operand.vmem [shape: f32[64,64], index: 1, kind: input, shape index: {}]   ;;  %s5975_s2 = inlined_call_operand.vmem [shape: f32[64,64], index: 2, kind: input, shape index: {}]   ;;  %s5976_s3 = inlined_call_operand.vmem [shape: f32[256,32], index: 3, kind: input, shape index: {}]   ;;  %s5977_s4 = inlined_call_operand.vmem [shape: f32[12,64], index: 4, kind: input, shape index: {}]   ;;  %s5978_s5 = inlined_call_operand.vmem [shape: f32[32,16], index: 5, kind: input, shape index: {}]   ;;  %s5979_s6 = inlined_call_operand.vmem [shape: f32[1,32,32], index: 6, kind: input, shape index: {}]   ;;  %s5980_s7 = inlined_call_operand.hbm [shape: f32[64,32], index: 7, kind: output, shape index: {}]  }
   0x1   :  { %v29_v0 = vld [vmem:[%s5973_s0 + $0x10] sm:$0xff]  ;;  %v27_v1 = vld [vmem:[%s5973_s0] sm:$0xff]  ;;  %v30_v4 = vld [vmem:[%s5973_s0 + $0x18] sm:$0xff] }
   0x2   :  { %v44_v2 = vsel %vm37_vm0, %v29_v0, 0.0  ;;  %v38_v3 = vsel %vm37_vm0, %v27_v1, 0.0  ;;  %v28_v5 = vld [vmem:[%s5973_s0 + $0x8] sm:$0xff]  ;;  %v47_v6 = vsel %vm37_vm0, %v30_v4, 0.0 }
   0x3   :  { %45 = vadd.xlane.f32.xlu1 %v44_v2  ;;  %39 = vadd.xlane.f32.xlu0 %v38_v3 }
   0x4   :  { %48 = vadd.xlane.f32.xlu2 %v47_v6 }
   0x5   :  { %12 = vsyncpa [#allocation3], 0  ;;  %v41_v7 = vsel %vm37_vm0, %v28_v5, 0.0  ;;  %v31_v8 = vld [vmem:[%s5973_s0 + $0x20] sm:$0xff]  ;;  %v3857_v10 = vmov 32.0   ;;  %v33_v29 = vld [vmem:[%s5973_s0 + $0x30] sm:$0xff] }
   0x6   :  { %v50_v9 = vsel %vm37_vm0, %v31_v8, 0.0  ;;  %3611 = vrcp.f32 %v3857_v10  ;;  %v56_v31 = vsel %vm37_vm0, %v33_v29, 0.0  ;;  %v34_v38 = vld [vmem:[%s5973_s0 + $0x38] sm:$0xff]  ;;  %v32_v39 = vld [vmem:[%s5973_s0 + $0x28] sm:$0xff]  ;;  %vm245_vm9 = vcmask 64512   ;;  %s3439_s17 = sshll.u32 %s5980_s7, 4  ;;  %s3440_s17 = int_to_ptr.hbm [resolvable:$true] %s3439_s17 }
   0x7   :  { %v59_v42 = vsel %vm37_vm0, %v34_v38, 0.0  ;;  %v53_v43 = vsel %vm37_vm0, %v32_v39, 0.0  ;;  %s3859_s18 = smov 128  }
   0xb   :  { %42 = vadd.xlane.f32.xlu0 %v41_v7 }
   0xc   :  { %v3612_v11 = vpop.eup %3611 }
   0xd   :  { %v63_v12 = vmul.f32 32.0, %v3612_v11  ;;  %vm67_vm1 = vweird.f32 %v3612_v11 }
   0xf   :  { %v64_v13 = vsub.f32 1.0, %v63_v12 }
  0x11   :  { %v65_v14 = vmul.f32 %v3612_v11, %v64_v13 }
  0x13   :  { %51 = vadd.xlane.f32.xlu0 %v50_v9  ;;  %v66_v15 = vadd.f32 %v3612_v11, %v65_v14 }
  0x15   :  { %v3921_v16 = vsel %vm67_vm1, %v3612_v11, %v66_v15 }
  0x76   :  { %v46_v17 = vpop.xlane.xlu1 %45  ;;  %v40_v18 = vpop.xlane.xlu0 %39 }
  0x77   :  { %v71_v19 = vmul.f32 %v3921_v16, %v46_v17  ;;  %v69_v20 = vmul.f32 %v3921_v16, %v40_v18  ;;  %v49_v33 = vpop.xlane.xlu2 %48 }
  0x78   :  { %v72_v37 = vmul.f32 %v3921_v16, %v49_v33 }
  0x79   :  { %v3925_v21 = vsub.f32 %v29_v0, %v71_v19  ;;  %v3927_v22 = vsub.f32 %v27_v1, %v69_v20 }
  0x7a   :  { %v3955_v41 = vsub.f32 %v30_v4, %v72_v37 }
  0x7b   :  { %v87_v23 = vmul.f32 %v3925_v21, %v3925_v21  ;;  %v85_v24 = vmul.f32 %v3927_v22, %v3927_v22 }
  0x7c   :  { %v88_v46 = vmul.f32 %v3955_v41, %v3955_v41 }
  0x7d   :  { %v99_v25 = vsel %vm37_vm0, %v87_v23, 0.0  ;;  %v93_v26 = vsel %vm37_vm0, %v85_v24, 0.0 }
  0x7e   :  { %100 = vadd.xlane.f32.xlu0 %v99_v25  ;;  %94 = vadd.xlane.f32.xlu1 %v93_v26  ;;  %v43_v27 = vpop.xlane.xlu0 %42  ;;  %v102_v47 = vsel %vm37_vm0, %v88_v46, 0.0  ;;  %v3988_v25 = vld [vmem:[%s5977_s4 + $0xa] ss:$0 sm:$0xff] }
  0x7f   :  { %v70_v28 = vmul.f32 %v3921_v16, %v43_v27 }
  0x81   :  { %v3939_v30 = vsub.f32 %v28_v5, %v70_v28 }
  0x83   :  { %v86_v32 = vmul.f32 %v3939_v30, %v3939_v30 }
  0x85   :  { %v96_v34 = vsel %vm37_vm0, %v86_v32, 0.0 }
  0x86   :  { %57 = vadd.xlane.f32.xlu1 %v56_v31  ;;  %97 = vadd.xlane.f32.xlu2 %v96_v34  ;;  %v52_v35 = vpop.xlane.xlu0 %51  ;;  %v4001_v34 = vld [vmem:[%s5977_s4 + $0xb] ss:$0 sm:$0xff] }
  0x87   :  { %v73_v36 = vmul.f32 %v3921_v16, %v52_v35 }
  0x89   :  { %v3953_v40 = vsub.f32 %v31_v8, %v73_v36 }
  0x8b   :  { %v89_v44 = vmul.f32 %v3953_v40, %v3953_v40 }
  0x8d   :  { %v105_v45 = vsel %vm37_vm0, %v89_v44, 0.0  ;;  %v4011_v44 = vld [vmem:[%s5978_s5] sm:$0xff] }
  0x8e   :  { %60 = vadd.xlane.f32.xlu1 %v59_v42  ;;  %54 = vadd.xlane.f32.xlu2 %v53_v43 }
  0x8f   :  { %106 = vadd.xlane.f32.xlu0 %v105_v45 }
  0x96   :  { %103 = vadd.xlane.f32.xlu2 %v102_v47 }
  0xf1   :  { %v95_v48 = vpop.xlane.xlu1 %94  ;;  %v101_v49 = vpop.xlane.xlu0 %100 }
  0xf2   :  { %v117_v50 = vmul.f32 %v95_v48, %v3921_v16  ;;  %v119_v51 = vmul.f32 %v101_v49, %v3921_v16 }
  0xf4   :  { %v125_v52 = vadd.f32 1e-05, %v117_v50  ;;  %v127_v53 = vadd.f32 1e-05, %v119_v51 }
  0xf6   :  { %3613 = vrsqrt.f32 %v125_v52  ;;  %vm139_vm2 = vweird.f32 %v125_v52  ;;  %vm159_vm4 = vweird.f32 %v127_v53 }
  0xf7   :  { %3615 = vrsqrt.f32 %v127_v53 }
  0xf9   :  { %v58_v54 = vpop.xlane.xlu1 %57  ;;  %v98_v55 = vpop.xlane.xlu2 %97 }
  0xfa   :  { %v75_v56 = vmul.f32 %v3921_v16, %v58_v54  ;;  %v118_v57 = vmul.f32 %v98_v55, %v3921_v16 }
  0xfc   :  { %v3614_v58 = vpop.eup %3613  ;;  %v3969_v59 = vsub.f32 %v33_v29, %v75_v56  ;;  %v126_v60 = vadd.f32 1e-05, %v118_v57  ;;  %v4023_v57 = vld [vmem:[%s5978_s5 + $0x8] sm:$0xff] }
  0xfd   :  { %v3616_v61 = vpop.eup %3615  ;;  %v134_v62 = vmul.f32 %v3614_v58, %v125_v52  ;;  %vm140_vm3 = vweird.f32 %v3614_v58 }
  0xfe   :  { %v154_v63 = vmul.f32 %v3616_v61, %v127_v53  ;;  %3617 = vrsqrt.f32 %v126_v60  ;;  %v91_v1 = vmul.f32 %v3969_v59, %v3969_v59  ;;  %vm160_vm5 = vweird.f32 %v3616_v61  ;;  %vm141_vm6 = vmor %vm139_vm2, %vm140_vm3 }
  0xff   :  { %v135_v0 = vmul.f32 %v3614_v58, %v134_v62  ;;  %vm3991_vm7 = vmor %vm159_vm4, %vm160_vm5  ;;  %vm149_vm10 = vweird.f32 %v126_v60 }
 0x100   :  { %v155_v2 = vmul.f32 %v3616_v61, %v154_v63  ;;  %v111_v4 = vsel %vm37_vm0, %v91_v1, 0.0 }
 0x101   :  { %v136_v3 = vmul.f32 0.5, %v135_v0  ;;  %v61_v5 = vpop.xlane.xlu1 %60  ;;  %v55_v6 = vpop.xlane.xlu2 %54  ;;  %112 = vadd.xlane.f32.xlu1 %v111_v4 }
 0x102   :  { %v156_v7 = vmul.f32 0.5, %v155_v2  ;;  %v76_v8 = vmul.f32 %v3921_v16, %v61_v5  ;;  %v74_v9 = vmul.f32 %v3921_v16, %v55_v6  ;;  %v107_v10 = vpop.xlane.xlu0 %106 }
 0x103   :  { %v137_v11 = vsub.f32 1.5, %v136_v3  ;;  %v121_v12 = vmul.f32 %v107_v10, %v3921_v16 }
 0x104   :  { %v3618_v13 = vpop.eup %3617  ;;  %v157_v14 = vsub.f32 1.5, %v156_v7  ;;  %v3977_v15 = vsub.f32 %v34_v38, %v76_v8  ;;  %v3979_v17 = vsub.f32 %v32_v39, %v74_v9 }
 0x105   :  { %v144_v18 = vmul.f32 %v3618_v13, %v126_v60  ;;  %v129_v19 = vadd.f32 1e-05, %v121_v12  ;;  %v138_v20 = vmul.f32 %v3614_v58, %v137_v11  ;;  %vm150_vm8 = vweird.f32 %v3618_v13 }
 0x106   :  { %v90_v23 = vmul.f32 %v3979_v17, %v3979_v17  ;;  %v92_v24 = vmul.f32 %v3977_v15, %v3977_v15  ;;  %v158_v26 = vmul.f32 %v3616_v61, %v157_v14  ;;  %vm151_vm11 = vmor %vm149_vm10, %vm150_vm8 }
 0x107   :  { %v145_v27 = vmul.f32 %v3618_v13, %v144_v18  ;;  %3619 = vrsqrt.f32 %v129_v19  ;;  %v142_v28 = vsel %vm141_vm6, %v3614_v58, %v138_v20  ;;  %vm179_vm12 = vweird.f32 %v129_v19 }
 0x108   :  { %v108_v31 = vsel %vm37_vm0, %v90_v23, 0.0  ;;  %v114_v32 = vsel %vm37_vm0, %v92_v24, 0.0  ;;  %v213_v33 = vmul.f32 %v142_v28, %v3927_v22  ;;  %v162_v39 = vsel %vm3991_vm7, %v3616_v61, %v158_v26 }
 0x109   :  { %v146_v35 = vmul.f32 0.5, %v145_v27  ;;  %109 = vadd.xlane.f32.xlu2 %v108_v31  ;;  %v104_v36 = vpop.xlane.xlu2 %103  ;;  %115 = vadd.xlane.f32.xlu0 %v114_v32  ;;  %v215_v47 = vmul.f32 %v162_v39, %v3925_v21 }
 0x10a   :  { %v120_v37 = vmul.f32 %v104_v36, %v3921_v16  ;;  %v222_v38 = vmul.f32 %v3988_v25, %v213_v33 }
 0x10b   :  { %v147_v42 = vsub.f32 1.5, %v146_v35  ;;  %v224_v54 = vmul.f32 %v3988_v25, %v215_v47 }
 0x10c   :  { %v128_v43 = vadd.f32 1e-05, %v120_v37  ;;  %v231_v22 = vadd.f32 %v4001_v34, %v222_v38 }
 0x10d   :  { %v3620_v45 = vpop.eup %3619  ;;  %v148_v46 = vmul.f32 %v3618_v13, %v147_v42 }
 0x10e   :  { %v174_v48 = vmul.f32 %v3620_v45, %v129_v19  ;;  %3621 = vrsqrt.f32 %v128_v43  ;;  %267 = vmatpush.msra.mxu3 %v231_v22  ;;  %vm180_vm13 = vweird.f32 %v3620_v45  ;;  %vm169_vm15 = vweird.f32 %v128_v43 }
 0x10f   :  { %3451 = vmatmul.msk.f32.vlgmr.msra.gmra.mxu3 %vm245_vm9, %v4011_v44  ;;  %v152_v49 = vsel %vm151_vm11, %v3618_v13, %v148_v46  ;;  %vm181_vm14 = vmor %vm179_vm12, %vm180_vm13  ;;  %v4059_v46 = vld [vmem:[%s5979_s6] sm:$0xff] }
 0x110   :  { %v175_v50 = vmul.f32 %v3620_v45, %v174_v48  ;;  %v214_v51 = vmul.f32 %v152_v49, %v3939_v30  ;;  %v233_v30 = vadd.f32 %v4001_v34, %v224_v54 }
 0x112   :  { %v176_v52 = vmul.f32 0.5, %v175_v50  ;;  %v223_v53 = vmul.f32 %v3988_v25, %v214_v51 }
 0x114   :  { %v3622_v55 = vpop.eup %3621  ;;  %v177_v21 = vsub.f32 1.5, %v176_v52  ;;  %v232_v56 = vadd.f32 %v4001_v34, %v223_v53 }
 0x115   :  { %v164_v58 = vmul.f32 %v3622_v55, %v128_v43  ;;  %vm170_vm1 = vweird.f32 %v3622_v55 }
 0x116   :  { %290 = vmatpush.msrb.mxu3 %v232_v56  ;;  %v178_v60 = vmul.f32 %v3620_v45, %v177_v21  ;;  %vm171_vm2 = vmor %vm169_vm15, %vm170_vm1 }
 0x117   :  { %v165_v61 = vmul.f32 %v3622_v55, %v164_v58  ;;  %3452 = vmatmul.msk.f32.gmra.mxu3 %vm245_vm9, %v4023_v57 }
 0x118   :  { %313 = vmatpush.msra.mxu3 %v233_v30  ;;  %v182_v62 = vsel %vm181_vm14, %v3620_v45, %v178_v60 }
 0x119   :  { %v166_v63 = vmul.f32 0.5, %v165_v61  ;;  %v217_v0 = vmul.f32 %v182_v62, %v3953_v40 }
 0x11b   :  { %v167_v1 = vsub.f32 1.5, %v166_v63  ;;  %v226_v2 = vmul.f32 %v3988_v25, %v217_v0 }
 0x11d   :  { %v168_v3 = vmul.f32 %v3622_v55, %v167_v1  ;;  %v235_v4 = vadd.f32 %v4001_v34, %v226_v2 }
 0x11f   :  { %v172_v5 = vsel %vm171_vm2, %v3622_v55, %v168_v3  ;;  %359 = vmatpush.msra.mxu0 %v235_v4  ;;  %3453 = vmatmul.msk.f32.vlgmr.msrb.gmra.mxu3 %vm245_vm9, %v4011_v44 }
 0x120   :  { %v216_v6 = vmul.f32 %v172_v5, %v3955_v41  ;;  %3459 = vmatmul.msk.f32.vlgmr.msra.gmra.mxu0 %vm245_vm9, %v4011_v44 }
 0x122   :  { %v225_v7 = vmul.f32 %v3988_v25, %v216_v6 }
 0x124   :  { %v234_v40 = vadd.f32 %v4001_v34, %v225_v7 }
 0x126   :  { %336 = vmatpush.msrb.mxu3 %v234_v40 }
 0x127   :  { %3454 = vmatmul.msk.f32.gmra.mxu3 %vm245_vm9, %v4023_v57 }
 0x128   :  { %3460 = vmatmul.msk.f32.gmra.mxu0 %vm245_vm9, %v4023_v57 }
 0x12f   :  { %3455 = vmatmul.msk.f32.vlgmr.msra.gmra.mxu3 %vm245_vm9, %v4011_v44 }
 0x137   :  { %3456 = vmatmul.msk.f32.gmra.mxu3 %vm245_vm9, %v4023_v57 }
 0x13f   :  { %3457 = vmatmul.msk.f32.vlgmr.msrb.gmra.mxu3 %vm245_vm9, %v4011_v44 }
 0x147   :  { %3458 = vmatmul.msk.f32.gmra.mxu3 %vm245_vm9, %v4023_v57 }
 0x174   :  { %v113_v41 = vpop.xlane.xlu1 %112 }
 0x175   :  { %v123_v8 = vmul.f32 %v113_v41, %v3921_v16 }
 0x177   :  { %v131_v9 = vadd.f32 1e-05, %v123_v8 }
 0x179   :  { %3623 = vrsqrt.f32 %v131_v9  ;;  %vm199_vm4 = vweird.f32 %v131_v9 }
 0x17c   :  { %v110_v10 = vpop.xlane.xlu2 %109  ;;  %v116_v11 = vpop.xlane.xlu0 %115 }
 0x17d   :  { %v122_v12 = vmul.f32 %v110_v10, %v3921_v16  ;;  %v124_v13 = vmul.f32 %v116_v11, %v3921_v16 }
 0x17f   :  { %v130_v14 = vadd.f32 1e-05, %v122_v12  ;;  %v132_v18 = vadd.f32 1e-05, %v124_v13  ;;  %v3624_v19 = vpop.eup %3623 }
 0x180   :  { %v194_v20 = vmul.f32 %v3624_v19, %v131_v9  ;;  %vm200_vm3 = vweird.f32 %v3624_v19 }
 0x181   :  { %3625 = vrsqrt.f32 %v130_v14  ;;  %vm201_vm5 = vmor %vm199_vm4, %vm200_vm3  ;;  %vm189_vm8 = vweird.f32 %v130_v14  ;;  %vm209_vm11 = vweird.f32 %v132_v18 }
 0x182   :  { %3627 = vrsqrt.f32 %v132_v18  ;;  %v195_v23 = vmul.f32 %v3624_v19, %v194_v20 }
 0x184   :  { %v196_v24 = vmul.f32 0.5, %v195_v23 }
 0x186   :  { %v197_v27 = vsub.f32 1.5, %v196_v24 }
 0x187   :  { %v3626_v26 = vpop.eup %3625 }
 0x188   :  { %v3628_v28 = vpop.eup %3627  ;;  %v184_v29 = vmul.f32 %v3626_v26, %v130_v14  ;;  %v198_v32 = vmul.f32 %v3624_v19, %v197_v27  ;;  %vm190_vm6 = vweird.f32 %v3626_v26 }
 0x189   :  { %v204_v31 = vmul.f32 %v3628_v28, %v132_v18  ;;  %vm210_vm7 = vweird.f32 %v3628_v28  ;;  %vm191_vm10 = vmor %vm189_vm8, %vm190_vm6 }
 0x18a   :  { %v185_v33 = vmul.f32 %v3626_v26, %v184_v29  ;;  %v202_v36 = vsel %vm201_vm5, %v3624_v19, %v198_v32  ;;  %vm211_vm12 = vmor %vm209_vm11, %vm210_vm7 }
 0x18b   :  { %v205_v35 = vmul.f32 %v3628_v28, %v204_v31  ;;  %v219_v38 = vmul.f32 %v202_v36, %v3969_v59 }
 0x18c   :  { %v186_v37 = vmul.f32 0.5, %v185_v33 }
 0x18d   :  { %v206_v39 = vmul.f32 0.5, %v205_v35  ;;  %v228_v43 = vmul.f32 %v3988_v25, %v219_v38 }
 0x18e   :  { %v187_v42 = vsub.f32 1.5, %v186_v37 }
 0x18f   :  { %v207_v22 = vsub.f32 1.5, %v206_v39  ;;  %v237_v45 = vadd.f32 %v4001_v34, %v228_v43 }
 0x190   :  { %v188_v47 = vmul.f32 %v3626_v26, %v187_v42 }
 0x191   :  { %v208_v48 = vmul.f32 %v3628_v28, %v207_v22  ;;  %405 = vmatpush.msra.mxu2 %v237_v45 }
 0x192   :  { %v269_v59 = vpop.f32.mrf.mxu3  ;;  %v192_v49 = vsel %vm191_vm10, %v3626_v26, %v188_v47  ;;  %3463 = vmatmul.msk.f32.vlgmr.msra.gmra.mxu2 %vm245_vm9, %v4011_v44 }
 0x193   :  { %v212_v50 = vsel %vm211_vm12, %v3628_v28, %v208_v48  ;;  %v4062_v51 = vadd.f32 %v269_v59, %v4059_v46  ;;  %v218_v52 = vmul.f32 %v192_v49, %v3979_v17  ;;  %v4080_v17 = vld [vmem:[%s5979_s6 + $0x8] sm:$0xff] }
 0x194   :  { %v220_v53 = vmul.f32 %v212_v50, %v3977_v15 }
 0x195   :  { %v4069_v54 = vmul.f32 0.70710677, %v4062_v51  ;;  %v227_v55 = vmul.f32 %v3988_v25, %v218_v52 }
 0x196   :  { %v229_v21 = vmul.f32 %v3988_v25, %v220_v53 }
 0x197   :  { %v468_v56 = vmul.f32 %v4069_v54, %v4069_v54  ;;  %v236_v58 = vadd.f32 %v4001_v34, %v227_v55 }
 0x198   :  { %v238_v30 = vadd.f32 %v4001_v34, %v229_v21 }
 0x199   :  { %v4082_v15 = vmin.f32 %v468_v56, 16.0  ;;  %382 = vmatpush.msra.mxu1 %v236_v58 }
 0x19a   :  { %428 = vmatpush.msra.mxu3 %v238_v30  ;;  %v272_v60 = vpop.f32.mrf.mxu3  ;;  %3461 = vmatmul.msk.f32.vlgmr.msra.gmra.mxu1 %vm245_vm9, %v4011_v44 }
 0x19b   :  { %v4087_v25 = vadd.f32 %v272_v60, %v4080_v17  ;;  %3464 = vmatmul.msk.f32.gmra.mxu2 %vm245_vm9, %v4023_v57  ;;  %3465 = vmatmul.msk.f32.vlgmr.msra.gmra.mxu3 %vm245_vm9, %v4011_v44  ;;  %v470_v34 = vmul.f32 2.1237322e-06, %v4082_v15  ;;  %v481_v37 = vmul.f32 3.8918573e-05, %v4082_v15 }
 0x19d   :  { %v4095_v61 = vmul.f32 0.70710677, %v4087_v25  ;;  %v361_v62 = vpop.f32.mrf.mxu0  ;;  %v471_v2 = vadd.f32 0.00028619796, %v470_v34  ;;  %v482_v52 = vadd.f32 0.001143296, %v481_v37 }
 0x19e   :  { %v4098_v63 = vadd.f32 %v361_v62, %v4059_v46 }
 0x19f   :  { %v508_v0 = vmul.f32 %v4095_v61, %v4095_v61  ;;  %v472_v40 = vmul.f32 %v471_v2, %v4082_v15 }
 0x1a0   :  { %v4103_v1 = vmul.f32 0.70710677, %v4098_v63 }
 0x1a1   :  { %v4105_v3 = vmin.f32 %v508_v0, 16.0  ;;  %v473_v19 = vadd.f32 0.0036580483, %v472_v40 }
 0x1a2   :  { %v292_v4 = vpop.f32.mrf.mxu3  ;;  %3462 = vmatmul.msk.f32.gmra.mxu1 %vm245_vm9, %v4023_v57  ;;  %v788_v44 = vmul.f32 %v4103_v1, %v4103_v1 }
 0x1a3   :  { %v510_v5 = vmul.f32 2.1237322e-06, %v4105_v3  ;;  %v4113_v6 = vadd.f32 %v292_v4, %v4059_v46  ;;  %3466 = vmatmul.msk.f32.gmra.mxu3 %vm245_vm9, %v4023_v57  ;;  %v521_v13 = vmul.f32 3.8918573e-05, %v4105_v3  ;;  %v474_v38 = vmul.f32 %v473_v19, %v4082_v15 }
 0x1a4   :  { %v4117_v7 = vmin.f32 %v788_v44, 16.0 }
 0x1a5   :  { %v511_v41 = vadd.f32 0.00028619796, %v510_v5  ;;  %v364_v8 = vpop.f32.mrf.mxu0  ;;  %v4121_v9 = vmul.f32 0.70710677, %v4113_v6  ;;  %v522_v32 = vadd.f32 0.001143296, %v521_v13 }
 0x1a6   :  { %v801_v10 = vmul.f32 3.8918573e-05, %v4117_v7  ;;  %v4125_v11 = vadd.f32 %v364_v8, %v4080_v17  ;;  %v790_v14 = vmul.f32 2.1237322e-06, %v4117_v7  ;;  %v475_v53 = vadd.f32 0.05243302, %v474_v38 }
 0x1a7   :  { %v512_v12 = vmul.f32 %v511_v41, %v4105_v3  ;;  %v548_v57 = vmul.f32 %v4121_v9, %v4121_v9  ;;  %v523_v48 = vmul.f32 %v522_v32, %v4105_v3  ;;  %v483_v8 = vmul.f32 %v482_v52, %v4082_v15 }
 0x1a8   :  { %v802_v18 = vadd.f32 0.001143296, %v801_v10  ;;  %v4133_v20 = vmul.f32 0.70710677, %v4125_v11  ;;  %v791_v27 = vadd.f32 0.00028619796, %v790_v14  ;;  %v476_v10 = vmul.f32 %v475_v53, %v4082_v15 }
 0x1a9   :  { %v513_v23 = vadd.f32 0.0036580483, %v512_v12  ;;  %v4135_v24 = vmin.f32 %v548_v57, 16.0  ;;  %v524_v4 = vadd.f32 0.014752088, %v523_v48 }
 0x1aa   :  { %v295_v26 = vpop.f32.mrf.mxu3  ;;  %v803_v28 = vmul.f32 %v802_v18, %v4117_v7  ;;  %v828_v31 = vmul.f32 %v4133_v20, %v4133_v20  ;;  %v792_v35 = vmul.f32 %v791_v27, %v4117_v7 }
 0x1ab   :  { %v4139_v29 = vadd.f32 %v295_v26, %v4080_v17  ;;  %v550_v33 = vmul.f32 2.1237322e-06, %v4135_v24  ;;  %v514_v42 = vmul.f32 %v513_v23, %v4105_v3  ;;  %v525_v23 = vmul.f32 %v524_v4, %v4105_v3 }
 0x1ac   :  { %v804_v36 = vadd.f32 0.014752088, %v803_v28  ;;  %v4147_v39 = vmin.f32 %v828_v31, 16.0  ;;  %v793_v49 = vadd.f32 0.0036580483, %v792_v35 }
 0x1ad   :  { %v551_v43 = vadd.f32 0.00028619796, %v550_v33  ;;  %v4151_v22 = vmul.f32 0.70710677, %v4139_v29  ;;  %v515_v56 = vadd.f32 0.05243302, %v514_v42 }
 0x1ae   :  { %v805_v45 = vmul.f32 %v804_v36, %v4117_v7  ;;  %v830_v47 = vmul.f32 2.1237322e-06, %v4147_v39  ;;  %v841_v21 = vmul.f32 3.8918573e-05, %v4147_v39  ;;  %v794_v5 = vmul.f32 %v793_v49, %v4117_v7 }
 0x1af   :  { %v588_v59 = vmul.f32 %v4151_v22, %v4151_v22  ;;  %v552_v58 = vmul.f32 %v551_v43, %v4135_v24  ;;  %v516_v12 = vmul.f32 %v515_v56, %v4105_v3  ;;  %v484_v33 = vadd.f32 0.014752088, %v483_v8 }
 0x1b0   :  { %v806_v50 = vadd.f32 0.112945676, %v805_v45  ;;  %v831_v55 = vadd.f32 0.00028619796, %v830_v47  ;;  %v842_v2 = vadd.f32 0.001143296, %v841_v21 }
 0x1b1   :  { %v4160_v30 = vmin.f32 %v588_v59, 16.0  ;;  %v553_v13 = vadd.f32 0.0036580483, %v552_v58  ;;  %v795_v27 = vadd.f32 0.05243302, %v794_v5  ;;  %v485_v49 = vmul.f32 %v484_v33, %v4082_v15 }
 0x1b2   :  { %v807_v60 = vmul.f32 %v806_v50, %v4117_v7  ;;  %v315_v34 = vpop.f32.mrf.mxu3  ;;  %v832_v0 = vmul.f32 %v831_v55, %v4147_v39  ;;  %v843_v41 = vmul.f32 %v842_v2, %v4147_v39  ;;  %v477_v35 = vadd.f32 0.18741608, %v476_v10 }
 0x1b3   :  { %v4164_v62 = vadd.f32 %v315_v34, %v4059_v46  ;;  %v590_v44 = vmul.f32 2.1237322e-06, %v4160_v30  ;;  %v554_v36 = vmul.f32 %v553_v13, %v4135_v24  ;;  %v517_v38 = vadd.f32 0.18741608, %v516_v12 }
 0x1b4   :  { %v808_v40 = vadd.f32 0.4994258, %v807_v60  ;;  %v833_v18 = vadd.f32 0.0036580483, %v832_v0  ;;  %v844_v19 = vadd.f32 0.014752088, %v843_v41  ;;  %v796_v47 = vmul.f32 %v795_v27, %v4117_v7 }
 0x1b5   :  { %v4175_v14 = vmul.f32 0.70710677, %v4164_v62  ;;  %v591_v26 = vadd.f32 0.00028619796, %v590_v44  ;;  %v526_v43 = vadd.f32 0.112945676, %v525_v23  ;;  %v478_v52 = vmul.f32 %v477_v35, %v4082_v15 }
 0x1b6   :  { %v809_v57 = vmul.f32 %v808_v40, %v4117_v7  ;;  %v834_v31 = vmul.f32 %v833_v18, %v4147_v39  ;;  %v845_v32 = vmul.f32 %v844_v19, %v4147_v39  ;;  %v4190_v50 = vmul.f32 0.5, %v4062_v51 }
 0x1b7   :  { %v628_v42 = vmul.f32 %v4175_v14, %v4175_v14  ;;  %v592_v45 = vmul.f32 %v591_v26, %v4160_v30  ;;  %v555_v53 = vadd.f32 0.05243302, %v554_v36  ;;  %v527_v60 = vmul.f32 %v526_v43, %v4105_v3 }
 0x1b8   :  { %v4178_v28 = vadd.f32 1.0, %v809_v57  ;;  %v835_v48 = vadd.f32 0.05243302, %v834_v31  ;;  %v846_v59 = vadd.f32 0.112945676, %v845_v32  ;;  %v4202_v34 = vmul.f32 0.5, %v4087_v25 }
 0x1b9   :  { %v4196_v21 = vmin.f32 %v628_v42, 16.0  ;;  %v518_v51 = vmul.f32 %v517_v38, %v4105_v3  ;;  %v593_v0 = vadd.f32 0.0036580483, %v592_v45  ;;  %v797_v2 = vadd.f32 0.18741608, %v796_v47 }
 0x1ba   :  { %v318_v37 = vpop.f32.mrf.mxu3  ;;  %3629 = vrcp.f32 %v4178_v28  ;;  %v836_v56 = vmul.f32 %v835_v48, %v4147_v39  ;;  %v847_v58 = vmul.f32 %v846_v59, %v4147_v39  ;;  %v486_v5 = vadd.f32 0.112945676, %v485_v49 }
 0x1bb   :  { %v4194_v55 = vadd.f32 %v318_v37, %v4080_v17  ;;  %v630_v4 = vmul.f32 2.1237322e-06, %v4196_v21  ;;  %v556_v41 = vmul.f32 %v555_v53, %v4135_v24  ;;  %v4210_v8 = vmul.f32 0.5, %v4098_v63 }
 0x1bc   :  { %v848_v44 = vadd.f32 0.4994258, %v847_v58  ;;  %v528_v12 = vadd.f32 0.4994258, %v527_v60  ;;  %v479_v13 = vadd.f32 1.1283791, %v478_v52  ;;  %v594_v26 = vmul.f32 %v593_v0, %v4160_v30 }
 0x1bd   :  { %v4213_v10 = vmul.f32 0.70710677, %v4194_v55  ;;  %v837_v57 = vadd.f32 0.18741608, %v836_v56  ;;  %v519_v23 = vadd.f32 1.1283791, %v518_v51  ;;  %v798_v27 = vmul.f32 %v797_v2, %v4117_v7 }
 0x1be   :  { %v849_v18 = vmul.f32 %v848_v44, %v4147_v39  ;;  %v631_v32 = vadd.f32 0.00028619796, %v630_v4  ;;  %v529_v35 = vmul.f32 %v528_v12, %v4105_v3  ;;  %v557_v36 = vadd.f32 0.18741608, %v556_v41 }
 0x1bf   :  { %v668_v63 = vmul.f32 %v4213_v10, %v4213_v10  ;;  %v822_v37 = vand.u32 2147483648, %v4178_v28  ;;  %v4233_v7 = vmul.f32 %v479_v13, %v4069_v54  ;;  %v838_v43 = vmul.f32 %v837_v57, %v4147_v39 }
 0x1c0   :  { %v4206_v40 = vpop.eup %3629  ;;  %v850_v33 = vadd.f32 1.0, %v849_v18  ;;  %v487_v45 = vmul.f32 %v486_v5, %v4082_v15  ;;  %v4238_v47 = vmul.f32 %v519_v23, %v4095_v61  ;;  %v595_v3 = vadd.f32 0.05243302, %v594_v26 }
 0x1c1   :  { %v812_v31 = vmul.f32 %v4206_v40, %v4178_v28  ;;  %v4227_v38 = vmin.f32 %v668_v63, 16.0  ;;  %v4240_v48 = vadd.f32 1.1283791, %v798_v27  ;;  %vm816_vm9 = vweird.f32 %v4178_v28 }
 0x1c2   :  { %v338_v25 = vpop.f32.mrf.mxu3  ;;  %3631 = vrcp.f32 %v850_v33  ;;  %v632_v52 = vmul.f32 %v631_v32, %v4196_v21  ;;  %v4247_v39 = vadd.f32 1.0, %v529_v35  ;;  %v4250_v53 = vmul.f32 %v557_v36, %v4135_v24 }
 0x1c3   :  { %v4217_v19 = vadd.f32 %v338_v25, %v4059_v46  ;;  %v670_v59 = vmul.f32 2.1237322e-06, %v4227_v38  ;;  %v813_v49 = vsub.f32 1.0, %v812_v31  ;;  %v820_v61 = vand.u32 2147483647, %v4178_v28 }
 0x1c4   :  { %v4253_v56 = vor.u32 1.1754944e-38, %v822_v37  ;;  %v839_v51 = vadd.f32 1.1283791, %v838_v43  ;;  %v488_v4 = vadd.f32 0.4994258, %v487_v45  ;;  %v4261_v44 = vmul.f32 %v595_v3, %v4160_v30 }
 0x1c5   :  { %v4230_v42 = vmul.f32 0.70710677, %v4217_v19  ;;  %v671_v58 = vadd.f32 0.00028619796, %v670_v59  ;;  %vm817_vm13 = vweird.f32 %v4206_v40  ;;  %3633 = vrcp.f32 %v4247_v39 }
 0x1c6   :  { %v814_v25 = vmul.f32 %v4206_v40, %v813_v49  ;;  %v4267_v12 = vadd.f32 0.0036580483, %v632_v52  ;;  %v860_v23 = vand.u32 2147483647, %v850_v33  ;;  %v862_v26 = vand.u32 2147483648, %v850_v33  ;;  %vm4302_vm4 = vmor %vm816_vm9, %vm817_vm13 }
 0x1c7   :  { %v708_v54 = vmul.f32 %v4230_v42, %v4230_v42  ;;  %v672_v5 = vmul.f32 %v671_v58, %v4227_v38  ;;  %v840_v63 = vmul.f32 %v839_v51, %v4133_v20  ;;  %vm856_vm14 = vweird.f32 %v850_v33 }
 0x1c8   :  { %v3632_v41 = vpop.eup %3631  ;;  %v815_v43 = vadd.f32 %v4206_v40, %v814_v25  ;;  %v489_v59 = vmul.f32 %v488_v4, %v4082_v15  ;;  %vm4281_vm1 = vcmp.eq.f32.partialorder %v860_v23, 8.507059e+37  ;;  %vm4287_vm2 = vcmp.eq.f32.partialorder %v820_v61, 8.507059e+37 }
 0x1c9   :  { %v4255_v0 = vmin.f32 %v708_v54, 16.0  ;;  %v852_v18 = vmul.f32 %v3632_v41, %v850_v33  ;;  %vm857_vm15 = vweird.f32 %v3632_v41  ;;  %v673_v36 = vadd.f32 0.0036580483, %v672_v5 }
 0x1ca   :  { %v341_v60 = vpop.f32.mrf.mxu3  ;;  %v863_v54 = vor.u32 1.1754944e-38, %v862_v26  ;;  %vm4292_vm3 = vmor %vm856_vm14, %vm857_vm15  ;;  %v540_v25 = vand.u32 2147483647, %v4247_v39  ;;  %vm536_vm6 = vweird.f32 %v4247_v39  ;;  %vm1142_vm14 = vcmask 130048  }
 0x1cb   :  { %v4258_v2 = vadd.f32 %v341_v60, %v4080_v17  ;;  %v710_v13 = vmul.f32 2.1237322e-06, %v4255_v0  ;;  %v721_v57 = vmul.f32 3.8918573e-05, %v4255_v0  ;;  %v853_v35 = vsub.f32 1.0, %v852_v18  ;;  %v3634_v49 = vpop.eup %3633 }
 0x1cc   :  { %v532_v4 = vmul.f32 %v3634_v49, %v4247_v39  ;;  %v674_v33 = vmul.f32 %v673_v36, %v4227_v38  ;;  %v819_v36 = vsel %vm4302_vm4, %v4206_v40, %v815_v43  ;;  %vm537_vm5 = vweird.f32 %v3634_v49 }
 0x1cd   :  { %v4272_v27 = vmul.f32 0.70710677, %v4258_v2  ;;  %v711_v31 = vadd.f32 0.00028619796, %v710_v13  ;;  %v722_v32 = vadd.f32 0.001143296, %v721_v57  ;;  %v854_v52 = vmul.f32 %v3632_v41, %v853_v35  ;;  %vm538_vm7 = vmor %vm536_vm6, %vm537_vm5 }
 0x1ce   :  { %v533_v26 = vsub.f32 1.0, %v532_v4  ;;  %vm541_vm8 = vcmp.eq.f32.partialorder %v540_v25, 8.507059e+37  ;;  %v445_v60 = vmul.f32 0.5, %v4125_v11 }
 0x1cf   :  { %v748_v37 = vmul.f32 %v4272_v27, %v4272_v27  ;;  %v712_v45 = vmul.f32 %v711_v31, %v4255_v0  ;;  %v723_v3 = vmul.f32 %v722_v32, %v4255_v0  ;;  %v855_v13 = vadd.f32 %v3632_v41, %v854_v52 }
 0x1d0   :  { %v542_v31 = vand.u32 2147483648, %v4247_v39  ;;  %v4311_v32 = vadd.f32 1.0, %v489_v59  ;;  %v534_v52 = vmul.f32 %v3634_v49, %v533_v26  ;;  %v800_v39 = vmul.f32 %v4240_v48, %v4103_v1 }
 0x1d1   :  { %v4285_v58 = vmin.f32 %v748_v37, 16.0  ;;  %v713_v5 = vadd.f32 0.0036580483, %v712_v45  ;;  %v724_v15 = vadd.f32 0.014752088, %v723_v3  ;;  %v859_v28 = vsel %vm4292_vm3, %v3632_v41, %v855_v13 }
 0x1d2   :  { %v675_v41 = vadd.f32 0.05243302, %v674_v33  ;;  %3635 = vrcp.f32 %v4311_v32  ;;  %v543_v43 = vor.u32 1.1754944e-38, %v542_v31  ;;  %v634_v26 = vmul.f32 %v4267_v12, %v4196_v21 }
 0x1d3   :  { %v750_v57 = vmul.f32 2.1237322e-06, %v4285_v58  ;;  %v761_v18 = vmul.f32 3.8918573e-05, %v4285_v58  ;;  %v725_v23 = vmul.f32 %v724_v15, %v4255_v0  ;;  %v714_v35 = vmul.f32 %v713_v5, %v4255_v0 }
 0x1d4   :  { %v864_v15 = vsel %vm4281_vm1, %v863_v54, %v859_v28  ;;  %v535_v5 = vadd.f32 %v3634_v49, %v534_v52  ;;  %v4352_v52 = vadd.f32 0.05243302, %v634_v26  ;;  %vm496_vm10 = vweird.f32 %v4311_v32 }
 0x1d5   :  { %v751_v37 = vadd.f32 0.00028619796, %v750_v57  ;;  %v762_v45 = vadd.f32 0.001143296, %v761_v18  ;;  %v726_v3 = vadd.f32 0.112945676, %v725_v23  ;;  %v865_v13 = vmul.f32 %v864_v15, %v840_v63 }
 0x1d6   :  { %v715_v61 = vadd.f32 0.05243302, %v714_v35  ;;  %v539_v57 = vsel %vm538_vm7, %v3634_v49, %v535_v5  ;;  %v597_v18 = vadd.f32 0.18741608, %v4261_v44  ;;  %v824_v49 = vsel %vm4287_vm2, %v4253_v56, %v819_v36 }
 0x1d7   :  { %v752_v59 = vmul.f32 %v751_v37, %v4285_v58  ;;  %v763_v4 = vmul.f32 %v762_v45, %v4285_v58  ;;  %v727_v51 = vmul.f32 %v726_v3, %v4255_v0  ;;  %v544_v23 = vsel %vm541_vm8, %v543_v43, %v539_v57 }
 0x1d8   :  { %v545_v63 = vmul.f32 %v544_v23, %v4238_v47  ;;  %v676_v44 = vmul.f32 %v675_v41, %v4227_v38  ;;  %v716_v1 = vmul.f32 %v715_v61, %v4255_v0  ;;  %v3636_v31 = vpop.eup %3635  ;;  %v3476_v35 = vclamps-f32 %v865_v13, 1.0 }
 0x1d9   :  { %v753_v40 = vadd.f32 0.0036580483, %v752_v59  ;;  %v728_v20 = vadd.f32 0.4994258, %v727_v51  ;;  %v764_v54 = vadd.f32 0.014752088, %v763_v4  ;;  %v4346_v47 = vmul.f32 %v597_v18, %v4160_v30 }
 0x1da   :  { %v3468_v45 = vclamps-f32 %v545_v63, 1.0  ;;  %v4343_v3 = vadd.f32 1.1283791, %v4250_v53  ;;  %v492_v56 = vmul.f32 %v3636_v31, %v4311_v32  ;;  %v4350_v36 = vmul.f32 %v824_v49, %v800_v39 }
 0x1db   :  { %v754_v33 = vmul.f32 %v753_v40, %v4285_v58  ;;  %v729_v28 = vmul.f32 %v728_v20, %v4255_v0  ;;  %v765_v25 = vmul.f32 %v764_v54, %v4285_v58  ;;  %v601_v15 = vmul.f32 3.8918573e-05, %v4160_v30 }
 0x1dc   :  { %v717_v59 = vadd.f32 0.18741608, %v716_v1  ;;  %v1109_v41 = vadd.f32 1.0, %v3468_v45  ;;  %v1117_v51 = vadd.f32 1.0, %v3476_v35  ;;  %v4358_v5 = vadd.f32 0.18741608, %v676_v44 }
 0x1dd   :  { %v755_v48 = vadd.f32 0.05243302, %v754_v33  ;;  %v4340_v37 = vadd.f32 1.0, %v729_v28  ;;  %v766_v12 = vadd.f32 0.112945676, %v765_v25  ;;  %v493_v11 = vsub.f32 1.0, %v492_v56 }
 0x1de   :  { %v1125_v40 = vmul.f32 %v1109_v41, %v4202_v34  ;;  %vm497_vm11 = vweird.f32 %v3636_v31  ;;  %v502_v43 = vand.u32 2147483648, %v4311_v32  ;;  %v602_v20 = vadd.f32 0.001143296, %v601_v15 }
 0x1df   :  { %3637 = vrcp.f32 %v4340_v37  ;;  %v756_v4 = vmul.f32 %v755_v48, %v4285_v58  ;;  %v767_v53 = vmul.f32 %v766_v12, %v4285_v58  ;;  %v494_v13 = vmul.f32 %v3636_v31, %v493_v11  ;;  %vm498_vm12 = vmor %vm496_vm10, %vm497_vm11 }
 0x1e0   :  { %v561_v54 = vmul.f32 3.8918573e-05, %v4135_v24  ;;  %v681_v57 = vmul.f32 3.8918573e-05, %v4227_v38  ;;  %v718_v18 = vmul.f32 %v717_v59, %v4255_v0  ;;  %1163 = vmatpush.msrb.mxu0 %v1125_v40  ;;  %v500_v23 = vand.u32 2147483647, %v4311_v32 }
 0x1e1   :  { %v768_v61 = vadd.f32 0.4994258, %v767_v53  ;;  %v757_v39 = vadd.f32 0.18741608, %v756_v4  ;;  %v495_v34 = vadd.f32 %v3636_v31, %v494_v13  ;;  %v603_v28 = vmul.f32 %v602_v20, %v4160_v30 }
 0x1e2   :  { %v562_v25 = vadd.f32 0.001143296, %v561_v54  ;;  %v682_v63 = vadd.f32 0.001143296, %v681_v57  ;;  %v503_v0 = vor.u32 1.1754944e-38, %v502_v43  ;;  %v1133_v56 = vmul.f32 %v1117_v51, %v445_v60 }
 0x1e3   :  { %v769_v33 = vmul.f32 %v768_v61, %v4285_v58  ;;  %v641_v1 = vmul.f32 3.8918573e-05, %v4196_v21  ;;  %v499_v48 = vsel %vm498_vm12, %v3636_v31, %v495_v34  ;;  %v604_v35 = vadd.f32 0.014752088, %v603_v28 }
 0x1e4   :  { %v563_v12 = vmul.f32 %v562_v25, %v4135_v24  ;;  %v683_v45 = vmul.f32 %v682_v63, %v4227_v38  ;;  %v4381_v15 = vadd.f32 1.1283791, %v718_v18  ;;  %vm501_vm9 = vcmp.eq.f32.partialorder %v500_v23, 8.507059e+37 }
 0x1e5   :  { %v4368_v26 = vpop.eup %3637  ;;  %v4373_v44 = vadd.f32 1.0, %v769_v33  ;;  %v758_v59 = vmul.f32 %v757_v39, %v4285_v58  ;;  %v504_v4 = vsel %vm501_vm9, %v503_v0, %v499_v48  ;;  %v605_v32 = vmul.f32 %v604_v35, %v4160_v30 }
 0x1e6   :  { %v732_v49 = vmul.f32 %v4368_v26, %v4340_v37  ;;  %v564_v53 = vadd.f32 0.014752088, %v563_v12  ;;  %v740_v31 = vand.u32 2147483647, %v4340_v37  ;;  %v505_v11 = vmul.f32 %v504_v4, %v4233_v7 }
 0x1e7   :  { %3639 = vrcp.f32 %v4373_v44  ;;  %v684_v61 = vadd.f32 0.014752088, %v683_v45  ;;  %vm736_vm13 = vweird.f32 %v4340_v37  ;;  %v606_v60 = vadd.f32 0.112945676, %v605_v32 }
 0x1e8   :  { %v733_v41 = vsub.f32 1.0, %v732_v49  ;;  %v565_v51 = vmul.f32 %v564_v53, %v4135_v24  ;;  %v642_v40 = vadd.f32 0.001143296, %v641_v1  ;;  %v742_v43 = vand.u32 2147483648, %v4340_v37  ;;  %v4408_v1 = vld [vmem:[%s5978_s5 + $0x10] sm:$0xff] }
 0x1e9   :  { %v3467_v13 = vclamps-f32 %v505_v11, 1.0  ;;  %v685_v58 = vmul.f32 %v684_v61, %v4227_v38  ;;  %v759_v20 = vadd.f32 1.1283791, %v758_v59  ;;  %v607_v54 = vmul.f32 %v606_v60, %v4160_v30 }
 0x1ea   :  { %v566_v57 = vadd.f32 0.112945676, %v565_v51  ;;  %v643_v18 = vmul.f32 %v642_v40, %v4196_v21  ;;  %v734_v39 = vmul.f32 %v4368_v26, %v733_v41  ;;  %vm737_vm15 = vweird.f32 %v4368_v26 }
 0x1eb   :  { %vm4396_vm1 = vcmp.eq.f32.partialorder %v740_v31, 8.507059e+37  ;;  %v1108_v23 = vadd.f32 1.0, %v3467_v13  ;;  %v686_v34 = vadd.f32 0.112945676, %v685_v58  ;;  %vm776_vm2 = vweird.f32 %v4373_v44  ;;  %vm4419_vm4 = vmor %vm736_vm13, %vm737_vm15 }
 0x1ec   :  { %v780_v25 = vand.u32 2147483647, %v4373_v44  ;;  %v608_v63 = vadd.f32 0.4994258, %v607_v54  ;;  %v782_v49 = vand.u32 2147483648, %v4373_v44  ;;  %v567_v48 = vmul.f32 %v566_v57, %v4135_v24 }
 0x1ed   :  { %v3640_v7 = vpop.eup %3639  ;;  %v1124_v0 = vmul.f32 %v1108_v23, %v4190_v50  ;;  %v687_v35 = vmul.f32 %v686_v34, %v4227_v38  ;;  %v644_v59 = vadd.f32 0.014752088, %v643_v18  ;;  %v735_v4 = vadd.f32 %v4368_v26, %v734_v39 }
 0x1ee   :  { %v772_v28 = vmul.f32 %v3640_v7, %v4373_v44  ;;  %vm777_vm3 = vweird.f32 %v3640_v7  ;;  %v609_v45 = vmul.f32 %v608_v63, %v4160_v30  ;;  %v568_v32 = vadd.f32 0.4994258, %v567_v48 }
 0x1ef   :  { %1164 = vmatpush.msrb.mxu0 %v1124_v0  ;;  %v3475_v50 = vclamps-f32 %v4350_v36, 1.0  ;;  %v688_v53 = vadd.f32 0.4994258, %v687_v35  ;;  %v743_v31 = vor.u32 1.1754944e-38, %v742_v43  ;;  %v645_v61 = vmul.f32 %v644_v59, %v4196_v21  ;;  %vm4428_vm5 = vmor %vm776_vm2, %vm777_vm3 }
 0x1f0   :  { %v773_v12 = vsub.f32 1.0, %v772_v28  ;;  %3483 = vmatmul.msk.f32.vlgmr.msrb.gmra.mxu0 %vm1142_vm14, %v4408_v1  ;;  %v610_v30 = vadd.f32 1.0, %v609_v45  ;;  %v783_v60 = vor.u32 1.1754944e-38, %v782_v49  ;;  %v569_v37 = vmul.f32 %v568_v32, %v4135_v24 }
 0x1f1   :  { %1255 = vmatpush.msra.mxu0 %v1133_v56  ;;  %v1116_v51 = vadd.f32 1.0, %v3475_v50  ;;  %v689_v40 = vmul.f32 %v688_v53, %v4227_v38  ;;  %v760_v43 = vmul.f32 %v759_v20, %v4272_v27  ;;  %vm781_vm6 = vcmp.eq.f32.partialorder %v780_v25, 8.507059e+37 }
 0x1f2   :  { %v774_v11 = vmul.f32 %v3640_v7, %v773_v12  ;;  %3641 = vrcp.f32 %v610_v30  ;;  %v739_v44 = vsel %vm4419_vm4, %v4368_v26, %v735_v4  ;;  %v4438_v58 = vadd.f32 1.0, %v569_v37 }
 0x1f3   :  { %v1132_v54 = vmul.f32 %v1116_v51, %v4210_v8  ;;  %v4441_v57 = vadd.f32 1.0, %v689_v40  ;;  %v599_v24 = vadd.f32 1.1283791, %v4346_v47  ;;  %v636_v56 = vmul.f32 %v4352_v52, %v4196_v21  ;;  %v4455_v8 = vld [vmem:[%s5978_s5 + $0x18] sm:$0xff] }
 0x1f4   :  { %v775_v13 = vadd.f32 %v3640_v7, %v774_v11  ;;  %v646_v20 = vadd.f32 0.112945676, %v645_v61  ;;  %v678_v18 = vmul.f32 %v4358_v5, %v4227_v38  ;;  %v720_v26 = vmul.f32 %v4381_v15, %v4230_v42 }
 0x1f5   :  { %3643 = vrcp.f32 %v4438_v58  ;;  %1256 = vmatpush.msra.mxu0 %v1132_v54  ;;  %v744_v47 = vsel %vm4396_vm1, %v743_v31, %v739_v44  ;;  %v622_v38 = vand.u32 2147483648, %v610_v30  ;;  %v4464_v15 = vmul.f32 %v4343_v3, %v4121_v9 }
 0x1f6   :  { %v779_v27 = vsel %vm4428_vm5, %v3640_v7, %v775_v13  ;;  %v620_v7 = vand.u32 2147483647, %v610_v30  ;;  %3645 = vrcp.f32 %v4441_v57  ;;  %v647_v5 = vmul.f32 %v646_v20, %v4196_v21 }
 0x1f7   :  { %v784_v39 = vsel %vm781_vm6, %v783_v60, %v779_v27  ;;  %v600_v23 = vmul.f32 %v599_v24, %v4151_v22  ;;  %v443_v34 = vmul.f32 0.5, %v4258_v2  ;;  %v637_v33 = vadd.f32 0.18741608, %v636_v56 }
 0x1f8   :  { %v785_v52 = vmul.f32 %v784_v39, %v760_v43  ;;  %v3642_v42 = vpop.eup %3641  ;;  %3484 = vmatmul.msk.f32.gmra.mxu0 %vm1142_vm14, %v4455_v8  ;;  %v679_v25 = vadd.f32 1.1283791, %v678_v18  ;;  %v745_v63 = vmul.f32 %v744_v47, %v720_v26  ;;  %vm616_vm7 = vweird.f32 %v610_v30 }
 0x1f9   :  { %v612_v49 = vmul.f32 %v3642_v42, %v610_v30  ;;  %vm4470_vm8 = vcmp.eq.f32.partialorder %v620_v7, 8.507059e+37  ;;  %v648_v9 = vadd.f32 0.4994258, %v647_v5  ;;  %vm617_vm10 = vweird.f32 %v3642_v42 }
 0x1fa   :  { %v3474_v28 = vclamps-f32 %v785_v52, 1.0  ;;  %v623_v22 = vor.u32 1.1754944e-38, %v622_v38  ;;  %vm576_vm11 = vweird.f32 %v4438_v58  ;;  %v580_v59 = vand.u32 2147483647, %v4438_v58  ;;  %vm4482_vm9 = vmor %vm616_vm7, %vm617_vm10 }
 0x1fb   :  { %v3644_v3 = vpop.eup %3643  ;;  %v613_v35 = vsub.f32 1.0, %v612_v49  ;;  %v649_v4 = vmul.f32 %v648_v9, %v4196_v21  ;;  %v582_v50 = vand.u32 2147483648, %v4438_v58  ;;  %vm696_vm12 = vweird.f32 %v4441_v57 }
 0x1fc   :  { %v1115_v0 = vadd.f32 1.0, %v3474_v28  ;;  %v3646_v2 = vpop.eup %3645  ;;  %v572_v45 = vmul.f32 %v3644_v3, %v4438_v58  ;;  %vm577_vm13 = vweird.f32 %v3644_v3  ;;  %v702_v11 = vand.u32 2147483648, %v4441_v57 }
 0x1fd   :  { %v614_v32 = vmul.f32 %v3642_v42, %v613_v35  ;;  %v692_v53 = vmul.f32 %v3646_v2, %v4441_v57  ;;  %v650_v61 = vadd.f32 1.0, %v649_v4  ;;  %vm697_vm15 = vweird.f32 %v3646_v2  ;;  %vm4496_vm1 = vmor %vm576_vm11, %vm577_vm13 }
 0x1fe   :  { %v1131_v12 = vmul.f32 %v1115_v0, %v443_v34  ;;  %v573_v31 = vsub.f32 1.0, %v572_v45  ;;  %v700_v37 = vand.u32 2147483647, %v4441_v57  ;;  %v638_v51 = vmul.f32 %v637_v33, %v4196_v21  ;;  %vm4508_vm3 = vmor %vm696_vm12, %vm697_vm15 }
 0x1ff   :  { %v615_v36 = vadd.f32 %v3642_v42, %v614_v32  ;;  %v693_v60 = vsub.f32 1.0, %v692_v53  ;;  %v442_v40 = vmul.f32 0.5, %v4217_v19  ;;  %3647 = vrcp.f32 %v650_v61 }
 0x200   :  { %1232 = vmatpush.msrb.mxu3 %v1131_v12  ;;  %v574_v30 = vmul.f32 %v3644_v3, %v573_v31  ;;  %3491 = vmatmul.msk.f32.vlgmr.msra.gmra.mxu0 %vm1142_vm14, %v4408_v1  ;;  %vm4500_vm2 = vcmp.eq.f32.partialorder %v580_v59, 8.507059e+37  ;;  %v583_v21 = vor.u32 1.1754944e-38, %v582_v50  ;;  %v703_v58 = vor.u32 1.1754944e-38, %v702_v11 }
 0x201   :  { %v619_v43 = vsel %vm4482_vm9, %v3642_v42, %v615_v36  ;;  %v694_v19 = vmul.f32 %v3646_v2, %v693_v60  ;;  %v3473_v27 = vclamps-f32 %v745_v63, 1.0  ;;  %v680_v20 = vmul.f32 %v679_v25, %v4213_v10 }
 0x202   :  { %v624_v54 = vsel %vm4470_vm8, %v623_v22, %v619_v43  ;;  %v575_v24 = vadd.f32 %v3644_v3, %v574_v30  ;;  %vm701_vm4 = vcmp.eq.f32.partialorder %v700_v37, 8.507059e+37  ;;  %v438_v39 = vmul.f32 0.5, %v4113_v6  ;;  %v3821_v43 = vld [vmem:[%s5979_s6] sm:$0xff] }
 0x203   :  { %v625_v18 = vmul.f32 %v624_v54, %v600_v23  ;;  %v695_v26 = vadd.f32 %v3646_v2, %v694_v19  ;;  %v1114_v52 = vadd.f32 1.0, %v3473_v27  ;;  %v439_v7 = vmul.f32 0.5, %v4139_v29 }
 0x204   :  { %v579_v47 = vsel %vm4496_vm1, %v3644_v3, %v575_v24  ;;  %v441_v10 = vmul.f32 0.5, %v4194_v55  ;;  %v639_v28 = vadd.f32 1.1283791, %v638_v51  ;;  %vm656_vm5 = vweird.f32 %v650_v61 }
 0x205   :  { %v3470_v57 = vclamps-f32 %v625_v18, 1.0  ;;  %v584_v38 = vsel %vm4500_vm2, %v583_v21, %v579_v47  ;;  %v699_v5 = vsel %vm4508_vm3, %v3646_v2, %v695_v26  ;;  %v3648_v42 = vpop.eup %3647  ;;  %v1130_v6 = vmul.f32 %v1114_v52, %v442_v40 }
 0x206   :  { %v585_v23 = vmul.f32 %v584_v38, %v4464_v15  ;;  %v704_v34 = vsel %vm701_vm4, %v703_v58, %v699_v5  ;;  %v652_v63 = vmul.f32 %v3648_v42, %v650_v61  ;;  %v660_v29 = vand.u32 2147483647, %v650_v61 }
 0x207   :  { %v1111_v33 = vadd.f32 1.0, %v3470_v57  ;;  %v705_v25 = vmul.f32 %v704_v34, %v680_v20  ;;  %v662_v0 = vand.u32 2147483648, %v650_v61  ;;  %1233 = vmatpush.msrb.mxu3 %v1130_v6  ;;  %vm657_vm6 = vweird.f32 %v3648_v42 }
 0x208   :  { %v3469_v49 = vclamps-f32 %v585_v23, 1.0  ;;  %3492 = vmatmul.msk.f32.gmra.mxu0 %vm1142_vm14, %v4455_v8  ;;  %v653_v3 = vsub.f32 1.0, %v652_v63  ;;  %3489 = vmatmul.msk.f32.vlgmr.msrb.gmra.mxu3 %vm1142_vm14, %v4408_v1  ;;  %vm658_vm7 = vmor %vm656_vm5, %vm657_vm6  ;;  %v640_v12 = vmul.f32 %v639_v28, %v4175_v14  ;;  %vm661_vm8 = vcmp.eq.f32.partialorder %v660_v29, 8.507059e+37 }
 0x209   :  { %v1127_v48 = vmul.f32 %v1111_v33, %v439_v7  ;;  %v3472_v9 = vclamps-f32 %v705_v25, 1.0  ;;  %v663_v2 = vor.u32 1.1754944e-38, %v662_v0  ;;  %v440_v14 = vmul.f32 0.5, %v4164_v62 }
 0x20a   :  { %v1110_v55 = vadd.f32 1.0, %v3469_v49  ;;  %v654_v35 = vmul.f32 %v3648_v42, %v653_v3 }
 0x20b   :  { %1186 = vmatpush.msrb.mxu1 %v1127_v48  ;;  %v1113_v15 = vadd.f32 1.0, %v3472_v9 }
 0x20c   :  { %v1126_v22 = vmul.f32 %v1110_v55, %v438_v39  ;;  %v655_v59 = vadd.f32 %v3648_v42, %v654_v35 }
 0x20d   :  { %v1129_v45 = vmul.f32 %v1113_v15, %v441_v10 }
 0x20e   :  { %1187 = vmatpush.msrb.mxu1 %v1126_v22  ;;  %v659_v4 = vsel %vm658_vm7, %v3648_v42, %v655_v59 }
 0x20f   :  { %3485 = vmatmul.msk.f32.vlgmr.msrb.gmra.mxu1 %vm1142_vm14, %v4408_v1  ;;  %1209 = vmatpush.msrb.mxu2 %v1129_v45  ;;  %v664_v32 = vsel %vm661_vm8, %v663_v2, %v659_v4 }
 0x210   :  { %v665_v50 = vmul.f32 %v664_v32, %v640_v12  ;;  %3490 = vmatmul.msk.f32.gmra.mxu3 %vm1142_vm14, %v4455_v8 }
 0x212   :  { %v3471_v31 = vclamps-f32 %v665_v50, 1.0 }
 0x214   :  { %v1112_v61 = vadd.f32 1.0, %v3471_v31 }
 0x215   :  { %v407_v53 = vpop.f32.mrf.mxu2 }
 0x216   :  { %v4534_v41 = vadd.f32 %v407_v53, %v4059_v46  ;;  %v1128_v60 = vmul.f32 %v1112_v61, %v440_v14 }
 0x217   :  { %3486 = vmatmul.msk.f32.gmra.mxu1 %vm1142_vm14, %v4455_v8  ;;  %v384_v40 = vpop.f32.mrf.mxu1 }
 0x218   :  { %v4538_v11 = vmul.f32 0.70710677, %v4534_v41  ;;  %1210 = vmatpush.msrb.mxu2 %v1128_v60  ;;  %v4553_v13 = vadd.f32 %v3821_v43, %v384_v40 }
 0x219   :  { %3487 = vmatmul.msk.f32.vlgmr.msrb.gmra.mxu2 %vm1142_vm14, %v4408_v1 }
 0x21a   :  { %v948_v36 = vmul.f32 %v4538_v11, %v4538_v11  ;;  %v4559_v21 = vmul.f32 0.70710677, %v4553_v13 }
 0x21c   :  { %v4544_v37 = vmin.f32 %v948_v36, 16.0  ;;  %v868_v24 = vmul.f32 %v4559_v21, %v4559_v21 }
 0x21e   :  { %v961_v46 = vmul.f32 3.8918573e-05, %v4544_v37  ;;  %v950_v19 = vmul.f32 2.1237322e-06, %v4544_v37  ;;  %v4565_v58 = vmin.f32 %v868_v24, 16.0  ;;  %v410_v26 = vpop.f32.mrf.mxu2  ;;  %v430_v39 = vpop.f32.mrf.mxu3 }
 0x21f   :  { %v4569_v47 = vadd.f32 %v410_v26, %v4080_v17  ;;  %v4572_v57 = vadd.f32 %v3821_v43, %v430_v39  ;;  %v387_v38 = vpop.f32.mrf.mxu1  ;;  %v3822_v17 = vld [vmem:[%s5979_s6 + $0x8] sm:$0xff] }
 0x220   :  { %v962_v62 = vadd.f32 0.001143296, %v961_v46  ;;  %v951_v27 = vadd.f32 0.00028619796, %v950_v19  ;;  %v881_v18 = vmul.f32 3.8918573e-05, %v4565_v58  ;;  %v4585_v34 = vadd.f32 %v3822_v17, %v387_v38 }
 0x221   :  { %3488 = vmatmul.msk.f32.gmra.mxu2 %vm1142_vm14, %v4455_v8  ;;  %v4575_v5 = vmul.f32 0.70710677, %v4569_v47  ;;  %v4580_v23 = vmul.f32 0.70710677, %v4572_v57  ;;  %v870_v9 = vmul.f32 2.1237322e-06, %v4565_v58 }
 0x222   :  { %v963_v51 = vmul.f32 %v962_v62, %v4544_v37  ;;  %v952_v52 = vmul.f32 %v951_v27, %v4544_v37  ;;  %v882_v7 = vadd.f32 0.001143296, %v881_v18  ;;  %v4597_v0 = vmul.f32 0.70710677, %v4585_v34 }
 0x223   :  { %v988_v33 = vmul.f32 %v4575_v5, %v4575_v5  ;;  %v1028_v25 = vmul.f32 %v4580_v23, %v4580_v23  ;;  %v871_v4 = vadd.f32 0.00028619796, %v870_v9 }
 0x224   :  { %v964_v30 = vadd.f32 0.014752088, %v963_v51  ;;  %v883_v10 = vmul.f32 %v882_v7, %v4565_v58  ;;  %v953_v6 = vadd.f32 0.0036580483, %v952_v52  ;;  %v908_v22 = vmul.f32 %v4597_v0, %v4597_v0 }
 0x225   :  { %v4594_v29 = vmin.f32 %v988_v33, 16.0  ;;  %v4603_v35 = vmin.f32 %v1028_v25, 16.0  ;;  %v872_v40 = vmul.f32 %v871_v4, %v4565_v58 }
 0x226   :  { %v965_v44 = vmul.f32 %v964_v30, %v4544_v37  ;;  %v884_v28 = vadd.f32 0.014752088, %v883_v10  ;;  %v954_v48 = vmul.f32 %v953_v6, %v4544_v37  ;;  %v4612_v31 = vmin.f32 %v908_v22, 16.0  ;;  %v433_v38 = vpop.f32.mrf.mxu3 }
 0x227   :  { %v990_v55 = vmul.f32 2.1237322e-06, %v4594_v29  ;;  %v1001_v15 = vmul.f32 3.8918573e-05, %v4594_v29  ;;  %v1041_v14 = vmul.f32 3.8918573e-05, %v4603_v35  ;;  %v4635_v9 = vadd.f32 %v3822_v17, %v433_v38 }
 0x228   :  { %v966_v54 = vadd.f32 0.112945676, %v965_v44  ;;  %v885_v49 = vmul.f32 %v884_v28, %v4565_v58  ;;  %v955_v59 = vadd.f32 0.05243302, %v954_v48  ;;  %v910_v44 = vmul.f32 2.1237322e-06, %v4612_v31 }
 0x229   :  { %v991_v12 = vadd.f32 0.00028619796, %v990_v55  ;;  %v1002_v45 = vadd.f32 0.001143296, %v1001_v15  ;;  %v1042_v51 = vadd.f32 0.001143296, %v1041_v14 }
 0x22a   :  { %v967_v56 = vmul.f32 %v966_v54, %v4544_v37  ;;  %v886_v3 = vadd.f32 0.112945676, %v885_v49  ;;  %v956_v62 = vmul.f32 %v955_v59, %v4544_v37  ;;  %v911_v26 = vadd.f32 0.00028619796, %v910_v44 }
 0x22b   :  { %v992_v50 = vmul.f32 %v991_v12, %v4594_v29  ;;  %v1003_v53 = vmul.f32 %v1002_v45, %v4594_v29  ;;  %v1043_v27 = vmul.f32 %v1042_v51, %v4603_v35  ;;  %v921_v7 = vmul.f32 3.8918573e-05, %v4612_v31 }
 0x22c   :  { %v968_v20 = vadd.f32 0.4994258, %v967_v56  ;;  %v887_v2 = vmul.f32 %v886_v3, %v4565_v58  ;;  %v957_v24 = vadd.f32 0.18741608, %v956_v62  ;;  %v1030_v48 = vmul.f32 2.1237322e-06, %v4603_v35 }
 0x22d   :  { %v993_v36 = vadd.f32 0.0036580483, %v992_v50  ;;  %v1004_v60 = vadd.f32 0.014752088, %v1003_v53  ;;  %v1044_v52 = vadd.f32 0.014752088, %v1043_v27  ;;  %v912_v15 = vmul.f32 %v911_v26, %v4612_v31 }
 0x22e   :  { %v969_v42 = vmul.f32 %v968_v20, %v4544_v37  ;;  %v888_v32 = vadd.f32 0.4994258, %v887_v2  ;;  %v873_v20 = vadd.f32 0.0036580483, %v872_v40  ;;  %v958_v10 = vmul.f32 %v957_v24, %v4544_v37 }
 0x22f   :  { %v994_v30 = vmul.f32 %v993_v36, %v4594_v29  ;;  %v1005_v43 = vmul.f32 %v1004_v60, %v4594_v29  ;;  %v1045_v28 = vmul.f32 %v1044_v52, %v4603_v35  ;;  %v922_v33 = vadd.f32 0.001143296, %v921_v7 }
 0x230   :  { %v4591_v63 = vadd.f32 1.0, %v969_v42  ;;  %v889_v61 = vmul.f32 %v888_v32, %v4565_v58  ;;  %v874_v25 = vmul.f32 %v873_v20, %v4565_v58  ;;  %v959_v12 = vadd.f32 1.1283791, %v958_v10 }
 0x231   :  { %v1006_v56 = vadd.f32 0.112945676, %v1005_v43  ;;  %v995_v18 = vadd.f32 0.05243302, %v994_v30  ;;  %v1046_v55 = vadd.f32 0.112945676, %v1045_v28  ;;  %v923_v22 = vmul.f32 %v922_v33, %v4612_v31 }
 0x232   :  { %3649 = vrcp.f32 %v4591_v63  ;;  %v4622_v19 = vadd.f32 1.0, %v889_v61  ;;  %v875_v32 = vadd.f32 0.05243302, %v874_v25  ;;  %v1031_v17 = vadd.f32 0.00028619796, %v1030_v48 }
 0x233   :  { %v1007_v39 = vmul.f32 %v1006_v56, %v4594_v29  ;;  %v996_v49 = vmul.f32 %v995_v18, %v4594_v29  ;;  %v1047_v59 = vmul.f32 %v1046_v55, %v4603_v35  ;;  %v924_v4 = vadd.f32 0.014752088, %v923_v22 }
 0x234   :  { %3651 = vrcp.f32 %v4622_v19  ;;  %v4647_v50 = vmul.f32 0.70710677, %v4635_v9  ;;  %v982_v53 = vand.u32 2147483648, %v4591_v63  ;;  %v913_v61 = vadd.f32 0.0036580483, %v912_v15 }
 0x235   :  { %v1008_v6 = vadd.f32 0.4994258, %v1007_v39  ;;  %v997_v14 = vadd.f32 0.18741608, %v996_v49  ;;  %v1048_v62 = vadd.f32 0.4994258, %v1047_v59  ;;  %vm976_vm11 = vweird.f32 %v4591_v63 }
 0x236   :  { %v925_v51 = vmul.f32 %v924_v4, %v4612_v31  ;;  %v1068_v40 = vmul.f32 %v4647_v50, %v4647_v50  ;;  %v980_v30 = vand.u32 2147483647, %v4591_v63  ;;  %v876_v43 = vmul.f32 %v875_v32, %v4565_v58 }
 0x237   :  { %v1009_v3 = vmul.f32 %v1008_v6, %v4594_v29  ;;  %v1032_v44 = vmul.f32 %v1031_v17, %v4603_v35  ;;  %v998_v56 = vmul.f32 %v997_v14, %v4594_v29  ;;  %v914_v27 = vmul.f32 %v913_v61, %v4612_v31 }
 0x238   :  { %v4615_v46 = vpop.eup %3649  ;;  %v926_v20 = vadd.f32 0.112945676, %v925_v51  ;;  %v4669_v18 = vmin.f32 %v1068_v40, 16.0  ;;  %v960_v26 = vmul.f32 %v959_v12, %v4538_v11  ;;  %v983_v39 = vor.u32 1.1754944e-38, %v982_v53 }
 0x239   :  { %v972_v54 = vmul.f32 %v4615_v46, %v4591_v63  ;;  %v4643_v45 = vadd.f32 1.0, %v1009_v3  ;;  %vm977_vm10 = vweird.f32 %v4615_v46  ;;  %vm981_vm9 = vcmp.eq.f32.partialorder %v980_v30, 8.507059e+37 }
 0x23a   :  { %v4641_v2 = vpop.eup %3651  ;;  %vm4663_vm12 = vmor %vm976_vm11, %vm977_vm10  ;;  %v1070_v29 = vmul.f32 2.1237322e-06, %v4669_v18  ;;  %v1081_v10 = vmul.f32 3.8918573e-05, %v4669_v18  ;;  %v877_v6 = vadd.f32 0.18741608, %v876_v43  ;;  %vm896_vm4 = vweird.f32 %v4622_v19 }
 0x23b   :  { %v973_v42 = vsub.f32 1.0, %v972_v54  ;;  %3653 = vrcp.f32 %v4643_v45  ;;  %v892_v60 = vmul.f32 %v4641_v2, %v4622_v19  ;;  %v1049_v54 = vmul.f32 %v1048_v62, %v4603_v35 }
 0x23c   :  { %v1033_v11 = vadd.f32 0.0036580483, %v1032_v44  ;;  %v999_v25 = vadd.f32 1.1283791, %v998_v56  ;;  %v915_v49 = vadd.f32 0.05243302, %v914_v27  ;;  %v878_v17 = vmul.f32 %v877_v6, %v4565_v58 }
 0x23d   :  { %v974_v37 = vmul.f32 %v4615_v46, %v973_v42  ;;  %v893_v52 = vsub.f32 1.0, %v892_v60  ;;  %v4675_v38 = vadd.f32 1.0, %v1049_v54  ;;  %v927_v42 = vmul.f32 %v926_v20, %v4612_v31 }
 0x23e   :  { %v1071_v55 = vadd.f32 0.00028619796, %v1070_v29  ;;  %v1082_v15 = vadd.f32 0.001143296, %v1081_v10  ;;  %v1020_v22 = vand.u32 2147483647, %v4643_v45  ;;  %v1034_v53 = vmul.f32 %v1033_v11, %v4603_v35 }
 0x23f   :  { %v975_v36 = vadd.f32 %v4615_v46, %v974_v37  ;;  %v894_v48 = vmul.f32 %v4641_v2, %v893_v52  ;;  %v1022_v37 = vand.u32 2147483648, %v4643_v45  ;;  %3655 = vrcp.f32 %v4675_v38 }
 0x240   :  { %v1072_v4 = vmul.f32 %v1071_v55, %v4669_v18  ;;  %v1083_v32 = vmul.f32 %v1082_v15, %v4669_v18  ;;  %v916_v14 = vmul.f32 %v915_v49, %v4612_v31  ;;  %vm1016_vm15 = vweird.f32 %v4643_v45 }
 0x241   :  { %v979_v63 = vsel %vm4663_vm12, %v4615_v46, %v975_v36  ;;  %v3654_v7 = vpop.eup %3653  ;;  %v928_v46 = vadd.f32 0.4994258, %v927_v42  ;;  %vm897_vm1 = vweird.f32 %v4641_v2  ;;  %v1000_v51 = vmul.f32 %v999_v25, %v4575_v5 }
 0x242   :  { %v1012_v28 = vmul.f32 %v3654_v7, %v4643_v45  ;;  %v984_v33 = vsel %vm981_vm9, %v983_v39, %v979_v63  ;;  %vm1017_vm13 = vweird.f32 %v3654_v7  ;;  %v1084_v62 = vadd.f32 0.014752088, %v1083_v32  ;;  %vm4706_vm5 = vmor %vm896_vm4, %vm897_vm1 }
 0x243   :  { %v929_v12 = vmul.f32 %v928_v46, %v4612_v31  ;;  %v985_v36 = vmul.f32 %v984_v33, %v960_v26  ;;  %vm1018_vm2 = vmor %vm1016_vm15, %vm1017_vm13  ;;  %v1023_v40 = vor.u32 1.1754944e-38, %v1022_v37  ;;  %v895_v58 = vadd.f32 %v4641_v2, %v894_v48 }
 0x244   :  { %v1013_v3 = vsub.f32 1.0, %v1012_v28  ;;  %vm1021_vm3 = vcmp.eq.f32.partialorder %v1020_v22, 8.507059e+37  ;;  %v1073_v43 = vadd.f32 0.0036580483, %v1072_v4  ;;  %v902_v54 = vand.u32 2147483648, %v4622_v19 }
 0x245   :  { %v4691_v61 = vadd.f32 1.0, %v929_v12  ;;  %v4698_v44 = vpop.eup %3655  ;;  %v917_v45 = vadd.f32 0.18741608, %v916_v14  ;;  %v1085_v56 = vmul.f32 %v1084_v62, %v4669_v18  ;;  %v900_v5 = vand.u32 2147483647, %v4622_v19 }
 0x246   :  { %v1014_v59 = vmul.f32 %v3654_v7, %v1013_v3  ;;  %v3479_v20 = vclamps-f32 %v985_v36, 1.0  ;;  %v449_v63 = vmul.f32 0.5, %v4569_v47  ;;  %v1035_v39 = vadd.f32 0.05243302, %v1034_v53 }
 0x247   :  { %3657 = vrcp.f32 %v4691_v61  ;;  %v1086_v52 = vadd.f32 0.112945676, %v1085_v56  ;;  %v1052_v19 = vmul.f32 %v4698_v44, %v4675_v38  ;;  %v1074_v29 = vmul.f32 %v1073_v43, %v4669_v18 }
 0x248   :  { %v1015_v60 = vadd.f32 %v3654_v7, %v1014_v59  ;;  %v879_v6 = vadd.f32 1.1283791, %v878_v17  ;;  %v903_v28 = vor.u32 1.1754944e-38, %v902_v54  ;;  %v918_v11 = vmul.f32 %v917_v45, %v4612_v31 }
 0x249   :  { %v1087_v33 = vmul.f32 %v1086_v52, %v4669_v18  ;;  %vm901_vm6 = vcmp.eq.f32.partialorder %v900_v5, 8.507059e+37  ;;  %v1120_v49 = vadd.f32 1.0, %v3479_v20  ;;  %v1036_v48 = vmul.f32 %v1035_v39, %v4603_v35 }
 0x24a   :  { %v1019_v30 = vsel %vm1018_vm2, %v3654_v7, %v1015_v60  ;;  %v899_v7 = vsel %vm4706_vm5, %v4641_v2, %v895_v58  ;;  %v448_v2 = vmul.f32 0.5, %v4534_v41  ;;  %v1053_v15 = vsub.f32 1.0, %v1052_v19 }
 0x24b   :  { %v1024_v24 = vsel %vm1021_vm3, %v1023_v40, %v1019_v30  ;;  %v904_v46 = vsel %vm901_vm6, %v903_v28, %v899_v7  ;;  %v1088_v3 = vadd.f32 0.4994258, %v1087_v33  ;;  %v1075_v37 = vadd.f32 0.05243302, %v1074_v29 }
 0x24c   :  { %v1025_v27 = vmul.f32 %v1024_v24, %v1000_v51  ;;  %v880_v12 = vmul.f32 %v879_v6, %v4559_v21  ;;  %v919_v31 = vadd.f32 1.1283791, %v918_v11  ;;  %v942_v59 = vand.u32 2147483648, %v4691_v61 }
 0x24d   :  { %v3658_v10 = vpop.eup %3657  ;;  %v1089_v4 = vmul.f32 %v1088_v3, %v4669_v18  ;;  %v940_v17 = vand.u32 2147483647, %v4691_v61  ;;  %v1136_v41 = vmul.f32 %v1120_v49, %v448_v2  ;;  %v1037_v14 = vadd.f32 0.18741608, %v1036_v48  ;;  %v4756_v2 = vld [vmem:[%s5979_s6 + $0x18] sm:$0xff] }
 0x24e   :  { %v3480_v42 = vclamps-f32 %v1025_v27, 1.0  ;;  %v932_v25 = vmul.f32 %v3658_v10, %v4691_v61  ;;  %vm937_vm7 = vweird.f32 %v3658_v10  ;;  %v905_v53 = vmul.f32 %v904_v46, %v880_v12 }
 0x24f   :  { %v1090_v36 = vadd.f32 1.0, %v1089_v4  ;;  %v1054_v60 = vmul.f32 %v4698_v44, %v1053_v15  ;;  %vm936_vm8 = vweird.f32 %v4691_v61  ;;  %v1076_v21 = vmul.f32 %v1075_v37, %v4669_v18 }
 0x250   :  { %v1121_v47 = vadd.f32 1.0, %v3480_v42  ;;  %v933_v22 = vsub.f32 1.0, %v932_v25  ;;  %vm938_vm10 = vmor %vm936_vm8, %vm937_vm7  ;;  %v943_v51 = vor.u32 1.1754944e-38, %v942_v59  ;;  %v920_v40 = vmul.f32 %v919_v31, %v4597_v0 }
 0x251   :  { %3659 = vrcp.f32 %v1090_v36  ;;  %vm941_vm11 = vcmp.eq.f32.partialorder %v940_v17, 8.507059e+37  ;;  %v1038_v30 = vmul.f32 %v1037_v14, %v4603_v35  ;;  %v3477_v54 = vclamps-f32 %v905_v53, 1.0 }
 0x252   :  { %v1137_v55 = vmul.f32 %v1121_v47, %v449_v63  ;;  %v934_v32 = vmul.f32 %v3658_v10, %v933_v22  ;;  %v1055_v24 = vadd.f32 %v4698_v44, %v1054_v60  ;;  %vm1057_vm12 = vweird.f32 %v4698_v44 }
 0x253   :  { %v1077_v45 = vadd.f32 0.18741608, %v1076_v21  ;;  %v1062_v56 = vand.u32 2147483648, %v4675_v38  ;;  %vm1056_vm9 = vweird.f32 %v4675_v38  ;;  %v1060_v5 = vand.u32 2147483647, %v4675_v38 }
 0x254   :  { %1301 = vmatpush.msra.mxu2 %v1137_v55  ;;  %v935_v62 = vadd.f32 %v3658_v10, %v934_v32  ;;  %v1039_v20 = vadd.f32 1.1283791, %v1038_v30  ;;  %vm4738_vm13 = vmor %vm1056_vm9, %vm1057_vm12  ;;  %v447_v35 = vmul.f32 0.5, %v4585_v34  ;;  %v1118_v63 = vadd.f32 1.0, %v3477_v54 }
 0x255   :  { %v1059_v39 = vsel %vm4738_vm13, %v4698_v44, %v1055_v24  ;;  %v1078_v7 = vmul.f32 %v1077_v45, %v4669_v18  ;;  %v446_v38 = vmul.f32 0.5, %v4553_v13  ;;  %v1063_v19 = vor.u32 1.1754944e-38, %v1062_v56  ;;  %v4781_v24 = vld [vmem:[%s5979_s6 + $0x10] sm:$0xff]  ;;  %s3860_s6 = smov 8  }
 0x256   :  { %1302 = vmatpush.msra.mxu2 %v1136_v41  ;;  %v939_v58 = vsel %vm938_vm10, %v3658_v10, %v935_v62  ;;  %vm1061_vm15 = vcmp.eq.f32.partialorder %v1060_v5, 8.507059e+37  ;;  %v1040_v6 = vmul.f32 %v1039_v20, %v4580_v23  ;;  %v1102_v11 = vand.u32 2147483648, %v1090_v36 }
 0x257   :  { %3495 = vmatmul.msk.f32.vlgmr.msra.gmra.mxu2 %vm1142_vm14, %v4408_v1  ;;  %v944_v43 = vsel %vm941_vm11, %v943_v51, %v939_v58  ;;  %v3660_v0 = vpop.eup %3659  ;;  %v1064_v28 = vsel %vm1061_vm15, %v1063_v19, %v1059_v39  ;;  %v1134_v44 = vmul.f32 %v1118_v63, %v446_v38  ;;  %v1079_v33 = vadd.f32 1.1283791, %v1078_v7  ;;  %v3823_v63 = vld [vmem:[%s5973_s0] sm:$0xff] }
 0x258   :  { %v945_v61 = vmul.f32 %v944_v43, %v920_v40  ;;  %v1092_v42 = vmul.f32 %v3660_v0, %v1090_v36  ;;  %vm1097_vm1 = vweird.f32 %v3660_v0  ;;  %v1100_v18 = vand.u32 2147483647, %v1090_v36 }
 0x259   :  { %v1065_v13 = vmul.f32 %v1064_v28, %v1040_v6  ;;  %vm1096_vm2 = vweird.f32 %v1090_v36  ;;  %v1103_v49 = vor.u32 1.1754944e-38, %v1102_v11  ;;  %v1080_v23 = vmul.f32 %v1079_v33, %v4647_v50 }
 0x25a   :  { %v3478_v27 = vclamps-f32 %v945_v61, 1.0  ;;  %v1093_v34 = vsub.f32 1.0, %v1092_v42  ;;  %vm1098_vm3 = vmor %vm1096_vm2, %vm1097_vm1  ;;  %vm1101_vm4 = vcmp.eq.f32.partialorder %v1100_v18, 8.507059e+37  ;;  %v451_v31 = vmul.f32 0.5, %v4635_v9 }
 0x25b   :  { %v3481_v22 = vclamps-f32 %v1065_v13, 1.0  ;;  %v450_v50 = vmul.f32 0.5, %v4572_v57 }
 0x25c   :  { %v1119_v52 = vadd.f32 1.0, %v3478_v27  ;;  %v1094_v47 = vmul.f32 %v3660_v0, %v1093_v34 }
 0x25d   :  { %v1122_v4 = vadd.f32 1.0, %v3481_v22 }
 0x25e   :  { %v1135_v10 = vmul.f32 %v1119_v52, %v447_v35  ;;  %v1095_v25 = vadd.f32 %v3660_v0, %v1094_v47 }
 0x25f   :  { %3496 = vmatmul.msk.f32.gmra.mxu2 %vm1142_vm14, %v4455_v8  ;;  %v1138_v41 = vmul.f32 %v1122_v4, %v450_v50 }
 0x260   :  { %1278 = vmatpush.msra.mxu1 %v1135_v10  ;;  %v1099_v46 = vsel %vm1098_vm3, %v3660_v0, %v1095_v25 }
 0x261   :  { %v1104_v48 = vsel %vm1101_vm4, %v1103_v49, %v1099_v46 }
 0x262   :  { %1279 = vmatpush.msra.mxu1 %v1134_v44  ;;  %v1105_v55 = vmul.f32 %v1104_v48, %v1080_v23 }
 0x263   :  { %3493 = vmatmul.msk.f32.vlgmr.msra.gmra.mxu1 %vm1142_vm14, %v4408_v1 }
 0x264   :  { %v3482_v37 = vclamps-f32 %v1105_v55, 1.0 }
 0x266   :  { %v1123_v59 = vadd.f32 1.0, %v3482_v37 }
 0x268   :  { %v1139_v32 = vmul.f32 %v1123_v59, %v451_v31 }
 0x26a   :  { %1324 = vmatpush.msra.mxu3 %v1139_v32 }
 0x26b   :  { %3494 = vmatmul.msk.f32.gmra.mxu1 %vm1142_vm14, %v4455_v8 }
 0x26c   :  { %1325 = vmatpush.msra.mxu3 %v1138_v41 }
 0x26d   :  { %v4748_v29 = vpop.f32.mrf.mxu0  ;;  %3497 = vmatmul.msk.f32.vlgmr.msra.gmra.mxu3 %vm1142_vm14, %v4408_v1 }
 0x26e   :  { %v1167_v5 = vadd.f32 %v4748_v29, %v4781_v24 }
 0x275   :  { %v1169_v3 = vpop.f32.mrf.mxu0  ;;  %3498 = vmatmul.msk.f32.gmra.mxu3 %vm1142_vm14, %v4455_v8 }
 0x276   :  { %v1170_v15 = vadd.f32 %v1169_v3, %v4756_v2 }
 0x278   :  { %v3499_v12 = vmul.f32 -1.442695, %v1170_v15 }
 0x27a   :  { %3661 = vpow2.f32 %v3499_v12 }
 0x27d   :  { %v4766_v17 = vpop.f32.mrf.mxu0 }
 0x280   :  { %v3662_v53 = vpop.eup %3661 }
 0x281   :  { %v1357_v14 = vadd.f32 1.0, %v3662_v53 }
 0x283   :  { %3663 = vrcp.f32 %v1357_v14  ;;  %v1376_v21 = vand.u32 2147483648, %v1357_v14  ;;  %vm1370_vm5 = vweird.f32 %v1357_v14  ;;  %v1374_v40 = vand.u32 2147483647, %v1357_v14 }
 0x285   :  { %v1261_v9 = vpop.f32.mrf.mxu0  ;;  %v1377_v30 = vor.u32 1.1754944e-38, %v1376_v21  ;;  %vm1375_vm8 = vcmp.eq.f32.partialorder %v1374_v40, 8.507059e+37 }
 0x286   :  { %v4771_v36 = vadd.f32 %v1261_v9, %v4756_v2 }
 0x288   :  { %v3503_v60 = vmul.f32 -1.442695, %v4771_v36 }
 0x289   :  { %v3664_v62 = vpop.eup %3663 }
 0x28a   :  { %v1366_v57 = vmul.f32 %v3664_v62, %v1357_v14  ;;  %3665 = vpow2.f32 %v3503_v60  ;;  %vm1371_vm6 = vweird.f32 %v3664_v62 }
 0x28b   :  { %vm1372_vm7 = vmor %vm1370_vm5, %vm1371_vm6  ;;  %v4783_v45 = vpop.f32.mrf.mxu3 }
 0x28c   :  { %v1367_v51 = vsub.f32 1.0, %v1366_v57  ;;  %v4776_v58 = vpop.f32.mrf.mxu1 }
 0x28d   :  { %v1190_v53 = vadd.f32 %v4776_v58, %v4781_v24 }
 0x28e   :  { %v1368_v1 = vmul.f32 %v3664_v62, %v1367_v51 }
 0x290   :  { %v3666_v43 = vpop.eup %3665  ;;  %v1369_v54 = vadd.f32 %v3664_v62, %v1368_v1  ;;  %v1259_v1 = vadd.f32 %v4766_v17, %v4781_v24 }
 0x291   :  { %v1361_v8 = vadd.f32 1.0, %v3666_v43 }
 0x292   :  { %v1373_v61 = vsel %vm1372_vm7, %v3664_v62, %v1369_v54 }
 0x293   :  { %v1378_v56 = vsel %vm1375_vm8, %v1377_v30, %v1373_v61  ;;  %3667 = vrcp.f32 %v1361_v8  ;;  %v1238_v42 = vpop.f32.mrf.mxu3  ;;  %vm1430_vm14 = vweird.f32 %v1361_v8  ;;  %v1436_v25 = vand.u32 2147483648, %v1361_v8 }
 0x294   :  { %v1485_v27 = vmul.f32 %v1378_v56, %v1170_v15  ;;  %v1192_v0 = vpop.f32.mrf.mxu1  ;;  %v4796_v38 = vadd.f32 %v1238_v42, %v4756_v2  ;;  %v1434_v48 = vand.u32 2147483647, %v1361_v8  ;;  %v3824_v56 = vld [vmem:[%s5973_s0 + $0x8] sm:$0xff] }
 0x295   :  { %v1193_v20 = vadd.f32 %v1192_v0, %v4756_v2  ;;  %v1437_v37 = vor.u32 1.1754944e-38, %v1436_v25 }
 0x296   :  { %v1493_v26 = vmul.f32 %v1485_v27, %v1167_v5  ;;  %v3502_v10 = vmul.f32 -1.442695, %v4796_v38  ;;  %vm1435_vm13 = vcmp.eq.f32.partialorder %v1434_v48, 8.507059e+37  ;;  %v1236_v27 = vadd.f32 %v4783_v45, %v4781_v24 }
 0x297   :  { %v3500_v35 = vmul.f32 -1.442695, %v1193_v20 }
 0x298   :  { %v4791_v39 = vadd.f32 %v3823_v63, %v1493_v26 }
 0x299   :  { %3669 = vpow2.f32 %v3500_v35  ;;  %v3668_v52 = vpop.eup %3667 }
 0x29a   :  { %v1551_v7 = vsel %vm37_vm0, %v4791_v39, 0.0  ;;  %v1426_v19 = vmul.f32 %v3668_v52, %v1361_v8  ;;  %3671 = vpow2.f32 %v3502_v10  ;;  %vm1431_vm10 = vweird.f32 %v3668_v52 }
 0x29b   :  { %1552 = vadd.xlane.f32.xlu1 %v1551_v7  ;;  %vm4805_vm11 = vmor %vm1430_vm14, %vm1431_vm10 }
 0x29c   :  { %v4798_v29 = vpop.f32.mrf.mxu2  ;;  %v1427_v28 = vsub.f32 1.0, %v1426_v19 }
 0x29e   :  { %v1428_v44 = vmul.f32 %v3668_v52, %v1427_v28 }
 0x29f   :  { %v3670_v34 = vpop.eup %3669 }
 0x2a0   :  { %v1358_v6 = vadd.f32 1.0, %v3670_v34  ;;  %v3672_v11 = vpop.eup %3671  ;;  %v1429_v46 = vadd.f32 %v3668_v52, %v1428_v44  ;;  %v3826_v34 = vld [vmem:[%s5973_s0 + $0x18] sm:$0xff] }
 0x2a1   :  { %v1360_v18 = vadd.f32 1.0, %v3672_v11 }
 0x2a2   :  { %3673 = vrcp.f32 %v1358_v6  ;;  %v1391_v3 = vand.u32 2147483648, %v1358_v6  ;;  %vm1385_vm12 = vweird.f32 %v1358_v6  ;;  %v1389_v22 = vand.u32 2147483647, %v1358_v6 }
 0x2a3   :  { %3675 = vrcp.f32 %v1360_v18  ;;  %v1433_v31 = vsel %vm4805_vm11, %v3668_v52, %v1429_v46  ;;  %v1421_v57 = vand.u32 2147483648, %v1360_v18  ;;  %vm1415_vm2 = vweird.f32 %v1360_v18  ;;  %v3825_v52 = vld [vmem:[%s5973_s0 + $0x20] sm:$0xff] }
 0x2a4   :  { %v1215_v33 = vpop.f32.mrf.mxu2  ;;  %v1392_v4 = vor.u32 1.1754944e-38, %v1391_v3  ;;  %vm1390_vm1 = vcmp.eq.f32.partialorder %v1389_v22, 8.507059e+37  ;;  %v1438_v14 = vsel %vm1435_vm13, %v1437_v37, %v1433_v31  ;;  %v1419_v51 = vand.u32 2147483647, %v1360_v18 }
 0x2a5   :  { %v4802_v47 = vadd.f32 %v1215_v33, %v4756_v2  ;;  %v1489_v30 = vmul.f32 %v1438_v14, %v4771_v36  ;;  %v1422_v58 = vor.u32 1.1754944e-38, %v1421_v57  ;;  %v1213_v33 = vadd.f32 %v4798_v29, %v4781_v24 }
 0x2a6   :  { %vm1420_vm5 = vcmp.eq.f32.partialorder %v1419_v51, 8.507059e+37 }
 0x2a7   :  { %v3501_v49 = vmul.f32 -1.442695, %v4802_v47  ;;  %v1497_v61 = vmul.f32 %v1489_v30, %v1259_v1 }
 0x2a8   :  { %v3674_v13 = vpop.eup %3673 }
 0x2a9   :  { %v1381_v23 = vmul.f32 %v3674_v13, %v1358_v6  ;;  %3677 = vpow2.f32 %v3501_v49  ;;  %vm1386_vm9 = vweird.f32 %v3674_v13  ;;  %v3676_v59 = vpop.eup %3675  ;;  %v4829_v7 = vadd.f32 %v3825_v52, %v1497_v61  ;;  %v3828_v52 = vld [vmem:[%s5973_s0 + $0x30] sm:$0xff] }
 0x2aa   :  { %vm1387_vm15 = vmor %vm1385_vm12, %vm1386_vm9  ;;  %v1411_v32 = vmul.f32 %v3676_v59, %v1360_v18  ;;  %vm1416_vm3 = vweird.f32 %v3676_v59 }
 0x2ab   :  { %v1382_v15 = vsub.f32 1.0, %v1381_v23  ;;  %vm1417_vm4 = vmor %vm1415_vm2, %vm1416_vm3  ;;  %v1563_v28 = vsel %vm37_vm0, %v4829_v7, 0.0  ;;  %v3827_v23 = vld [vmem:[%s5973_s0 + $0x10] sm:$0xff] }
 0x2ac   :  { %v1412_v62 = vsub.f32 1.0, %v1411_v32 }
 0x2ad   :  { %v1383_v12 = vmul.f32 %v3674_v13, %v1382_v15 }
 0x2ae   :  { %v1413_v43 = vmul.f32 %v3676_v59, %v1412_v62 }
 0x2af   :  { %v1384_v50 = vadd.f32 %v3674_v13, %v1383_v12  ;;  %v3678_v41 = vpop.eup %3677 }
 0x2b0   :  { %v1359_v60 = vadd.f32 1.0, %v3678_v41  ;;  %v1414_v8 = vadd.f32 %v3676_v59, %v1413_v43 }
 0x2b1   :  { %v1388_v9 = vsel %vm1387_vm15, %v3674_v13, %v1384_v50 }
 0x2b2   :  { %v1393_v21 = vsel %vm1390_vm1, %v1392_v4, %v1388_v9  ;;  %3679 = vrcp.f32 %v1359_v60  ;;  %v1418_v17 = vsel %vm1417_vm4, %v3676_v59, %v1414_v8  ;;  %vm1400_vm6 = vweird.f32 %v1359_v60 }
 0x2b3   :  { %v1486_v40 = vmul.f32 %v1393_v21, %v1193_v20  ;;  %v1423_v20 = vsel %vm1420_vm5, %v1422_v58, %v1418_v17  ;;  %v1406_v63 = vand.u32 2147483648, %v1359_v60  ;;  %v1404_v45 = vand.u32 2147483647, %v1359_v60 }
 0x2b4   :  { %v1488_v35 = vmul.f32 %v1423_v20, %v4796_v38 }
 0x2b5   :  { %v1494_v54 = vmul.f32 %v1486_v40, %v1190_v53  ;;  %v1407_v38 = vor.u32 1.1754944e-38, %v1406_v63  ;;  %vm1405_vm14 = vcmp.eq.f32.partialorder %v1404_v45, 8.507059e+37 }
 0x2b6   :  { %v1496_v19 = vmul.f32 %v1488_v35, %v1236_v27 }
 0x2b7   :  { %v4819_v5 = vadd.f32 %v3824_v56, %v1494_v54 }
 0x2b8   :  { %v3680_v0 = vpop.eup %3679  ;;  %v4834_v6 = vadd.f32 %v3826_v34, %v1496_v19 }
 0x2b9   :  { %v1554_v36 = vsel %vm37_vm0, %v4819_v5, 0.0  ;;  %v1396_v26 = vmul.f32 %v3680_v0, %v1359_v60  ;;  %vm1401_vm7 = vweird.f32 %v3680_v0 }
 0x2ba   :  { %1555 = vadd.xlane.f32.xlu2 %v1554_v36  ;;  %vm1402_vm8 = vmor %vm1400_vm6, %vm1401_vm7  ;;  %v1560_v44 = vsel %vm37_vm0, %v4834_v6, 0.0 }
 0x2bb   :  { %v1397_v42 = vsub.f32 1.0, %v1396_v26  ;;  %1561 = vadd.xlane.f32.xlu1 %v1560_v44 }
 0x2bd   :  { %v1398_v10 = vmul.f32 %v3680_v0, %v1397_v42 }
 0x2bf   :  { %v1399_v11 = vadd.f32 %v3680_v0, %v1398_v10 }
 0x2c1   :  { %v1403_v18 = vsel %vm1402_vm8, %v3680_v0, %v1399_v11 }
 0x2c2   :  { %1564 = vadd.xlane.f32.xlu2 %v1563_v28  ;;  %v1408_v13 = vsel %vm1405_vm14, %v1407_v38, %v1403_v18 }
 0x2c3   :  { %v1487_v25 = vmul.f32 %v1408_v13, %v4802_v47  ;;  %v3829_v13 = vld [vmem:[%s5973_s0 + $0x28] sm:$0xff] }
 0x2c5   :  { %v1495_v49 = vmul.f32 %v1487_v25, %v1213_v33 }
 0x2c7   :  { %v4846_v46 = vadd.f32 %v3827_v23, %v1495_v49 }
 0x2c9   :  { %v1557_v48 = vsel %vm37_vm0, %v4846_v46, 0.0 }
 0x2ca   :  { %1558 = vadd.xlane.f32.xlu0 %v1557_v48 }
 0x2da   :  { %v1304_v3 = vpop.f32.mrf.mxu2 }
 0x2db   :  { %v1305_v54 = vadd.f32 %v1304_v3, %v4781_v24 }
 0x2e0   :  { %v1281_v55 = vpop.f32.mrf.mxu1 }
 0x2e1   :  { %v1282_v11 = vadd.f32 %v1281_v55, %v4781_v24 }
 0x2e2   :  { %v1307_v15 = vpop.f32.mrf.mxu2 }
 0x2e3   :  { %v1308_v29 = vadd.f32 %v1307_v15, %v4756_v2 }
 0x2e5   :  { %v3505_v22 = vmul.f32 -1.442695, %v1308_v29 }
 0x2e7   :  { %3681 = vpow2.f32 %v3505_v22 }
 0x2e8   :  { %v1284_v37 = vpop.f32.mrf.mxu1 }
 0x2e9   :  { %v1285_v47 = vadd.f32 %v1284_v37, %v4756_v2 }
 0x2eb   :  { %v3504_v31 = vmul.f32 -1.442695, %v1285_v47 }
 0x2ed   :  { %v3682_v12 = vpop.eup %3681  ;;  %3683 = vpow2.f32 %v3504_v31 }
 0x2ee   :  { %v1363_v59 = vadd.f32 1.0, %v3682_v12 }
 0x2f0   :  { %3685 = vrcp.f32 %v1363_v59  ;;  %v4852_v41 = vpop.f32.mrf.mxu3  ;;  %v1466_v9 = vand.u32 2147483648, %v1363_v59  ;;  %v1464_v62 = vand.u32 2147483647, %v1363_v59  ;;  %vm1460_vm11 = vweird.f32 %v1363_v59 }
 0x2f1   :  { %v1328_v31 = vadd.f32 %v4852_v41, %v4781_v24 }
 0x2f2   :  { %v1467_v51 = vor.u32 1.1754944e-38, %v1466_v9  ;;  %vm1465_vm9 = vcmp.eq.f32.partialorder %v1464_v62, 8.507059e+37 }
 0x2f3   :  { %v3684_v4 = vpop.eup %3683 }
 0x2f4   :  { %v1362_v32 = vadd.f32 1.0, %v3684_v4 }
 0x2f6   :  { %v3686_v50 = vpop.eup %3685  ;;  %3687 = vrcp.f32 %v1362_v32  ;;  %v1449_v0 = vand.u32 2147483647, %v1362_v32  ;;  %v1451_v36 = vand.u32 2147483648, %v1362_v32  ;;  %vm1445_vm15 = vweird.f32 %v1362_v32 }
 0x2f7   :  { %v1456_v53 = vmul.f32 %v3686_v50, %v1363_v59  ;;  %vm1461_vm10 = vweird.f32 %v3686_v50 }
 0x2f8   :  { %vm1462_vm12 = vmor %vm1460_vm11, %vm1461_vm10  ;;  %v1330_v40 = vpop.f32.mrf.mxu3  ;;  %v1452_v45 = vor.u32 1.1754944e-38, %v1451_v36  ;;  %vm1450_vm2 = vcmp.eq.f32.partialorder %v1449_v0, 8.507059e+37 }
 0x2f9   :  { %v1457_v14 = vsub.f32 1.0, %v1456_v53  ;;  %v1331_v43 = vadd.f32 %v1330_v40, %v4756_v2  ;;  %v3830_v53 = vld [vmem:[%s5973_s0 + $0x38] sm:$0xff] }
 0x2fb   :  { %v1458_v60 = vmul.f32 %v3686_v50, %v1457_v14  ;;  %v3506_v27 = vmul.f32 -1.442695, %v1331_v43 }
 0x2fc   :  { %v3688_v21 = vpop.eup %3687 }
 0x2fd   :  { %v1459_v57 = vadd.f32 %v3686_v50, %v1458_v60  ;;  %v1441_v1 = vmul.f32 %v3688_v21, %v1362_v32  ;;  %vm1446_vm13 = vweird.f32 %v3688_v21  ;;  %3689 = vpow2.f32 %v3506_v27 }
 0x2fe   :  { %vm1447_vm1 = vmor %vm1445_vm15, %vm1446_vm13 }
 0x2ff   :  { %v1463_v30 = vsel %vm1462_vm12, %v3686_v50, %v1459_v57  ;;  %v1442_v61 = vsub.f32 1.0, %v1441_v1 }
 0x300   :  { %v1468_v58 = vsel %vm1465_vm9, %v1467_v51, %v1463_v30 }
 0x301   :  { %v1491_v56 = vmul.f32 %v1468_v58, %v1308_v29  ;;  %v1443_v20 = vmul.f32 %v3688_v21, %v1442_v61 }
 0x303   :  { %v1499_v26 = vmul.f32 %v1491_v56, %v1305_v54  ;;  %v1444_v63 = vadd.f32 %v3688_v21, %v1443_v20  ;;  %v3690_v28 = vpop.eup %3689 }
 0x304   :  { %v1364_v33 = vadd.f32 1.0, %v3690_v28 }
 0x305   :  { %v4865_v42 = vadd.f32 %v3828_v52, %v1499_v26  ;;  %v1448_v19 = vsel %vm1447_vm1, %v3688_v21, %v1444_v63  ;;  %v1512_v52 = vld [vmem:[%s5975_s2 + $0x18] sm:$0xff] }
 0x306   :  { %v1453_v38 = vsel %vm1450_vm2, %v1452_v45, %v1448_v19  ;;  %3691 = vrcp.f32 %v1364_v33  ;;  %v1481_v15 = vand.u32 2147483648, %v1364_v33  ;;  %v1479_v55 = vand.u32 2147483647, %v1364_v33  ;;  %1785 = vmatpush.msrb.mxu0 %v1512_v52  ;;  %v1511_v19 = vld [vmem:[%s5975_s2 + $0x10] sm:$0xff] }
 0x307   :  { %v1569_v34 = vsel %vm37_vm0, %v4865_v42, 0.0  ;;  %v1490_v44 = vmul.f32 %v1453_v38, %v1285_v47  ;;  %vm1475_vm4 = vweird.f32 %v1364_v33  ;;  %v1510_v38 = vld [vmem:[%s5975_s2 + $0x8] sm:$0xff] }
 0x308   :  { %1570 = vadd.xlane.f32.xlu2 %v1569_v34  ;;  %v1482_v37 = vor.u32 1.1754944e-38, %v1481_v15  ;;  %vm1480_vm6 = vcmp.eq.f32.partialorder %v1479_v55, 8.507059e+37  ;;  %1786 = vmatpush.msrb.mxu0 %v1511_v19 }
 0x309   :  { %v1498_v18 = vmul.f32 %v1490_v44, %v1282_v11  ;;  %v1509_v11 = vld [vmem:[%s5975_s2] sm:$0xff] }
 0x30a   :  { %1787 = vmatpush.msrb.mxu0 %v1510_v38 }
 0x30b   :  { %v4874_v25 = vadd.f32 %v3829_v13, %v1498_v18 }
 0x30c   :  { %v3692_v23 = vpop.eup %3691  ;;  %1788 = vmatpush.msrb.mxu0 %v1509_v11 }
 0x30d   :  { %v1566_v49 = vsel %vm37_vm0, %v4874_v25, 0.0  ;;  %v1471_v48 = vmul.f32 %v3692_v23, %v1364_v33  ;;  %vm1476_vm3 = vweird.f32 %v3692_v23 }
 0x30e   :  { %v1553_v8 = vpop.xlane.xlu1 %1552  ;;  %1567 = vadd.xlane.f32.xlu0 %v1566_v49  ;;  %vm1477_vm5 = vmor %vm1475_vm4, %vm1476_vm3 }
 0x30f   :  { %v1575_v17 = vmul.f32 %v1553_v8, %v3921_v16  ;;  %v1472_v3 = vsub.f32 1.0, %v1471_v48 }
 0x311   :  { %v4858_v35 = vsub.f32 %v4791_v39, %v1575_v17  ;;  %v1473_v29 = vmul.f32 %v3692_v23, %v1472_v3 }
 0x313   :  { %v1591_v2 = vmul.f32 %v4858_v35, %v4858_v35  ;;  %v1474_v22 = vadd.f32 %v3692_v23, %v1473_v29  ;;  %v4945_v29 = vld [vmem:[%s5977_s4] ss:$0 sm:$0xff] }
 0x315   :  { %v1599_v10 = vsel %vm37_vm0, %v1591_v2, 0.0  ;;  %v1478_v47 = vsel %vm1477_vm5, %v3692_v23, %v1474_v22 }
 0x316   :  { %1600 = vadd.xlane.f32.xlu1 %v1599_v10  ;;  %v1483_v12 = vsel %vm1480_vm6, %v1482_v37, %v1478_v47  ;;  %v4951_v37 = vld [vmem:[%s5977_s4 + $0x1] ss:$0 sm:$0xff] }
 0x317   :  { %v1492_v59 = vmul.f32 %v1483_v12, %v1331_v43 }
 0x319   :  { %v1500_v4 = vmul.f32 %v1492_v59, %v1328_v31 }
 0x31b   :  { %v4884_v14 = vadd.f32 %v3830_v53, %v1500_v4 }
 0x31d   :  { %v1572_v60 = vsel %vm37_vm0, %v4884_v14, 0.0 }
 0x31e   :  { %1573 = vadd.xlane.f32.xlu1 %v1572_v60 }
 0x32d   :  { %v1556_v50 = vpop.xlane.xlu2 %1555 }
 0x32e   :  { %v1576_v32 = vmul.f32 %v1556_v50, %v3921_v16  ;;  %v1562_v62 = vpop.xlane.xlu1 %1561 }
 0x32f   :  { %v1578_v21 = vmul.f32 %v1562_v62, %v3921_v16 }
 0x330   :  { %v4887_v9 = vsub.f32 %v4819_v5, %v1576_v32 }
 0x331   :  { %v4897_v40 = vsub.f32 %v4834_v6, %v1578_v21 }
 0x332   :  { %v1592_v24 = vmul.f32 %v4887_v9, %v4887_v9 }
 0x333   :  { %v1594_v30 = vmul.f32 %v4897_v40, %v4897_v40 }
 0x334   :  { %v1602_v41 = vsel %vm37_vm0, %v1592_v24, 0.0 }
 0x335   :  { %v1565_v57 = vpop.xlane.xlu2 %1564  ;;  %1603 = vadd.xlane.f32.xlu0 %v1602_v41  ;;  %v1608_v54 = vsel %vm37_vm0, %v1594_v30, 0.0 }
 0x336   :  { %v1579_v51 = vmul.f32 %v1565_v57, %v3921_v16 }
 0x338   :  { %v4900_v1 = vsub.f32 %v4829_v7, %v1579_v51 }
 0x33a   :  { %v1595_v43 = vmul.f32 %v4900_v1, %v4900_v1 }
 0x33c   :  { %v1611_v58 = vsel %vm37_vm0, %v1595_v43, 0.0 }
 0x33d   :  { %1612 = vadd.xlane.f32.xlu1 %v1611_v58  ;;  %1609 = vadd.xlane.f32.xlu0 %v1608_v54  ;;  %v1559_v8 = vpop.xlane.xlu0 %1558 }
 0x33e   :  { %v1577_v61 = vmul.f32 %v1559_v8, %v3921_v16 }
 0x340   :  { %v4910_v56 = vsub.f32 %v4846_v46, %v1577_v61 }
 0x342   :  { %v1593_v27 = vmul.f32 %v4910_v56, %v4910_v56 }
 0x344   :  { %v1605_v17 = vsel %vm37_vm0, %v1593_v27, 0.0 }
 0x345   :  { %1606 = vadd.xlane.f32.xlu2 %v1605_v17 }
 0x37b   :  { %v1571_v36 = vpop.xlane.xlu2 %1570 }
 0x37c   :  { %v1581_v26 = vmul.f32 %v1571_v36, %v3921_v16 }
 0x37e   :  { %v4918_v2 = vsub.f32 %v4865_v42, %v1581_v26 }
 0x380   :  { %v1597_v45 = vmul.f32 %v4918_v2, %v4918_v2 }
 0x381   :  { %v1568_v34 = vpop.xlane.xlu0 %1567 }
 0x382   :  { %v1617_v10 = vsel %vm37_vm0, %v1597_v45, 0.0  ;;  %v1580_v28 = vmul.f32 %v1568_v34, %v3921_v16 }
 0x383   :  { %1618 = vadd.xlane.f32.xlu0 %v1617_v10 }
 0x384   :  { %v4937_v33 = vsub.f32 %v4874_v25, %v1580_v28 }
 0x386   :  { %v1596_v13 = vmul.f32 %v4937_v33, %v4937_v33 }
 0x388   :  { %v1614_v23 = vsel %vm37_vm0, %v1596_v13, 0.0 }
 0x389   :  { %v1601_v0 = vpop.xlane.xlu1 %1600  ;;  %1615 = vadd.xlane.f32.xlu2 %v1614_v23 }
 0x38a   :  { %v1623_v20 = vmul.f32 %v1601_v0, %v3921_v16 }
 0x38c   :  { %v1631_v63 = vadd.f32 1e-05, %v1623_v20 }
 0x38e   :  { %3693 = vrsqrt.f32 %v1631_v63  ;;  %vm1645_vm8 = vweird.f32 %v1631_v63 }
 0x391   :  { %v1574_v31 = vpop.xlane.xlu1 %1573 }
 0x392   :  { %v1582_v59 = vmul.f32 %v1574_v31, %v3921_v16 }
 0x394   :  { %v3694_v44 = vpop.eup %3693  ;;  %v4958_v50 = vsub.f32 %v4884_v14, %v1582_v59 }
 0x395   :  { %v1640_v18 = vmul.f32 %v3694_v44, %v1631_v63  ;;  %vm1646_vm7 = vweird.f32 %v3694_v44 }
 0x396   :  { %vm1647_vm14 = vmor %vm1645_vm8, %vm1646_vm7  ;;  %v1598_v32 = vmul.f32 %v4958_v50, %v4958_v50 }
 0x397   :  { %v1641_v49 = vmul.f32 %v3694_v44, %v1640_v18 }
 0x398   :  { %v1620_v60 = vsel %vm37_vm0, %v1598_v32, 0.0 }
 0x399   :  { %v1642_v48 = vmul.f32 0.5, %v1641_v49  ;;  %1621 = vadd.xlane.f32.xlu1 %v1620_v60 }
 0x39b   :  { %v1643_v3 = vsub.f32 1.5, %v1642_v48 }
 0x39d   :  { %v1644_v15 = vmul.f32 %v3694_v44, %v1643_v3 }
 0x39f   :  { %v1648_v55 = vsel %vm1647_vm14, %v3694_v44, %v1644_v15 }
 0x3a0   :  { %v1719_v22 = vmul.f32 %v1648_v55, %v4858_v35 }
 0x3a2   :  { %v1728_v47 = vmul.f32 %v4945_v29, %v1719_v22 }
 0x3a4   :  { %v1737_v12 = vadd.f32 %v4951_v37, %v1728_v47 }
 0x3a6   :  { %3507 = vmatmul.msk.f32.vlgmr.msrb.gmra.mxu0 %vm37_vm0, %v1737_v12 }
 0x3a8   :  { %v1604_v4 = vpop.xlane.xlu0 %1603 }
 0x3a9   :  { %v1624_v35 = vmul.f32 %v1604_v4, %v3921_v16 }
 0x3ab   :  { %v1632_v53 = vadd.f32 1e-05, %v1624_v35 }
 0x3ad   :  { %3695 = vrsqrt.f32 %v1632_v53  ;;  %vm1655_vm11 = vweird.f32 %v1632_v53 }
 0x3b0   :  { %v1610_v24 = vpop.xlane.xlu0 %1609  ;;  %v1613_v41 = vpop.xlane.xlu1 %1612 }
 0x3b1   :  { %v1626_v62 = vmul.f32 %v1610_v24, %v3921_v16  ;;  %v1627_v30 = vmul.f32 %v1613_v41, %v3921_v16 }
 0x3b3   :  { %v3696_v57 = vpop.eup %3695  ;;  %v1634_v21 = vadd.f32 1e-05, %v1626_v62  ;;  %v1635_v58 = vadd.f32 1e-05, %v1627_v30 }
 0x3b4   :  { %v1650_v51 = vmul.f32 %v3696_v57, %v1632_v53  ;;  %vm1656_vm10 = vweird.f32 %v3696_v57 }
 0x3b5   :  { %3697 = vrsqrt.f32 %v1634_v21  ;;  %vm1657_vm12 = vmor %vm1655_vm11, %vm1656_vm10  ;;  %vm1675_vm15 = vweird.f32 %v1634_v21  ;;  %vm1685_vm5 = vweird.f32 %v1635_v58 }
 0x3b6   :  { %v1651_v43 = vmul.f32 %v3696_v57, %v1650_v51  ;;  %3699 = vrsqrt.f32 %v1635_v58 }
 0x3b8   :  { %v1652_v54 = vmul.f32 0.5, %v1651_v43  ;;  %v1607_v8 = vpop.xlane.xlu2 %1606 }
 0x3b9   :  { %v1625_v27 = vmul.f32 %v1607_v8, %v3921_v16 }
 0x3ba   :  { %v1653_v61 = vsub.f32 1.5, %v1652_v54 }
 0x3bb   :  { %v3698_v17 = vpop.eup %3697  ;;  %v1633_v36 = vadd.f32 1e-05, %v1625_v27 }
 0x3bc   :  { %v1654_v0 = vmul.f32 %v3696_v57, %v1653_v61  ;;  %v1670_v20 = vmul.f32 %v3698_v17, %v1634_v21  ;;  %v3700_v19 = vpop.eup %3699  ;;  %vm1676_vm9 = vweird.f32 %v3698_v17 }
 0x3bd   :  { %3701 = vrsqrt.f32 %v1633_v36  ;;  %v1680_v28 = vmul.f32 %v3700_v19, %v1635_v58  ;;  %vm1665_vm1 = vweird.f32 %v1633_v36  ;;  %vm1677_vm2 = vmor %vm1675_vm15, %vm1676_vm9  ;;  %vm1686_vm4 = vweird.f32 %v3700_v19 }
 0x3be   :  { %v1658_v26 = vsel %vm1657_vm12, %v3696_v57, %v1654_v0  ;;  %v1671_v52 = vmul.f32 %v3698_v17, %v1670_v20  ;;  %vm1687_vm6 = vmor %vm1685_vm5, %vm1686_vm4  ;;  %vm2167_vm5 = vcmask 523264  }
 0x3bf   :  { %v1720_v63 = vmul.f32 %v1658_v26, %v4887_v9  ;;  %v1681_v13 = vmul.f32 %v3700_v19, %v1680_v28 }
 0x3c0   :  { %v1672_v34 = vmul.f32 0.5, %v1671_v52 }
 0x3c1   :  { %v1729_v45 = vmul.f32 %v4945_v29, %v1720_v63  ;;  %v1682_v48 = vmul.f32 0.5, %v1681_v13  ;;  %v4988_v63 = vld [vmem:[%s5977_s4 + $0x4] ss:$0 sm:$0xff] }
 0x3c2   :  { %v1673_v18 = vsub.f32 1.5, %v1672_v34 }
 0x3c3   :  { %v1738_v10 = vadd.f32 %v4951_v37, %v1729_v45  ;;  %v3702_v38 = vpop.eup %3701  ;;  %v1683_v47 = vsub.f32 1.5, %v1682_v48 }
 0x3c4   :  { %v1660_v11 = vmul.f32 %v3702_v38, %v1633_v36  ;;  %vm1666_vm13 = vweird.f32 %v3702_v38  ;;  %v1674_v9 = vmul.f32 %v3698_v17, %v1673_v18 }
 0x3c5   :  { %3508 = vmatmul.msk.f32.gmra.mxu0 %vm37_vm0, %v1738_v10  ;;  %vm1667_vm3 = vmor %vm1665_vm1, %vm1666_vm13  ;;  %v1684_v4 = vmul.f32 %v3700_v19, %v1683_v47 }
 0x3c6   :  { %v1661_v44 = vmul.f32 %v3702_v38, %v1660_v11  ;;  %v1678_v55 = vsel %vm1677_vm2, %v3698_v17, %v1674_v9 }
 0x3c7   :  { %v1722_v31 = vmul.f32 %v1678_v55, %v4897_v40  ;;  %v1688_v32 = vsel %vm1687_vm6, %v3700_v19, %v1684_v4 }
 0x3c8   :  { %v1662_v49 = vmul.f32 0.5, %v1661_v44 }
 0x3c9   :  { %v1731_v35 = vmul.f32 %v4945_v29, %v1722_v31 }
 0x3ca   :  { %v1663_v23 = vsub.f32 1.5, %v1662_v49 }
 0x3cb   :  { %v1740_v53 = vadd.f32 %v4951_v37, %v1731_v35 }
 0x3cc   :  { %v1664_v3 = vmul.f32 %v3702_v38, %v1663_v23 }
 0x3ce   :  { %v1668_v15 = vsel %vm1667_vm3, %v3702_v38, %v1664_v3 }
 0x3cf   :  { %v1721_v22 = vmul.f32 %v1668_v15, %v4910_v56  ;;  %v1723_v56 = vmul.f32 %v1688_v32, %v4900_v1 }
 0x3d1   :  { %v1730_v12 = vmul.f32 %v4945_v29, %v1721_v22  ;;  %v1732_v60 = vmul.f32 %v4945_v29, %v1723_v56 }
 0x3d3   :  { %v1739_v59 = vadd.f32 %v4951_v37, %v1730_v12  ;;  %v1741_v40 = vadd.f32 %v4951_v37, %v1732_v60 }
 0x3d5   :  { %3509 = vmatmul.msk.f32.gmra.mxu0 %vm37_vm0, %v1739_v59 }
 0x3dd   :  { %3510 = vmatmul.msk.f32.gmra.mxu0 %vm37_vm0, %v1740_v53 }
 0x3e5   :  { %3511 = vmatmul.msk.f32.gmra.mxu0 %vm37_vm0, %v1741_v40 }
 0x3f6   :  { %v1619_v24 = vpop.xlane.xlu0 %1618 }
 0x3f7   :  { %v1629_v41 = vmul.f32 %v1619_v24, %v3921_v16 }
 0x3f9   :  { %v1637_v62 = vadd.f32 1e-05, %v1629_v41 }
 0x3fb   :  { %3703 = vrsqrt.f32 %v1637_v62  ;;  %vm1705_vm11 = vweird.f32 %v1637_v62 }
 0x3fc   :  { %v1616_v57 = vpop.xlane.xlu2 %1615 }
 0x3fd   :  { %v1628_v21 = vmul.f32 %v1616_v57, %v3921_v16  ;;  %v1524_v57 = vld [vmem:[%s5976_s3 + $0x38] sm:$0xff] }
 0x3fe   :  { %2200 = vmatpush.msrb.mxu1 %v1524_v57 }
 0x3ff   :  { %v1636_v30 = vadd.f32 1e-05, %v1628_v21  ;;  %v1532_v21 = vld [vmem:[%s5976_s3 + $0x78] sm:$0xff] }
 0x400   :  { %2242 = vmatpush.msrb.mxu2 %v1532_v21 }
 0x401   :  { %v3704_v51 = vpop.eup %3703  ;;  %3705 = vrsqrt.f32 %v1636_v30  ;;  %vm1695_vm8 = vweird.f32 %v1636_v30 }
 0x402   :  { %v1700_v43 = vmul.f32 %v3704_v51, %v1637_v62  ;;  %vm1706_vm14 = vweird.f32 %v3704_v51 }
 0x403   :  { %vm1707_vm12 = vmor %vm1705_vm11, %vm1706_vm14 }
 0x404   :  { %v1701_v1 = vmul.f32 %v3704_v51, %v1700_v43 }
 0x406   :  { %v1702_v8 = vmul.f32 0.5, %v1701_v1  ;;  %v1531_v1 = vld [vmem:[%s5976_s3 + $0x70] sm:$0xff] }
 0x407   :  { %v3706_v54 = vpop.eup %3705  ;;  %2243 = vmatpush.msrb.mxu2 %v1531_v1 }
 0x408   :  { %v1690_v58 = vmul.f32 %v3706_v54, %v1636_v30  ;;  %v1703_v17 = vsub.f32 1.5, %v1702_v8  ;;  %vm1696_vm7 = vweird.f32 %v3706_v54  ;;  %v1530_v8 = vld [vmem:[%s5976_s3 + $0x68] sm:$0xff] }
 0x409   :  { %vm1697_vm10 = vmor %vm1695_vm8, %vm1696_vm7  ;;  %2244 = vmatpush.msrb.mxu2 %v1530_v8 }
 0x40a   :  { %v1691_v61 = vmul.f32 %v3706_v54, %v1690_v58  ;;  %v1704_v20 = vmul.f32 %v3704_v51, %v1703_v17  ;;  %v1529_v17 = vld [vmem:[%s5976_s3 + $0x60] sm:$0xff] }
 0x40b   :  { %2245 = vmatpush.msrb.mxu2 %v1529_v17 }
 0x40c   :  { %v1692_v27 = vmul.f32 0.5, %v1691_v61  ;;  %v1622_v26 = vpop.xlane.xlu1 %1621  ;;  %v1708_v38 = vsel %vm1707_vm12, %v3704_v51, %v1704_v20 }
 0x40d   :  { %v1630_v52 = vmul.f32 %v1622_v26, %v3921_v16  ;;  %v1725_v13 = vmul.f32 %v1708_v38, %v4918_v2 }
 0x40e   :  { %v1693_v0 = vsub.f32 1.5, %v1692_v27 }
 0x40f   :  { %v1638_v19 = vadd.f32 1e-05, %v1630_v52  ;;  %v1734_v9 = vmul.f32 %v4945_v29, %v1725_v13  ;;  %v1519_v52 = vld [vmem:[%s5976_s3 + $0x10] sm:$0xff]  ;;  %v1517_v13 = vld [vmem:[%s5976_s3] sm:$0xff] }
 0x410   :  { %v1694_v36 = vmul.f32 %v3706_v54, %v1693_v0  ;;  %v1520_v0 = vld [vmem:[%s5976_s3 + $0x18] sm:$0xff] }
 0x411   :  { %3707 = vrsqrt.f32 %v1638_v19  ;;  %v1743_v2 = vadd.f32 %v4951_v37, %v1734_v9  ;;  %vm1715_vm13 = vweird.f32 %v1638_v19 }
 0x412   :  { %v1698_v45 = vsel %vm1697_vm10, %v3706_v54, %v1694_v36  ;;  %v1528_v36 = vld [vmem:[%s5976_s3 + $0x58] sm:$0xff] }
 0x413   :  { %v1724_v34 = vmul.f32 %v1698_v45, %v4937_v33  ;;  %2246 = vmatpush.msrb.mxu2 %v1528_v36  ;;  %v1527_v45 = vld [vmem:[%s5976_s3 + $0x50] sm:$0xff] }
 0x415   :  { %v1733_v11 = vmul.f32 %v4945_v29, %v1724_v34  ;;  %2247 = vmatpush.msrb.mxu2 %v1527_v45  ;;  %v1526_v34 = vld [vmem:[%s5976_s3 + $0x48] sm:$0xff] }
 0x417   :  { %v1742_v18 = vadd.f32 %v4951_v37, %v1733_v11  ;;  %v3708_v23 = vpop.eup %3707  ;;  %2248 = vmatpush.msrb.mxu2 %v1526_v34 }
 0x418   :  { %v1710_v48 = vmul.f32 %v3708_v23, %v1638_v19  ;;  %vm1716_vm9 = vweird.f32 %v3708_v23 }
 0x419   :  { %3512 = vmatmul.msk.f32.gmra.mxu0 %vm37_vm0, %v1742_v18  ;;  %vm1717_vm15 = vmor %vm1715_vm13, %vm1716_vm9 }
 0x41a   :  { %v1711_v55 = vmul.f32 %v3708_v23, %v1710_v48 }
 0x41c   :  { %v1712_v12 = vmul.f32 0.5, %v1711_v55 }
 0x41e   :  { %v1713_v4 = vsub.f32 1.5, %v1712_v12 }
 0x420   :  { %v1714_v53 = vmul.f32 %v3708_v23, %v1713_v4 }
 0x421   :  { %3513 = vmatmul.msk.f32.gmra.mxu0 %vm37_vm0, %v1743_v2 }
 0x422   :  { %v1718_v60 = vsel %vm1717_vm15, %v3708_v23, %v1714_v53 }
 0x423   :  { %v1790_v10 = vpop.f32.mrf.mxu0  ;;  %v1726_v41 = vmul.f32 %v1718_v60, %v4958_v50  ;;  %v1523_v50 = vld [vmem:[%s5976_s3 + $0x30] sm:$0xff] }
 0x424   :  { %v4993_v28 = vadd.f32 %v4988_v63, %v1790_v10  ;;  %2201 = vmatpush.msrb.mxu1 %v1523_v50  ;;  %v1518_v10 = vld [vmem:[%s5976_s3 + $0x8] sm:$0xff] }
 0x425   :  { %v1735_v51 = vmul.f32 %v4945_v29, %v1726_v41  ;;  %v1522_v29 = vld [vmem:[%s5976_s3 + $0x28] sm:$0xff] }
 0x426   :  { %v4997_v44 = vmul.f32 0.70710677, %v4993_v28  ;;  %2202 = vmatpush.msrb.mxu1 %v1522_v29 }
 0x427   :  { %v1744_v54 = vadd.f32 %v4951_v37, %v1735_v51  ;;  %v1521_v37 = vld [vmem:[%s5976_s3 + $0x20] sm:$0xff] }
 0x428   :  { %v1830_v49 = vmul.f32 %v4997_v44, %v4997_v44  ;;  %2203 = vmatpush.msrb.mxu1 %v1521_v37 }
 0x429   :  { %3514 = vmatmul.msk.f32.gmra.mxu0 %vm37_vm0, %v1744_v54 }
 0x42a   :  { %v5004_v33 = vmin.f32 %v1830_v49, 16.0  ;;  %2204 = vmatpush.msrb.mxu1 %v1520_v0  ;;  %v1525_v49 = vld [vmem:[%s5976_s3 + $0x40] sm:$0xff] }
 0x42b   :  { %2249 = vmatpush.msrb.mxu2 %v1525_v49 }
 0x42c   :  { %v1832_v3 = vmul.f32 2.1237322e-06, %v5004_v33  ;;  %v1843_v15 = vmul.f32 3.8918573e-05, %v5004_v33  ;;  %2205 = vmatpush.msrb.mxu1 %v1519_v52 }
 0x42e   :  { %v1833_v22 = vadd.f32 0.00028619796, %v1832_v3  ;;  %v1844_v47 = vadd.f32 0.001143296, %v1843_v15  ;;  %2206 = vmatpush.msrb.mxu1 %v1518_v10 }
 0x430   :  { %v1834_v31 = vmul.f32 %v1833_v22, %v5004_v33  ;;  %v1845_v59 = vmul.f32 %v1844_v47, %v5004_v33  ;;  %2207 = vmatpush.msrb.mxu1 %v1517_v13 }
 0x432   :  { %v1835_v35 = vadd.f32 0.0036580483, %v1834_v31  ;;  %v1846_v32 = vadd.f32 0.014752088, %v1845_v59 }
 0x434   :  { %v1847_v56 = vmul.f32 %v1846_v32, %v5004_v33  ;;  %v1836_v40 = vmul.f32 %v1835_v35, %v5004_v33 }
 0x436   :  { %v1848_v24 = vadd.f32 0.112945676, %v1847_v56  ;;  %v1837_v30 = vadd.f32 0.05243302, %v1836_v40 }
 0x438   :  { %v1849_v62 = vmul.f32 %v1848_v24, %v5004_v33  ;;  %v1838_v61 = vmul.f32 %v1837_v30, %v5004_v33 }
 0x43a   :  { %v1850_v43 = vadd.f32 0.4994258, %v1849_v62  ;;  %v1839_v20 = vadd.f32 0.18741608, %v1838_v61 }
 0x43c   :  { %v1851_v58 = vmul.f32 %v1850_v43, %v5004_v33  ;;  %v1840_v18 = vmul.f32 %v1839_v20, %v5004_v33  ;;  %v1814_v43 = vmul.f32 0.5, %v4993_v28 }
 0x43e   :  { %v1852_v27 = vadd.f32 1.0, %v1851_v58  ;;  %v1841_v15 = vadd.f32 1.1283791, %v1840_v18 }
 0x440   :  { %3709 = vrcp.f32 %v1852_v27  ;;  %v1862_v55 = vand.u32 2147483647, %v1852_v27  ;;  %v1864_v33 = vand.u32 2147483648, %v1852_v27  ;;  %vm1858_vm2 = vweird.f32 %v1852_v27 }
 0x441   :  { %v1842_v4 = vmul.f32 %v1841_v15, %v4997_v44 }
 0x442   :  { %v1793_v26 = vpop.f32.mrf.mxu0  ;;  %v1865_v35 = vor.u32 1.1754944e-38, %v1864_v33  ;;  %vm1863_vm4 = vcmp.eq.f32.partialorder %v1862_v55, 8.507059e+37 }
 0x443   :  { %v5059_v19 = vadd.f32 %v4988_v63, %v1793_v26 }
 0x445   :  { %v5068_v38 = vmul.f32 0.70710677, %v5059_v19 }
 0x446   :  { %v3710_v11 = vpop.eup %3709 }
 0x447   :  { %v1854_v23 = vmul.f32 %v3710_v11, %v1852_v27  ;;  %v1870_v9 = vmul.f32 %v5068_v38, %v5068_v38  ;;  %vm1859_vm1 = vweird.f32 %v3710_v11 }
 0x448   :  { %vm1860_vm3 = vmor %vm1858_vm2, %vm1859_vm1 }
 0x449   :  { %v1855_v48 = vsub.f32 1.0, %v1854_v23  ;;  %v1871_v3 = vmin.f32 %v1870_v9, 16.0 }
 0x44b   :  { %v1856_v22 = vmul.f32 %v3710_v11, %v1855_v48  ;;  %v1872_v47 = vmul.f32 2.1237322e-06, %v1871_v3  ;;  %v1883_v2 = vmul.f32 3.8918573e-05, %v1871_v3 }
 0x44d   :  { %v1857_v12 = vadd.f32 %v3710_v11, %v1856_v22  ;;  %v1873_v31 = vadd.f32 0.00028619796, %v1872_v47  ;;  %v1884_v59 = vadd.f32 0.001143296, %v1883_v2 }
 0x44f   :  { %v1861_v32 = vsel %vm1860_vm3, %v3710_v11, %v1857_v12  ;;  %v1874_v53 = vmul.f32 %v1873_v31, %v1871_v3  ;;  %v1885_v56 = vmul.f32 %v1884_v59, %v1871_v3 }
 0x450   :  { %v1866_v60 = vsel %vm1863_vm4, %v1865_v35, %v1861_v32 }
 0x451   :  { %v1867_v40 = vmul.f32 %v1866_v60, %v1842_v4  ;;  %v1875_v24 = vadd.f32 0.0036580483, %v1874_v53  ;;  %v1886_v41 = vadd.f32 0.014752088, %v1885_v56 }
 0x452   :  { %v1796_v51 = vpop.f32.mrf.mxu0 }
 0x453   :  { %v3515_v62 = vclamps-f32 %v1867_v40, 1.0  ;;  %v1876_v57 = vmul.f32 %v1875_v24, %v1871_v3  ;;  %v1887_v21 = vmul.f32 %v1886_v41, %v1871_v3  ;;  %v5081_v30 = vadd.f32 %v4988_v63, %v1796_v51 }
 0x455   :  { %v2150_v44 = vadd.f32 1.0, %v3515_v62  ;;  %v1888_v50 = vadd.f32 0.112945676, %v1887_v21  ;;  %v1877_v1 = vadd.f32 0.05243302, %v1876_v57 }
 0x456   :  { %v5085_v54 = vmul.f32 0.70710677, %v5081_v30 }
 0x457   :  { %v2158_v58 = vmul.f32 %v2150_v44, %v1814_v43  ;;  %v1889_v29 = vmul.f32 %v1888_v50, %v1871_v3  ;;  %v1878_v27 = vmul.f32 %v1877_v1, %v1871_v3 }
 0x458   :  { %v1910_v8 = vmul.f32 %v5085_v54, %v5085_v54 }
 0x459   :  { %v1890_v61 = vadd.f32 0.4994258, %v1889_v29  ;;  %3523 = vmatmul.msk.f32.vlgmr.msrb.gmra.mxu1 %vm2167_vm5, %v2158_v58  ;;  %3531 = vmatmul.msk.f32.vlgmr.msrb.gmra.mxu2 %vm2167_vm5, %v2158_v58  ;;  %v1879_v52 = vadd.f32 0.18741608, %v1878_v27 }
 0x45a   :  { %v5091_v37 = vmin.f32 %v1910_v8, 16.0  ;;  %v1799_v17 = vpop.f32.mrf.mxu0 }
 0x45b   :  { %v1891_v28 = vmul.f32 %v1890_v61, %v1871_v3  ;;  %v5096_v20 = vadd.f32 %v4988_v63, %v1799_v17  ;;  %v1880_v13 = vmul.f32 %v1879_v52, %v1871_v3 }
 0x45c   :  { %v1912_v0 = vmul.f32 2.1237322e-06, %v5091_v37  ;;  %v1923_v36 = vmul.f32 3.8918573e-05, %v5091_v37 }
 0x45d   :  { %v1892_v26 = vadd.f32 1.0, %v1891_v28  ;;  %v5101_v18 = vmul.f32 0.70710677, %v5096_v20  ;;  %v1881_v2 = vadd.f32 1.1283791, %v1880_v13 }
 0x45e   :  { %v1913_v45 = vadd.f32 0.00028619796, %v1912_v0  ;;  %v1924_v10 = vadd.f32 0.001143296, %v1923_v36 }
 0x45f   :  { %3711 = vrcp.f32 %v1892_v26  ;;  %v1950_v9 = vmul.f32 %v5101_v18, %v5101_v18  ;;  %v1902_v3 = vand.u32 2147483647, %v1892_v26  ;;  %v1904_v32 = vand.u32 2147483648, %v1892_v26 }
 0x460   :  { %v1914_v34 = vmul.f32 %v1913_v45, %v5091_v37  ;;  %v1925_v11 = vmul.f32 %v1924_v10, %v5091_v37  ;;  %vm1898_vm7 = vweird.f32 %v1892_v26  ;;  %v1882_v1 = vmul.f32 %v1881_v2, %v5068_v38 }
 0x461   :  { %v5106_v55 = vmin.f32 %v1950_v9, 16.0  ;;  %v1905_v58 = vor.u32 1.1754944e-38, %v1904_v32  ;;  %vm1903_vm14 = vcmp.eq.f32.partialorder %v1902_v3, 8.507059e+37 }
 0x462   :  { %v1915_v49 = vadd.f32 0.0036580483, %v1914_v34  ;;  %v1926_v23 = vadd.f32 0.014752088, %v1925_v11  ;;  %v1802_v48 = vpop.f32.mrf.mxu0 }
 0x463   :  { %v5109_v33 = vadd.f32 %v4988_v63, %v1802_v48  ;;  %v1952_v59 = vmul.f32 2.1237322e-06, %v5106_v55  ;;  %v1963_v4 = vmul.f32 3.8918573e-05, %v5106_v55  ;;  %v1815_v48 = vmul.f32 0.5, %v5059_v19 }
 0x464   :  { %v1927_v15 = vmul.f32 %v1926_v23, %v5091_v37  ;;  %v1916_v47 = vmul.f32 %v1915_v49, %v5091_v37 }
 0x465   :  { %v3712_v22 = vpop.eup %3711  ;;  %v5116_v56 = vmul.f32 0.70710677, %v5109_v33  ;;  %v1953_v40 = vadd.f32 0.00028619796, %v1952_v59  ;;  %v1964_v24 = vadd.f32 0.001143296, %v1963_v4 }
 0x466   :  { %v1894_v12 = vmul.f32 %v3712_v22, %v1892_v26  ;;  %v1928_v31 = vadd.f32 0.112945676, %v1927_v15  ;;  %v1917_v60 = vadd.f32 0.05243302, %v1916_v47  ;;  %vm1899_vm6 = vweird.f32 %v3712_v22 }
 0x467   :  { %v1990_v57 = vmul.f32 %v5116_v56, %v5116_v56  ;;  %v1954_v21 = vmul.f32 %v1953_v40, %v5106_v55  ;;  %v1965_v51 = vmul.f32 %v1964_v24, %v5106_v55  ;;  %vm1900_vm8 = vmor %vm1898_vm7, %vm1899_vm6 }
 0x468   :  { %v1895_v35 = vsub.f32 1.0, %v1894_v12  ;;  %v1929_v53 = vmul.f32 %v1928_v31, %v5091_v37  ;;  %v1918_v29 = vmul.f32 %v1917_v60, %v5091_v37 }
 0x469   :  { %v5123_v50 = vmin.f32 %v1990_v57, 16.0  ;;  %v1966_v8 = vadd.f32 0.014752088, %v1965_v51  ;;  %v1955_v0 = vadd.f32 0.0036580483, %v1954_v21 }
 0x46a   :  { %v1896_v41 = vmul.f32 %v3712_v22, %v1895_v35  ;;  %v1930_v62 = vadd.f32 0.4994258, %v1929_v53  ;;  %v1919_v45 = vadd.f32 0.18741608, %v1918_v29 }
 0x46b   :  { %v1992_v28 = vmul.f32 2.1237322e-06, %v5123_v50  ;;  %v1967_v36 = vmul.f32 %v1966_v8, %v5106_v55  ;;  %v2003_v26 = vmul.f32 3.8918573e-05, %v5123_v50  ;;  %v1956_v11 = vmul.f32 %v1955_v0, %v5106_v55 }
 0x46c   :  { %v1897_v43 = vadd.f32 %v3712_v22, %v1896_v41  ;;  %v1931_v44 = vmul.f32 %v1930_v62, %v5091_v37  ;;  %v1920_v47 = vmul.f32 %v1919_v45, %v5091_v37 }
 0x46d   :  { %v1968_v38 = vadd.f32 0.112945676, %v1967_v36  ;;  %v1993_v10 = vadd.f32 0.00028619796, %v1992_v28  ;;  %v2004_v34 = vadd.f32 0.001143296, %v2003_v26 }
 0x46e   :  { %v1901_v61 = vsel %vm1900_vm8, %v3712_v22, %v1897_v43  ;;  %v1932_v27 = vadd.f32 1.0, %v1931_v44  ;;  %v1957_v3 = vadd.f32 0.05243302, %v1956_v11  ;;  %v1921_v19 = vadd.f32 1.1283791, %v1920_v47 }
 0x46f   :  { %v1906_v17 = vsel %vm1903_vm14, %v1905_v58, %v1901_v61  ;;  %v1969_v49 = vmul.f32 %v1968_v38, %v5106_v55  ;;  %v1994_v23 = vmul.f32 %v1993_v10, %v5123_v50  ;;  %v2005_v9 = vmul.f32 %v2004_v34, %v5123_v50 }
 0x470   :  { %v1907_v52 = vmul.f32 %v1906_v17, %v1882_v1  ;;  %3713 = vrcp.f32 %v1932_v27  ;;  %v1944_v60 = vand.u32 2147483648, %v1932_v27  ;;  %v1942_v41 = vand.u32 2147483647, %v1932_v27 }
 0x471   :  { %v1970_v2 = vadd.f32 0.4994258, %v1969_v49  ;;  %v2006_v12 = vadd.f32 0.014752088, %v2005_v9  ;;  %v1995_v35 = vadd.f32 0.0036580483, %v1994_v23  ;;  %v1958_v62 = vmul.f32 %v1957_v3, %v5106_v55 }
 0x472   :  { %v3516_v13 = vclamps-f32 %v1907_v52, 1.0  ;;  %vm1938_vm11 = vweird.f32 %v1932_v27  ;;  %v1922_v43 = vmul.f32 %v1921_v19, %v5085_v54  ;;  %v1945_v44 = vor.u32 1.1754944e-38, %v1944_v60 }
 0x473   :  { %v1971_v4 = vmul.f32 %v1970_v2, %v5106_v55  ;;  %v2007_v32 = vmul.f32 %v2006_v12, %v5123_v50  ;;  %v1996_v57 = vmul.f32 %v1995_v35, %v5123_v50  ;;  %vm1943_vm9 = vcmp.eq.f32.partialorder %v1942_v41, 8.507059e+37 }
 0x474   :  { %v2151_v15 = vadd.f32 1.0, %v3516_v13  ;;  %v1959_v58 = vadd.f32 0.18741608, %v1958_v62  ;;  %v1816_v38 = vmul.f32 0.5, %v5081_v30  ;;  %v1817_v19 = vmul.f32 0.5, %v5096_v20 }
 0x475   :  { %v1972_v40 = vadd.f32 1.0, %v1971_v4  ;;  %v2008_v24 = vadd.f32 0.112945676, %v2007_v32  ;;  %v1997_v61 = vadd.f32 0.05243302, %v1996_v57 }
 0x476   :  { %v3714_v22 = vpop.eup %3713  ;;  %v2159_v59 = vmul.f32 %v2151_v15, %v1815_v48  ;;  %v1960_v36 = vmul.f32 %v1959_v58, %v5106_v55 }
 0x477   :  { %v1934_v31 = vmul.f32 %v3714_v22, %v1932_v27  ;;  %vm1939_vm10 = vweird.f32 %v3714_v22  ;;  %3715 = vrcp.f32 %v1972_v40  ;;  %v2009_v51 = vmul.f32 %v2008_v24, %v5123_v50 }
 0x478   :  { %3524 = vmatmul.msk.f32.gmra.mxu1 %vm2167_vm5, %v2159_v59  ;;  %3532 = vmatmul.msk.f32.gmra.mxu2 %vm2167_vm5, %v2159_v59  ;;  %vm1940_vm12 = vmor %vm1938_vm11, %vm1939_vm10  ;;  %v1998_v52 = vmul.f32 %v1997_v61, %v5123_v50  ;;  %v1984_v10 = vand.u32 2147483648, %v1972_v40  ;;  %v1961_v11 = vadd.f32 1.1283791, %v1960_v36  ;;  %v1982_v49 = vand.u32 2147483647, %v1972_v40 }
 0x479   :  { %v1935_v53 = vsub.f32 1.0, %v1934_v31  ;;  %v2010_v29 = vadd.f32 0.4994258, %v2009_v51  ;;  %vm1978_vm15 = vweird.f32 %v1972_v40 }
 0x47a   :  { %v1999_v23 = vadd.f32 0.18741608, %v1998_v52  ;;  %v1985_v55 = vor.u32 1.1754944e-38, %v1984_v10  ;;  %vm1983_vm2 = vcmp.eq.f32.partialorder %v1982_v49, 8.507059e+37 }
 0x47b   :  { %v1936_v37 = vmul.f32 %v3714_v22, %v1935_v53  ;;  %v2011_v17 = vmul.f32 %v2010_v29, %v5123_v50 }
 0x47c   :  { %v2000_v2 = vmul.f32 %v1999_v23, %v5123_v50 }
 0x47d   :  { %v1937_v21 = vadd.f32 %v3714_v22, %v1936_v37  ;;  %v3716_v0 = vpop.eup %3715  ;;  %v2012_v27 = vadd.f32 1.0, %v2011_v17 }
 0x47e   :  { %v1974_v26 = vmul.f32 %v3716_v0, %v1972_v40  ;;  %vm1979_vm13 = vweird.f32 %v3716_v0  ;;  %v2001_v35 = vadd.f32 1.1283791, %v2000_v2 }
 0x47f   :  { %v1941_v1 = vsel %vm1940_vm12, %v3714_v22, %v1937_v21  ;;  %3717 = vrcp.f32 %v2012_v27  ;;  %vm1980_vm1 = vmor %vm1978_vm15, %vm1979_vm13  ;;  %v1962_v22 = vmul.f32 %v1961_v11, %v5101_v18  ;;  %v2024_v59 = vand.u32 2147483648, %v2012_v27 }
 0x480   :  { %v1946_v8 = vsel %vm1943_vm9, %v1945_v44, %v1941_v1  ;;  %v1975_v54 = vsub.f32 1.0, %v1974_v26  ;;  %v2022_v53 = vand.u32 2147483647, %v2012_v27  ;;  %vm2018_vm4 = vweird.f32 %v2012_v27 }
 0x481   :  { %v1947_v28 = vmul.f32 %v1946_v8, %v1922_v43  ;;  %v2025_v18 = vor.u32 1.1754944e-38, %v2024_v59  ;;  %v2002_v37 = vmul.f32 %v2001_v35, %v5116_v56  ;;  %v1818_v21 = vmul.f32 0.5, %v5109_v33 }
 0x482   :  { %v1976_v13 = vmul.f32 %v3716_v0, %v1975_v54  ;;  %vm2023_vm7 = vcmp.eq.f32.partialorder %v2022_v53, 8.507059e+37 }
 0x483   :  { %v3517_v45 = vclamps-f32 %v1947_v28, 1.0 }
 0x484   :  { %v1977_v48 = vadd.f32 %v3716_v0, %v1976_v13 }
 0x485   :  { %v2152_v34 = vadd.f32 1.0, %v3517_v45  ;;  %v3718_v15 = vpop.eup %3717 }
 0x486   :  { %v1981_v30 = vsel %vm1980_vm1, %v3716_v0, %v1977_v48  ;;  %v2014_v12 = vmul.f32 %v3718_v15, %v2012_v27  ;;  %vm2019_vm3 = vweird.f32 %v3718_v15 }
 0x487   :  { %v2160_v9 = vmul.f32 %v2152_v34, %v1816_v38  ;;  %v1986_v47 = vsel %vm1983_vm2, %v1985_v55, %v1981_v30  ;;  %vm2020_vm6 = vmor %vm2018_vm4, %vm2019_vm3 }
 0x488   :  { %v1987_v31 = vmul.f32 %v1986_v47, %v1962_v22  ;;  %v2015_v3 = vsub.f32 1.0, %v2014_v12 }
 0x489   :  { %3525 = vmatmul.msk.f32.gmra.mxu1 %vm2167_vm5, %v2160_v9  ;;  %3533 = vmatmul.msk.f32.gmra.mxu2 %vm2167_vm5, %v2160_v9 }
 0x48a   :  { %v3518_v4 = vclamps-f32 %v1987_v31, 1.0  ;;  %v2016_v32 = vmul.f32 %v3718_v15, %v2015_v3 }
 0x48c   :  { %v2153_v60 = vadd.f32 1.0, %v3518_v4  ;;  %v2017_v40 = vadd.f32 %v3718_v15, %v2016_v32 }
 0x48e   :  { %v2161_v24 = vmul.f32 %v2153_v60, %v1817_v19  ;;  %v2021_v50 = vsel %vm2020_vm6, %v3718_v15, %v2017_v40 }
 0x48f   :  { %v2026_v41 = vsel %vm2023_vm7, %v2025_v18, %v2021_v50 }
 0x490   :  { %v2027_v62 = vmul.f32 %v2026_v41, %v2002_v37 }
 0x491   :  { %3526 = vmatmul.msk.f32.gmra.mxu1 %vm2167_vm5, %v2161_v24  ;;  %3534 = vmatmul.msk.f32.gmra.mxu2 %vm2167_vm5, %v2161_v24 }
 0x492   :  { %v3519_v57 = vclamps-f32 %v2027_v62, 1.0 }
 0x494   :  { %v2154_v20 = vadd.f32 1.0, %v3519_v57 }
 0x496   :  { %v2162_v51 = vmul.f32 %v2154_v20, %v1818_v21  ;;  %v1805_v43 = vpop.f32.mrf.mxu0 }
 0x497   :  { %v5160_v56 = vadd.f32 %v4988_v63, %v1805_v43 }
 0x499   :  { %3527 = vmatmul.msk.f32.gmra.mxu1 %vm2167_vm5, %v2162_v51  ;;  %3535 = vmatmul.msk.f32.gmra.mxu2 %vm2167_vm5, %v2162_v51  ;;  %v5163_v44 = vmul.f32 0.70710677, %v5160_v56 }
 0x49b   :  { %v2030_v1 = vmul.f32 %v5163_v44, %v5163_v44 }
 0x49d   :  { %v2031_v58 = vmin.f32 %v2030_v1, 16.0 }
 0x49e   :  { %v1808_v29 = vpop.f32.mrf.mxu0 }
 0x49f   :  { %v2032_v8 = vmul.f32 2.1237322e-06, %v2031_v58  ;;  %v2043_v33 = vmul.f32 3.8918573e-05, %v2031_v58  ;;  %v5168_v61 = vadd.f32 %v4988_v63, %v1808_v29 }
 0x4a1   :  { %v2033_v28 = vadd.f32 0.00028619796, %v2032_v8  ;;  %v2044_v17 = vadd.f32 0.001143296, %v2043_v33  ;;  %v5171_v0 = vmul.f32 0.70710677, %v5168_v61 }
 0x4a3   :  { %v2034_v36 = vmul.f32 %v2033_v28, %v2031_v58  ;;  %v2045_v26 = vmul.f32 %v2044_v17, %v2031_v58  ;;  %v2070_v27 = vmul.f32 %v5171_v0, %v5171_v0 }
 0x4a5   :  { %v2046_v52 = vadd.f32 0.014752088, %v2045_v26  ;;  %v2035_v45 = vadd.f32 0.0036580483, %v2034_v36  ;;  %v5175_v54 = vmin.f32 %v2070_v27, 16.0 }
 0x4a6   :  { %v1811_v9 = vpop.f32.mrf.mxu0 }
 0x4a7   :  { %v2047_v38 = vmul.f32 %v2046_v52, %v2031_v58  ;;  %v2072_v10 = vmul.f32 2.1237322e-06, %v5175_v54  ;;  %v2083_v34 = vmul.f32 3.8918573e-05, %v5175_v54  ;;  %v2036_v13 = vmul.f32 %v2035_v45, %v2031_v58 }
 0x4a8   :  { %v5180_v55 = vadd.f32 %v4988_v63, %v1811_v9 }
 0x4a9   :  { %v2048_v11 = vadd.f32 0.112945676, %v2047_v38  ;;  %v2073_v49 = vadd.f32 0.00028619796, %v2072_v10  ;;  %v2084_v23 = vadd.f32 0.001143296, %v2083_v34 }
 0x4aa   :  { %v2037_v47 = vadd.f32 0.05243302, %v2036_v13  ;;  %v5185_v12 = vmul.f32 0.70710677, %v5180_v55 }
 0x4ab   :  { %v2049_v48 = vmul.f32 %v2048_v11, %v2031_v58  ;;  %v2074_v15 = vmul.f32 %v2073_v49, %v5175_v54  ;;  %v2085_v22 = vmul.f32 %v2084_v23, %v5175_v54 }
 0x4ac   :  { %v2110_v4 = vmul.f32 %v5185_v12, %v5185_v12  ;;  %v2038_v63 = vmul.f32 %v2037_v47, %v2031_v58 }
 0x4ad   :  { %v2050_v30 = vadd.f32 0.4994258, %v2049_v48  ;;  %v2086_v2 = vadd.f32 0.014752088, %v2085_v22  ;;  %v2075_v3 = vadd.f32 0.0036580483, %v2074_v15 }
 0x4ae   :  { %v5190_v53 = vmin.f32 %v2110_v4, 16.0  ;;  %v2039_v24 = vadd.f32 0.18741608, %v2038_v63 }
 0x4af   :  { %v2051_v31 = vmul.f32 %v2050_v30, %v2031_v58  ;;  %v2087_v59 = vmul.f32 %v2086_v2, %v5175_v54  ;;  %v2076_v19 = vmul.f32 %v2075_v3, %v5175_v54 }
 0x4b0   :  { %v2112_v40 = vmul.f32 2.1237322e-06, %v5190_v53  ;;  %v2123_v18 = vmul.f32 3.8918573e-05, %v5190_v53  ;;  %v2040_v43 = vmul.f32 %v2039_v24, %v2031_v58 }
 0x4b1   :  { %v2052_v35 = vadd.f32 1.0, %v2051_v31  ;;  %v2088_v32 = vadd.f32 0.112945676, %v2087_v59  ;;  %v2077_v50 = vadd.f32 0.05243302, %v2076_v19 }
 0x4b2   :  { %v2113_v41 = vadd.f32 0.00028619796, %v2112_v40  ;;  %v2124_v62 = vadd.f32 0.001143296, %v2123_v18  ;;  %v2041_v27 = vadd.f32 1.1283791, %v2040_v43 }
 0x4b3   :  { %3719 = vrcp.f32 %v2052_v35  ;;  %v2089_v60 = vmul.f32 %v2088_v32, %v5175_v54  ;;  %v2078_v8 = vmul.f32 %v2077_v50, %v5175_v54  ;;  %v2064_v17 = vand.u32 2147483648, %v2052_v35  ;;  %v5211_v18 = vld [vmem:[%s5977_s4 + $0x3] ss:$0 sm:$0xff] }
 0x4b4   :  { %v2114_v20 = vmul.f32 %v2113_v41, %v5190_v53  ;;  %v2125_v51 = vmul.f32 %v2124_v62, %v5190_v53  ;;  %v2062_v45 = vand.u32 2147483647, %v2052_v35  ;;  %vm2058_vm14 = vweird.f32 %v2052_v35 }
 0x4b5   :  { %v2090_v37 = vadd.f32 0.4994258, %v2089_v60  ;;  %v2079_v38 = vadd.f32 0.18741608, %v2078_v8  ;;  %v2065_v58 = vor.u32 1.1754944e-38, %v2064_v17  ;;  %v2042_v23 = vmul.f32 %v2041_v27, %v5163_v44 }
 0x4b6   :  { %v2126_v33 = vadd.f32 0.014752088, %v2125_v51  ;;  %v2115_v36 = vadd.f32 0.0036580483, %v2114_v20  ;;  %vm2063_vm11 = vcmp.eq.f32.partialorder %v2062_v45, 8.507059e+37  ;;  %v1819_v60 = vmul.f32 0.5, %v5160_v56 }
 0x4b7   :  { %v2091_v57 = vmul.f32 %v2090_v37, %v5175_v54  ;;  %v2080_v15 = vmul.f32 %v2079_v38, %v5175_v54 }
 0x4b8   :  { %v2127_v26 = vmul.f32 %v2126_v33, %v5190_v53  ;;  %v2116_v11 = vmul.f32 %v2115_v36, %v5190_v53 }
 0x4b9   :  { %v3720_v21 = vpop.eup %3719  ;;  %v2092_v29 = vadd.f32 1.0, %v2091_v57 }
 0x4ba   :  { %v2054_v1 = vmul.f32 %v3720_v21, %v2052_v35  ;;  %vm2059_vm8 = vweird.f32 %v3720_v21  ;;  %v2128_v10 = vadd.f32 0.112945676, %v2127_v26  ;;  %v2117_v31 = vadd.f32 0.05243302, %v2116_v11 }
 0x4bb   :  { %3721 = vrcp.f32 %v2092_v29  ;;  %vm2060_vm10 = vmor %vm2058_vm14, %vm2059_vm8  ;;  %v2104_v3 = vand.u32 2147483648, %v2092_v29  ;;  %v2081_v35 = vadd.f32 1.1283791, %v2080_v15  ;;  %v2102_v32 = vand.u32 2147483647, %v2092_v29 }
 0x4bc   :  { %v2055_v28 = vsub.f32 1.0, %v2054_v1  ;;  %v2129_v13 = vmul.f32 %v2128_v10, %v5190_v53  ;;  %vm2098_vm9 = vweird.f32 %v2092_v29  ;;  %v2118_v54 = vmul.f32 %v2117_v31, %v5190_v53 }
 0x4bd   :  { %v2105_v24 = vor.u32 1.1754944e-38, %v2104_v3  ;;  %v2082_v37 = vmul.f32 %v2081_v35, %v5171_v0  ;;  %vm2103_vm15 = vcmp.eq.f32.partialorder %v2102_v32, 8.507059e+37 }
 0x4be   :  { %v2056_v52 = vmul.f32 %v3720_v21, %v2055_v28  ;;  %v2130_v47 = vadd.f32 0.4994258, %v2129_v13 }
 0x4c0   :  { %v2057_v34 = vadd.f32 %v3720_v21, %v2056_v52  ;;  %v2131_v59 = vmul.f32 %v2130_v47, %v5190_v53 }
 0x4c1   :  { %v3722_v49 = vpop.eup %3721 }
 0x4c2   :  { %v2061_v9 = vsel %vm2060_vm10, %v3720_v21, %v2057_v34  ;;  %v2094_v22 = vmul.f32 %v3722_v49, %v2092_v29  ;;  %vm2099_vm12 = vweird.f32 %v3722_v49  ;;  %v2132_v19 = vadd.f32 1.0, %v2131_v59 }
 0x4c3   :  { %v2066_v48 = vsel %vm2063_vm11, %v2065_v58, %v2061_v9  ;;  %vm2100_vm13 = vmor %vm2098_vm9, %vm2099_vm12  ;;  %v2119_v21 = vadd.f32 0.18741608, %v2118_v54  ;;  %v1820_v29 = vmul.f32 0.5, %v5168_v61 }
 0x4c4   :  { %v2067_v30 = vmul.f32 %v2066_v48, %v2042_v23  ;;  %v2095_v2 = vsub.f32 1.0, %v2094_v22  ;;  %3723 = vrcp.f32 %v2132_v19  ;;  %v2144_v36 = vand.u32 2147483648, %v2132_v19 }
 0x4c5   :  { %v2120_v0 = vmul.f32 %v2119_v21, %v5190_v53  ;;  %v2142_v52 = vand.u32 2147483647, %v2132_v19  ;;  %vm2138_vm2 = vweird.f32 %v2132_v19 }
 0x4c6   :  { %v3520_v4 = vclamps-f32 %v2067_v30, 1.0  ;;  %v2096_v63 = vmul.f32 %v3722_v49, %v2095_v2  ;;  %v2145_v61 = vor.u32 1.1754944e-38, %v2144_v36  ;;  %v5228_v2 = vld [vmem:[%s5977_s4 + $0x2] ss:$0 sm:$0xff] }
 0x4c7   :  { %v2121_v26 = vadd.f32 1.1283791, %v2120_v0  ;;  %vm2143_vm4 = vcmp.eq.f32.partialorder %v2142_v52, 8.507059e+37 }
 0x4c8   :  { %v2155_v44 = vadd.f32 1.0, %v3520_v4  ;;  %v2097_v40 = vadd.f32 %v3722_v49, %v2096_v63 }
 0x4c9   :  { %v2122_v10 = vmul.f32 %v2121_v26, %v5185_v12 }
 0x4ca   :  { %v2101_v50 = vsel %vm2100_vm13, %v3722_v49, %v2097_v40  ;;  %v2163_v41 = vmul.f32 %v2155_v44, %v1819_v60  ;;  %v3724_v1 = vpop.eup %3723  ;;  %v1821_v49 = vmul.f32 0.5, %v5180_v55 }
 0x4cb   :  { %v2106_v62 = vsel %vm2103_vm15, %v2105_v24, %v2101_v50  ;;  %v2134_v8 = vmul.f32 %v3724_v1, %v2132_v19  ;;  %vm2139_vm1 = vweird.f32 %v3724_v1 }
 0x4cc   :  { %v2107_v56 = vmul.f32 %v2106_v62, %v2082_v37  ;;  %3528 = vmatmul.msk.f32.gmra.mxu1 %vm2167_vm5, %v2163_v41  ;;  %3536 = vmatmul.msk.f32.gmra.mxu2 %vm2167_vm5, %v2163_v41  ;;  %vm2140_vm3 = vmor %vm2138_vm2, %vm2139_vm1 }
 0x4cd   :  { %v2135_v28 = vsub.f32 1.0, %v2134_v8 }
 0x4ce   :  { %v3521_v43 = vclamps-f32 %v2107_v56, 1.0 }
 0x4cf   :  { %v2136_v27 = vmul.f32 %v3724_v1, %v2135_v28 }
 0x4d0   :  { %v2156_v33 = vadd.f32 1.0, %v3521_v43 }
 0x4d1   :  { %v2137_v38 = vadd.f32 %v3724_v1, %v2136_v27 }
 0x4d2   :  { %v2164_v17 = vmul.f32 %v2156_v33, %v1820_v29 }
 0x4d3   :  { %v2141_v34 = vsel %vm2140_vm3, %v3724_v1, %v2137_v38 }
 0x4d4   :  { %3529 = vmatmul.msk.f32.gmra.mxu1 %vm2167_vm5, %v2164_v17  ;;  %3537 = vmatmul.msk.f32.gmra.mxu2 %vm2167_vm5, %v2164_v17  ;;  %v2146_v58 = vsel %vm2143_vm4, %v2145_v61, %v2141_v34 }
 0x4d5   :  { %v2147_v11 = vmul.f32 %v2146_v58, %v2122_v10 }
 0x4d6   :  { %v2209_v55 = vpop.f32.mrf.mxu1 }
 0x4d7   :  { %v3522_v13 = vclamps-f32 %v2147_v11, 1.0  ;;  %v2210_v35 = vadd.f32 %v5228_v2, %v2209_v55 }
 0x4d9   :  { %v2157_v23 = vadd.f32 1.0, %v3522_v13 }
 0x4db   :  { %v2165_v15 = vmul.f32 %v2157_v23, %v1821_v49 }
 0x4dc   :  { %v2251_v57 = vpop.f32.mrf.mxu2 }
 0x4dd   :  { %v2252_v20 = vadd.f32 %v5211_v18, %v2251_v57  ;;  %3530 = vmatmul.msk.f32.gmra.mxu1 %vm2167_vm5, %v2165_v15  ;;  %3538 = vmatmul.msk.f32.gmra.mxu2 %vm2167_vm5, %v2165_v15 }
 0x4df   :  { %v3539_v51 = vmul.f32 -1.442695, %v2252_v20 }
 0x4e1   :  { %3725 = vpow2.f32 %v3539_v51 }
 0x4e7   :  { %v3726_v45 = vpop.eup %3725 }
 0x4e8   :  { %v2299_v53 = vadd.f32 1.0, %v3726_v45 }
 0x4ea   :  { %3727 = vrcp.f32 %v2299_v53  ;;  %v2318_v30 = vand.u32 2147483648, %v2299_v53  ;;  %v2316_v12 = vand.u32 2147483647, %v2299_v53  ;;  %vm2312_vm7 = vweird.f32 %v2299_v53 }
 0x4ec   :  { %v2319_v3 = vor.u32 1.1754944e-38, %v2318_v30  ;;  %vm2317_vm14 = vcmp.eq.f32.partialorder %v2316_v12, 8.507059e+37 }
 0x4f0   :  { %v3728_v9 = vpop.eup %3727 }
 0x4f1   :  { %v2308_v48 = vmul.f32 %v3728_v9, %v2299_v53  ;;  %vm2313_vm6 = vweird.f32 %v3728_v9 }
 0x4f2   :  { %vm2314_vm8 = vmor %vm2312_vm7, %vm2313_vm6 }
 0x4f3   :  { %v2309_v22 = vsub.f32 1.0, %v2308_v48 }
 0x4f5   :  { %v2310_v47 = vmul.f32 %v3728_v9, %v2309_v22  ;;  %v2212_v21 = vpop.f32.mrf.mxu1 }
 0x4f6   :  { %v2213_v1 = vadd.f32 %v5228_v2, %v2212_v21 }
 0x4f7   :  { %v2311_v31 = vadd.f32 %v3728_v9, %v2310_v47 }
 0x4f9   :  { %v2315_v59 = vsel %vm2314_vm8, %v3728_v9, %v2311_v31 }
 0x4fa   :  { %v2320_v4 = vsel %vm2317_vm14, %v2319_v3, %v2315_v59 }
 0x4fb   :  { %v2427_v63 = vmul.f32 %v2320_v4, %v2252_v20  ;;  %v2254_v32 = vpop.f32.mrf.mxu2 }
 0x4fc   :  { %v2255_v44 = vadd.f32 %v5211_v18, %v2254_v32 }
 0x4fd   :  { %v5231_v19 = vmul.f32 %v2427_v63, %v2210_v35 }
 0x4fe   :  { %v3540_v60 = vmul.f32 -1.442695, %v2255_v44 }
 0x500   :  { %3729 = vpow2.f32 %v3540_v60 }
 0x506   :  { %v3730_v40 = vpop.eup %3729  ;;  %v5245_v38 = vpop.f32.mrf.mxu1 }
 0x507   :  { %v2300_v54 = vadd.f32 1.0, %v3730_v40 }
 0x509   :  { %3731 = vrcp.f32 %v2300_v54  ;;  %v2333_v41 = vand.u32 2147483648, %v2300_v54  ;;  %v2331_v57 = vand.u32 2147483647, %v2300_v54  ;;  %vm2327_vm11 = vweird.f32 %v2300_v54 }
 0x50b   :  { %v2334_v20 = vor.u32 1.1754944e-38, %v2333_v41  ;;  %vm2332_vm9 = vcmp.eq.f32.partialorder %v2331_v57, 8.507059e+37 }
 0x50c   :  { %v2257_v8 = vpop.f32.mrf.mxu2 }
 0x50d   :  { %v5238_v33 = vadd.f32 %v5211_v18, %v2257_v8 }
 0x50e   :  { %v5257_v23 = vpop.f32.mrf.mxu1 }
 0x50f   :  { %v3732_v24 = vpop.eup %3731  ;;  %v3541_v17 = vmul.f32 -1.442695, %v5238_v33 }
 0x510   :  { %v2323_v37 = vmul.f32 %v3732_v24, %v2300_v54  ;;  %vm2328_vm10 = vweird.f32 %v3732_v24 }
 0x511   :  { %vm2329_vm12 = vmor %vm2327_vm11, %vm2328_vm10  ;;  %3733 = vpow2.f32 %v3541_v17 }
 0x512   :  { %v2324_v50 = vsub.f32 1.0, %v2323_v37 }
 0x514   :  { %v2325_v62 = vmul.f32 %v3732_v24, %v2324_v50  ;;  %v2260_v28 = vpop.f32.mrf.mxu2 }
 0x515   :  { %v5242_v36 = vadd.f32 %v5211_v18, %v2260_v28 }
 0x516   :  { %v2326_v56 = vadd.f32 %v3732_v24, %v2325_v62  ;;  %v5266_v59 = vpop.f32.mrf.mxu1 }
 0x517   :  { %v3542_v27 = vmul.f32 -1.442695, %v5242_v36  ;;  %v3734_v52 = vpop.eup %3733 }
 0x518   :  { %v2330_v51 = vsel %vm2329_vm12, %v3732_v24, %v2326_v56  ;;  %v2301_v45 = vadd.f32 1.0, %v3734_v52 }
 0x519   :  { %v2335_v43 = vsel %vm2332_vm9, %v2334_v20, %v2330_v51  ;;  %3735 = vpow2.f32 %v3542_v27 }
 0x51a   :  { %v2428_v29 = vmul.f32 %v2335_v43, %v2255_v44  ;;  %3737 = vrcp.f32 %v2301_v45  ;;  %v2348_v54 = vand.u32 2147483648, %v2301_v45  ;;  %vm2342_vm15 = vweird.f32 %v2301_v45 }
 0x51b   :  { %v2346_v62 = vand.u32 2147483647, %v2301_v45 }
 0x51c   :  { %v5235_v0 = vmul.f32 %v2428_v29, %v2213_v1  ;;  %v2263_v26 = vpop.f32.mrf.mxu2  ;;  %v2349_v1 = vor.u32 1.1754944e-38, %v2348_v54 }
 0x51d   :  { %v5248_v53 = vadd.f32 %v5211_v18, %v2263_v26  ;;  %vm2347_vm4 = vcmp.eq.f32.partialorder %v2346_v62, 8.507059e+37 }
 0x51f   :  { %v3736_v34 = vpop.eup %3735  ;;  %v3543_v11 = vmul.f32 -1.442695, %v5248_v53 }
 0x520   :  { %v5255_v13 = vadd.f32 1.0, %v3736_v34  ;;  %v3738_v49 = vpop.eup %3737 }
 0x521   :  { %v2338_v15 = vmul.f32 %v3738_v49, %v2301_v45  ;;  %vm2343_vm13 = vweird.f32 %v3738_v49 }
 0x522   :  { %vm5279_vm1 = vmor %vm2342_vm15, %vm2343_vm13  ;;  %vm2357_vm8 = vweird.f32 %v5255_v13 }
 0x523   :  { %v2339_v12 = vsub.f32 1.0, %v2338_v15 }
 0x525   :  { %v2340_v3 = vmul.f32 %v3738_v49, %v2339_v12 }
 0x527   :  { %v2341_v40 = vadd.f32 %v3738_v49, %v2340_v3 }
 0x529   :  { %v2345_v43 = vsel %vm5279_vm1, %v3738_v49, %v2341_v40 }
 0x52a   :  { %v2350_v27 = vsel %vm2347_vm4, %v2349_v1, %v2345_v43 }
 0x52b   :  { %v2429_v15 = vmul.f32 %v2350_v27, %v5238_v33 }
 0x549   :  { %v2224_v29 = vpop.f32.mrf.mxu1 }
 0x54f   :  { %v2266_v61 = vpop.f32.mrf.mxu2 }
 0x550   :  { %v5251_v10 = vadd.f32 %v5211_v18, %v2266_v61  ;;  %v2361_v61 = vand.u32 2147483647, %v5255_v13 }
 0x552   :  { %v3544_v58 = vmul.f32 -1.442695, %v5251_v10  ;;  %vm5312_vm12 = vcmp.eq.f32.partialorder %v2361_v61, 8.507059e+37 }
 0x554   :  { %3739 = vpow2.f32 %v3544_v58 }
 0x555   :  { %3741 = vpow2.f32 %v3543_v11  ;;  %v2225_v11 = vadd.f32 %v5228_v2, %v2224_v29  ;;  %v2219_v29 = vadd.f32 %v5228_v2, %v5257_v23 }
 0x556   :  { %3743 = vrcp.f32 %v5255_v13 }
 0x557   :  { %v2269_v9 = vpop.f32.mrf.mxu2 }
 0x558   :  { %v5260_v48 = vadd.f32 %v5211_v18, %v2269_v9 }
 0x55a   :  { %v3740_v22 = vpop.eup %3739  ;;  %v3545_v30 = vmul.f32 -1.442695, %v5260_v48 }
 0x55b   :  { %v2304_v47 = vadd.f32 1.0, %v3740_v22  ;;  %v3742_v31 = vpop.eup %3741  ;;  %v2363_v22 = vand.u32 2147483648, %v5255_v13 }
 0x55c   :  { %3745 = vpow2.f32 %v3545_v30  ;;  %v5264_v55 = vpop.eup %3743  ;;  %v5270_v63 = vadd.f32 1.0, %v3742_v31 }
 0x55d   :  { %3747 = vrcp.f32 %v2304_v47  ;;  %v2353_v35 = vmul.f32 %v5264_v55, %v5255_v13  ;;  %v2393_v57 = vand.u32 2147483648, %v2304_v47  ;;  %v2391_v20 = vand.u32 2147483647, %v2304_v47 }
 0x55e   :  { %vm2387_vm3 = vweird.f32 %v2304_v47  ;;  %vm2358_vm14 = vweird.f32 %v5264_v55  ;;  %v2364_v54 = vor.u32 1.1754944e-38, %v2363_v22  ;;  %v2378_v23 = vand.u32 2147483648, %v5270_v63 }
 0x55f   :  { %v2354_v37 = vsub.f32 1.0, %v2353_v35  ;;  %v2394_v17 = vor.u32 1.1754944e-38, %v2393_v57  ;;  %vm2392_vm7 = vcmp.eq.f32.partialorder %v2391_v20, 8.507059e+37  ;;  %v2216_v35 = vadd.f32 %v5228_v2, %v5245_v38  ;;  %vm5308_vm11 = vmor %vm2357_vm8, %vm2358_vm14 }
 0x560   :  { %v2272_v24 = vpop.f32.mrf.mxu2 }
 0x561   :  { %v5277_v41 = vadd.f32 %v5211_v18, %v2272_v24  ;;  %v2355_v18 = vmul.f32 %v5264_v55, %v2354_v37  ;;  %v2437_v13 = vmul.f32 %v2429_v15, %v2216_v35  ;;  %v2227_v24 = vpop.f32.mrf.mxu1 }
 0x562   :  { %v3746_v4 = vpop.eup %3745 }
 0x563   :  { %v3748_v32 = vpop.eup %3747  ;;  %v5272_v44 = vadd.f32 1.0, %v3746_v4  ;;  %v3546_v51 = vmul.f32 -1.442695, %v5277_v41  ;;  %v2356_v58 = vadd.f32 %v5264_v55, %v2355_v18 }
 0x564   :  { %v2383_v60 = vmul.f32 %v3748_v32, %v2304_v47  ;;  %vm2388_vm2 = vweird.f32 %v3748_v32 }
 0x565   :  { %3749 = vrcp.f32 %v5272_v44  ;;  %vm2389_vm6 = vmor %vm2387_vm3, %vm2388_vm2  ;;  %v2408_v47 = vand.u32 2147483648, %v5272_v44  ;;  %v2406_v4 = vand.u32 2147483647, %v5272_v44  ;;  %vm2402_vm9 = vweird.f32 %v5272_v44 }
 0x566   :  { %3751 = vrcp.f32 %v5270_v63  ;;  %v2384_v50 = vsub.f32 1.0, %v2383_v60  ;;  %v2360_v60 = vsel %vm5308_vm11, %v5264_v55, %v2356_v58  ;;  %vm2372_vm2 = vweird.f32 %v5270_v63 }
 0x567   :  { %3753 = vpow2.f32 %v3546_v51  ;;  %v2409_v37 = vor.u32 1.1754944e-38, %v2408_v47  ;;  %vm2407_vm15 = vcmp.eq.f32.partialorder %v2406_v4, 8.507059e+37  ;;  %v2365_v55 = vsel %vm5312_vm12, %v2364_v54, %v2360_v60 }
 0x568   :  { %v2385_v21 = vmul.f32 %v3748_v32, %v2384_v50  ;;  %v2430_v20 = vmul.f32 %v2365_v55, %v5242_v36  ;;  %v5366_v4 = vadd.f32 %v5231_v19, %v4791_v39  ;;  %v5379_v39 = vadd.f32 %v5235_v0, %v4819_v5 }
 0x56a   :  { %v2386_v8 = vadd.f32 %v3748_v32, %v2385_v21  ;;  %v5330_v21 = vadd.f32 %v2437_v13, %v4846_v46  ;;  %v2438_v46 = vmul.f32 %v2430_v20, %v2219_v29  ;;  %v2453_v33 = vsel %vm37_vm0, %v5366_v4, 0.0 }
 0x56b   :  { %v3750_v28 = vpop.eup %3749 }
 0x56c   :  { %v5287_v26 = vpop.eup %3751  ;;  %v2390_v52 = vsel %vm2389_vm6, %v3748_v32, %v2386_v8  ;;  %v2398_v45 = vmul.f32 %v3750_v28, %v5272_v44  ;;  %vm2403_vm10 = vweird.f32 %v3750_v28  ;;  %v5352_v58 = vadd.f32 %v2438_v46, %v4834_v6 }
 0x56d   :  { %v2395_v34 = vsel %vm2392_vm7, %v2394_v17, %v2390_v52  ;;  %v2368_v30 = vmul.f32 %v5287_v26, %v5270_v63  ;;  %v3754_v12 = vpop.eup %3753  ;;  %vm2404_vm13 = vmor %vm2402_vm9, %vm2403_vm10  ;;  %vm2373_vm1 = vweird.f32 %v5287_v26 }
 0x56e   :  { %v2432_v49 = vmul.f32 %v2395_v34, %v5251_v10  ;;  %v2399_v9 = vsub.f32 1.0, %v2398_v45  ;;  %v2306_v32 = vadd.f32 1.0, %v3754_v12  ;;  %vm2374_vm4 = vmor %vm2372_vm2, %vm2373_vm1 }
 0x56f   :  { %v2369_v50 = vsub.f32 1.0, %v2368_v30 }
 0x570   :  { %v2440_v31 = vmul.f32 %v2432_v49, %v2225_v11  ;;  %v2400_v3 = vmul.f32 %v3750_v28, %v2399_v9  ;;  %3755 = vrcp.f32 %v2306_v32  ;;  %v2423_v27 = vand.u32 2147483648, %v2306_v32  ;;  %v2230_v49 = vpop.f32.mrf.mxu1 }
 0x571   :  { %v2370_v51 = vmul.f32 %v5287_v26, %v2369_v50  ;;  %v2421_v45 = vand.u32 2147483647, %v2306_v32  ;;  %vm2417_vm6 = vweird.f32 %v2306_v32  ;;  %v2379_v11 = vor.u32 1.1754944e-38, %v2378_v23 }
 0x572   :  { %v2401_v40 = vadd.f32 %v3750_v28, %v2400_v3  ;;  %v5321_v38 = vadd.f32 %v2440_v31, %v4874_v25  ;;  %v2228_v25 = vadd.f32 %v5228_v2, %v2227_v24  ;;  %v2424_v9 = vor.u32 1.1754944e-38, %v2423_v27 }
 0x573   :  { %vm2422_vm14 = vcmp.eq.f32.partialorder %v2421_v45, 8.507059e+37  ;;  %v2231_v30 = vadd.f32 %v5228_v2, %v2230_v49  ;;  %v2222_v31 = vadd.f32 %v5228_v2, %v5266_v59  ;;  %v2456_v2 = vsel %vm37_vm0, %v5379_v39, 0.0 }
 0x574   :  { %v2405_v62 = vsel %vm2404_vm13, %v3750_v28, %v2401_v40  ;;  %v2468_v57 = vsel %vm37_vm0, %v5321_v38, 0.0  ;;  %v2371_v28 = vadd.f32 %v5287_v26, %v2370_v51 }
 0x575   :  { %v2410_v56 = vsel %vm2407_vm15, %v2409_v37, %v2405_v62  ;;  %2469 = vadd.xlane.f32.xlu1 %v2468_v57 }
 0x576   :  { %v2433_v44 = vmul.f32 %v2410_v56, %v5260_v48  ;;  %v3756_v1 = vpop.eup %3755  ;;  %v2459_v48 = vsel %vm37_vm0, %v5330_v21, 0.0  ;;  %v2375_v61 = vsel %vm2374_vm4, %v5287_v26, %v2371_v28  ;;  %v2462_v26 = vsel %vm37_vm0, %v5352_v58, 0.0 }
 0x577   :  { %v2413_v18 = vmul.f32 %v3756_v1, %v2306_v32  ;;  %vm2418_vm3 = vweird.f32 %v3756_v1 }
 0x578   :  { %v2441_v43 = vmul.f32 %v2433_v44, %v2228_v25  ;;  %vm2419_vm7 = vmor %vm2417_vm6, %vm2418_vm3 }
 0x579   :  { %v2414_v36 = vsub.f32 1.0, %v2413_v18 }
 0x57a   :  { %v5337_v8 = vadd.f32 %v2441_v43, %v4865_v42  ;;  %v2376_v42 = vand.u32 2147483647, %v5270_v63 }
 0x57b   :  { %v2415_v52 = vmul.f32 %v3756_v1, %v2414_v36 }
 0x57c   :  { %v2471_v17 = vsel %vm37_vm0, %v5337_v8, 0.0  ;;  %vm2377_vm8 = vcmp.eq.f32.partialorder %v2376_v42, 8.507059e+37 }
 0x57d   :  { %2460 = vadd.xlane.f32.xlu1 %v2459_v48  ;;  %2472 = vadd.xlane.f32.xlu0 %v2471_v17  ;;  %v2416_v34 = vadd.f32 %v3756_v1, %v2415_v52  ;;  %v2380_v63 = vsel %vm2377_vm8, %v2379_v11, %v2375_v61 }
 0x57e   :  { %v2431_v6 = vmul.f32 %v2380_v63, %v5248_v53 }
 0x57f   :  { %v2420_v15 = vsel %vm2419_vm7, %v3756_v1, %v2416_v34 }
 0x580   :  { %v2425_v22 = vsel %vm2422_vm14, %v2424_v9, %v2420_v15  ;;  %v2439_v35 = vmul.f32 %v2431_v6, %v2222_v31 }
 0x581   :  { %v2434_v47 = vmul.f32 %v2425_v22, %v5277_v41 }
 0x582   :  { %v5373_v53 = vadd.f32 %v2439_v35, %v4829_v7 }
 0x583   :  { %v2442_v12 = vmul.f32 %v2434_v47, %v2231_v30 }
 0x585   :  { %2463 = vadd.xlane.f32.xlu0 %v2462_v26  ;;  %v5362_v3 = vadd.f32 %v2442_v12, %v4884_v14  ;;  %v2465_v14 = vsel %vm37_vm0, %v5373_v53, 0.0 }
 0x587   :  { %v2474_v41 = vsel %vm37_vm0, %v5362_v3, 0.0 }
 0x588   :  { %2475 = vadd.xlane.f32.xlu2 %v2474_v41 }
 0x58d   :  { %2454 = vadd.xlane.f32.xlu0 %v2453_v33 }
 0x590   :  { %2466 = vadd.xlane.f32.xlu2 %v2465_v14 }
 0x598   :  { %2457 = vadd.xlane.f32.xlu2 %v2456_v2 }
 0x5e8   :  { %v2470_v19 = vpop.xlane.xlu1 %2469 }
 0x5e9   :  { %v2482_v59 = vmul.f32 %v2470_v19, %v3921_v16 }
 0x5eb   :  { %v5385_v10 = vsub.f32 %v5321_v38, %v2482_v59 }
 0x5ed   :  { %v2498_v7 = vmul.f32 %v5385_v10, %v5385_v10 }
 0x5ef   :  { %v2516_v32 = vsel %vm37_vm0, %v2498_v7, 0.0 }
 0x5f0   :  { %v2461_v60 = vpop.xlane.xlu1 %2460  ;;  %2517 = vadd.xlane.f32.xlu0 %v2516_v32  ;;  %v2473_v40 = vpop.xlane.xlu0 %2472 }
 0x5f1   :  { %v2479_v5 = vmul.f32 %v2461_v60, %v3921_v16  ;;  %v2483_v0 = vmul.f32 %v2473_v40, %v3921_v16 }
 0x5f3   :  { %v5393_v13 = vsub.f32 %v5330_v21, %v2479_v5  ;;  %v5396_v54 = vsub.f32 %v5337_v8, %v2483_v0 }
 0x5f5   :  { %v2495_v24 = vmul.f32 %v5393_v13, %v5393_v13  ;;  %v2499_v37 = vmul.f32 %v5396_v54, %v5396_v54 }
 0x5f7   :  { %v2507_v50 = vsel %vm37_vm0, %v2495_v24, 0.0  ;;  %v2519_v62 = vsel %vm37_vm0, %v2499_v37, 0.0 }
 0x5f8   :  { %2508 = vadd.xlane.f32.xlu0 %v2507_v50  ;;  %2520 = vadd.xlane.f32.xlu2 %v2519_v62  ;;  %v2464_v57 = vpop.xlane.xlu0 %2463 }
 0x5f9   :  { %v2480_v55 = vmul.f32 %v2464_v57, %v3921_v16 }
 0x5fb   :  { %v5406_v56 = vsub.f32 %v5352_v58, %v2480_v55  ;;  %v2476_v44 = vpop.xlane.xlu2 %2475 }
 0x5fc   :  { %v2484_v20 = vmul.f32 %v2476_v44, %v3921_v16 }
 0x5fd   :  { %v2496_v25 = vmul.f32 %v5406_v56, %v5406_v56 }
 0x5fe   :  { %v5413_v1 = vsub.f32 %v5362_v3, %v2484_v20 }
 0x5ff   :  { %v2510_v51 = vsel %vm37_vm0, %v2496_v25, 0.0 }
 0x600   :  { %2511 = vadd.xlane.f32.xlu2 %v2510_v51  ;;  %v2455_v43 = vpop.xlane.xlu0 %2454  ;;  %v2500_v18 = vmul.f32 %v5413_v1, %v5413_v1 }
 0x601   :  { %v2477_v29 = vmul.f32 %v2455_v43, %v3921_v16 }
 0x602   :  { %v2522_v46 = vsel %vm37_vm0, %v2500_v18, 0.0 }
 0x603   :  { %v5419_v48 = vsub.f32 %v5366_v4, %v2477_v29  ;;  %2523 = vadd.xlane.f32.xlu1 %v2522_v46  ;;  %v2467_v36 = vpop.xlane.xlu2 %2466 }
 0x604   :  { %v2481_v17 = vmul.f32 %v2467_v36, %v3921_v16 }
 0x605   :  { %v2493_v28 = vmul.f32 %v5419_v48, %v5419_v48 }
 0x606   :  { %v5427_v27 = vsub.f32 %v5373_v53, %v2481_v17 }
 0x607   :  { %v2501_v23 = vsel %vm37_vm0, %v2493_v28, 0.0 }
 0x608   :  { %2502 = vadd.xlane.f32.xlu2 %v2501_v23  ;;  %v2497_v42 = vmul.f32 %v5427_v27, %v5427_v27 }
 0x60a   :  { %v2513_v52 = vsel %vm37_vm0, %v2497_v42, 0.0 }
 0x60b   :  { %2514 = vadd.xlane.f32.xlu1 %v2513_v52  ;;  %v2458_v45 = vpop.xlane.xlu2 %2457 }
 0x60c   :  { %v2478_v61 = vmul.f32 %v2458_v45, %v3921_v16 }
 0x60e   :  { %v5434_v34 = vsub.f32 %v5379_v39, %v2478_v61 }
 0x610   :  { %v2494_v11 = vmul.f32 %v5434_v34, %v5434_v34 }
 0x612   :  { %v2504_v49 = vsel %vm37_vm0, %v2494_v11, 0.0 }
 0x613   :  { %2505 = vadd.xlane.f32.xlu1 %v2504_v49 }
 0x663   :  { %v2518_v9 = vpop.xlane.xlu0 %2517 }
 0x664   :  { %v2530_v15 = vmul.f32 %v2518_v9, %v3921_v16 }
 0x666   :  { %v2538_v63 = vadd.f32 1e-05, %v2530_v15 }
 0x668   :  { %3757 = vrsqrt.f32 %v2538_v63  ;;  %vm2597_vm13 = vweird.f32 %v2538_v63 }
 0x66b   :  { %v2521_v22 = vpop.xlane.xlu2 %2520  ;;  %v2509_v47 = vpop.xlane.xlu0 %2508 }
 0x66c   :  { %v2531_v30 = vmul.f32 %v2521_v22, %v3921_v16  ;;  %v2527_v6 = vmul.f32 %v2509_v47, %v3921_v16 }
 0x66e   :  { %v2539_v26 = vadd.f32 1e-05, %v2531_v30  ;;  %v5442_v12 = vadd.f32 1e-05, %v2527_v6  ;;  %v5445_v41 = vpop.eup %3757 }
 0x66f   :  { %v2592_v19 = vmul.f32 %v5445_v41, %v2538_v63  ;;  %vm2598_vm11 = vweird.f32 %v5445_v41 }
 0x670   :  { %3759 = vrsqrt.f32 %v2539_v26  ;;  %vm2607_vm12 = vweird.f32 %v2539_v26  ;;  %vm5492_vm15 = vmor %vm2597_vm13, %vm2598_vm11  ;;  %vm2567_vm8 = vweird.f32 %v5442_v12 }
 0x671   :  { %3761 = vrsqrt.f32 %v5442_v12  ;;  %v2593_v40 = vmul.f32 %v5445_v41, %v2592_v19 }
 0x673   :  { %v2512_v31 = vpop.xlane.xlu2 %2511  ;;  %v2594_v55 = vmul.f32 0.5, %v2593_v40 }
 0x674   :  { %v2528_v35 = vmul.f32 %v2512_v31, %v3921_v16 }
 0x675   :  { %v2595_v18 = vsub.f32 1.5, %v2594_v55 }
 0x676   :  { %v5447_v33 = vpop.eup %3759  ;;  %v5449_v14 = vadd.f32 1e-05, %v2528_v35  ;;  %v2524_v59 = vpop.xlane.xlu1 %2523 }
 0x677   :  { %v2602_v2 = vmul.f32 %v5447_v33, %v2539_v26  ;;  %v2532_v32 = vmul.f32 %v2524_v59, %v3921_v16  ;;  %v5459_v24 = vpop.eup %3761  ;;  %vm2608_vm10 = vweird.f32 %v5447_v33  ;;  %v2596_v61 = vmul.f32 %v5445_v41, %v2595_v18 }
 0x678   :  { %3763 = vrsqrt.f32 %v5449_v14  ;;  %v2562_v25 = vmul.f32 %v5459_v24, %v5442_v12  ;;  %vm5484_vm9 = vmor %vm2607_vm12, %vm2608_vm10  ;;  %vm2568_vm6 = vweird.f32 %v5459_v24  ;;  %vm2577_vm7 = vweird.f32 %v5449_v14 }
 0x679   :  { %v2603_v7 = vmul.f32 %v5447_v33, %v2602_v2  ;;  %v2540_v5 = vadd.f32 1e-05, %v2532_v32  ;;  %v2600_v63 = vsel %vm5492_vm15, %v5445_v41, %v2596_v61  ;;  %v3606_v41 = vld [vmem:[%s5977_s4 + $0x5] ss:$0 sm:$0xff]  ;;  %vm5525_vm11 = vmor %vm2567_vm8, %vm2568_vm6 }
 0x67a   :  { %v2563_v28 = vmul.f32 %v5459_v24, %v2562_v25 }
 0x67b   :  { %v2503_v60 = vpop.xlane.xlu2 %2502  ;;  %v2604_v50 = vmul.f32 0.5, %v2603_v7  ;;  %3765 = vrsqrt.f32 %v2540_v5  ;;  %vm2617_vm2 = vweird.f32 %v2540_v5 }
 0x67c   :  { %v2525_v0 = vmul.f32 %v2503_v60, %v3921_v16  ;;  %v2564_v49 = vmul.f32 0.5, %v2563_v28 }
 0x67d   :  { %v2605_v20 = vsub.f32 1.5, %v2604_v50 }
 0x67e   :  { %v5461_v37 = vpop.eup %3763  ;;  %v5463_v62 = vadd.f32 1e-05, %v2525_v0  ;;  %v2515_v44 = vpop.xlane.xlu1 %2514  ;;  %v2565_v19 = vsub.f32 1.5, %v2564_v49 }
 0x67f   :  { %v2572_v57 = vmul.f32 %v5461_v37, %v5449_v14  ;;  %v2529_v51 = vmul.f32 %v2515_v44, %v3921_v16  ;;  %v2606_v23 = vmul.f32 %v5447_v33, %v2605_v20  ;;  %vm2578_vm4 = vweird.f32 %v5461_v37 }
 0x680   :  { %3767 = vrsqrt.f32 %v5463_v62  ;;  %v2566_v50 = vmul.f32 %v5459_v24, %v2565_v19  ;;  %vm5515_vm14 = vmor %vm2577_vm7, %vm2578_vm4  ;;  %vm2547_vm15 = vweird.f32 %v5463_v62  ;;  %v1516_v19 = vld [vmem:[%s5975_s2 + $0x38] sm:$0xff] }
 0x681   :  { %v2573_v43 = vmul.f32 %v5461_v37, %v2572_v57  ;;  %v3766_v29 = vpop.eup %3765  ;;  %v5472_v46 = vadd.f32 1e-05, %v2529_v51  ;;  %v2610_v22 = vsel %vm5484_vm9, %v5447_v33, %v2606_v23  ;;  %2760 = vmatpush.msra.mxu0 %v1516_v19  ;;  %v1538_v19 = vld [vmem:[%s5976_s3 + $0xa8] sm:$0xff] }
 0x682   :  { %v2612_v36 = vmul.f32 %v3766_v29, %v2540_v5  ;;  %vm2618_vm1 = vweird.f32 %v3766_v29  ;;  %v2627_v33 = vmul.f32 %v2610_v22, %v5396_v54  ;;  %v2626_v5 = vmul.f32 %v2600_v63, %v5385_v10  ;;  %v3607_v10 = vld [vmem:[%s5977_s4 + $0x6] ss:$0 sm:$0xff] }
 0x683   :  { %3769 = vrsqrt.f32 %v5472_v46  ;;  %v2574_v52 = vmul.f32 0.5, %v2573_v43  ;;  %vm2619_vm3 = vmor %vm2617_vm2, %vm2618_vm1  ;;  %vm2587_vm12 = vweird.f32 %v5472_v46  ;;  %v2647_v63 = vld [vmem:[%s5974_s1] sm:$0xff] }
 0x684   :  { %v2613_v42 = vmul.f32 %v3766_v29, %v2612_v36  ;;  %v2636_v55 = vmul.f32 %v3606_v41, %v2627_v33  ;;  %v2635_v43 = vmul.f32 %v3606_v41, %v2626_v5  ;;  %v1513_v33 = vld [vmem:[%s5975_s2 + $0x20] sm:$0xff] }
 0x685   :  { %v2575_v26 = vsub.f32 1.5, %v2574_v52 }
 0x686   :  { %v5475_v17 = vpop.eup %3767  ;;  %v2614_v9 = vmul.f32 0.5, %v2613_v42  ;;  %v2506_v15 = vpop.xlane.xlu1 %2505 }
 0x687   :  { %v2542_v45 = vmul.f32 %v5475_v17, %v5463_v62  ;;  %v2526_v30 = vmul.f32 %v2506_v15, %v3921_v16  ;;  %v2576_v32 = vmul.f32 %v5461_v37, %v2575_v26  ;;  %vm2548_vm13 = vweird.f32 %v5475_v17 }
 0x688   :  { %v2615_v6 = vsub.f32 1.5, %v2614_v9  ;;  %vm2549_vm1 = vmor %vm2547_vm15, %vm2548_vm13 }
 0x689   :  { %v2543_v31 = vmul.f32 %v5475_v17, %v2542_v45  ;;  %v3770_v35 = vpop.eup %3769  ;;  %v2534_v2 = vadd.f32 1e-05, %v2526_v30  ;;  %v2580_v25 = vsel %vm5515_vm14, %v5461_v37, %v2576_v32  ;;  %v2645_v37 = vadd.f32 %v3607_v10, %v2636_v55  ;;  %v2652_v32 = vld [vmem:[%s5974_s1 + $0x28] sm:$0xff] }
 0x68a   :  { %v2616_v59 = vmul.f32 %v3766_v29, %v2615_v6  ;;  %v2582_v16 = vmul.f32 %v3770_v35, %v5472_v46  ;;  %vm2588_vm10 = vweird.f32 %v3770_v35  ;;  %v2624_v36 = vmul.f32 %v2580_v25, %v5406_v56  ;;  %v5597_v55 = vld [vmem:[%s5977_s4 + $0x9] ss:$0 sm:$0xff] }
 0x68b   :  { %3771 = vrsqrt.f32 %v2534_v2  ;;  %v2544_v40 = vmul.f32 0.5, %v2543_v31  ;;  %vm2589_vm9 = vmor %vm2587_vm12, %vm2588_vm10  ;;  %v2644_v45 = vadd.f32 %v3607_v10, %v2635_v43 }
 0x68c   :  { %v2620_v7 = vsel %vm2619_vm3, %v3766_v29, %v2616_v59  ;;  %v2583_v60 = vmul.f32 %v3770_v35, %v2582_v16  ;;  %v2570_v29 = vsel %vm5525_vm11, %v5459_v24, %v2566_v50  ;;  %v2633_v49 = vmul.f32 %v3606_v41, %v2624_v36  ;;  %v1515_v59 = vld [vmem:[%s5975_s2 + $0x30] sm:$0xff]  ;;  %v1514_v16 = vld [vmem:[%s5975_s2 + $0x28] sm:$0xff] }
 0x68d   :  { %v2628_v0 = vmul.f32 %v2620_v7, %v5413_v1  ;;  %v2545_v44 = vsub.f32 1.5, %v2544_v40  ;;  %v2623_v24 = vmul.f32 %v2570_v29, %v5393_v13  ;;  %vm2557_vm3 = vweird.f32 %v2534_v2  ;;  %2761 = vmatpush.msra.mxu0 %v1515_v59  ;;  %v2651_v7 = vld [vmem:[%s5974_s1 + $0x20] sm:$0xff]  ;;  %v2654_v40 = vld [vmem:[%s5974_s1 + $0x38] sm:$0xff] }
 0x68e   :  { %v2584_v54 = vmul.f32 0.5, %v2583_v60  ;;  %v2653_v60 = vld [vmem:[%s5974_s1 + $0x30] sm:$0xff] }
 0x68f   :  { %v2637_v1 = vmul.f32 %v3606_v41, %v2628_v0  ;;  %v2546_v42 = vmul.f32 %v5475_v17, %v2545_v44  ;;  %v2632_v22 = vmul.f32 %v3606_v41, %v2623_v24  ;;  %2762 = vmatpush.msra.mxu0 %v1514_v16  ;;  %v1548_v24 = vld [vmem:[%s5976_s3 + $0xf8] sm:$0xff] }
 0x690   :  { %v2585_v14 = vsub.f32 1.5, %v2584_v54  ;;  %3216 = vmatpush.msra.mxu2 %v1548_v24  ;;  %v1542_v24 = vld [vmem:[%s5976_s3 + $0xc8] sm:$0xff] }
 0x691   :  { %v3772_v12 = vpop.eup %3771  ;;  %v2646_v51 = vadd.f32 %v3607_v10, %v2637_v1  ;;  %v2550_v56 = vsel %vm2549_vm1, %v5475_v17, %v2546_v42  ;;  %v2641_v62 = vadd.f32 %v3607_v10, %v2632_v22  ;;  %2763 = vmatpush.msra.mxu0 %v1513_v33 }
 0x692   :  { %v2586_v18 = vmul.f32 %v3770_v35, %v2585_v14  ;;  %v2552_v28 = vmul.f32 %v3772_v12, %v2534_v2  ;;  %vm2558_vm2 = vweird.f32 %v3772_v12  ;;  %v2621_v13 = vmul.f32 %v2550_v56, %v5419_v48  ;;  %v2648_v48 = vld [vmem:[%s5974_s1 + $0x8] sm:$0xff]  ;;  %v2650_v2 = vld [vmem:[%s5974_s1 + $0x18] sm:$0xff] }
 0x693   :  { %2687 = vmatpush.msrb.mxu3 %v2646_v51  ;;  %vm2559_vm4 = vmor %vm2557_vm3, %vm2558_vm2 }
 0x694   :  { %v2590_v23 = vsel %vm2589_vm9, %v3770_v35, %v2586_v18  ;;  %v2553_v52 = vmul.f32 %v3772_v12, %v2552_v28  ;;  %v2630_v31 = vmul.f32 %v3606_v41, %v2621_v13 }
 0x695   :  { %2688 = vmatpush.msrb.mxu3 %v2645_v37  ;;  %v2625_v61 = vmul.f32 %v2590_v23, %v5427_v27  ;;  %v2642_v27 = vadd.f32 %v3607_v10, %v2633_v49  ;;  %v1540_v49 = vld [vmem:[%s5976_s3 + $0xb8] sm:$0xff] }
 0x696   :  { %v2554_v46 = vmul.f32 0.5, %v2553_v52  ;;  %v2639_v35 = vadd.f32 %v3607_v10, %v2630_v31  ;;  %3174 = vmatpush.msra.mxu1 %v1540_v49  ;;  %v1546_v31 = vld [vmem:[%s5976_s3 + $0xe8] sm:$0xff] }
 0x697   :  { %2689 = vmatpush.msrb.mxu3 %v2644_v45  ;;  %v2634_v11 = vmul.f32 %v3606_v41, %v2625_v61 }
 0x698   :  { %v2555_v9 = vsub.f32 1.5, %v2554_v46 }
 0x699   :  { %v2643_v15 = vadd.f32 %v3607_v10, %v2634_v11 }
 0x69a   :  { %v2556_v30 = vmul.f32 %v3772_v12, %v2555_v9 }
 0x69b   :  { %2690 = vmatpush.msrb.mxu3 %v2643_v15 }
 0x69c   :  { %v2560_v47 = vsel %vm2559_vm4, %v3772_v12, %v2556_v30 }
 0x69d   :  { %2691 = vmatpush.msrb.mxu3 %v2642_v27  ;;  %v2622_v6 = vmul.f32 %v2560_v47, %v5434_v34  ;;  %v2649_v34 = vld [vmem:[%s5974_s1 + $0x10] sm:$0xff] }
 0x69e   :  { %v1547_v27 = vld [vmem:[%s5976_s3 + $0xf0] sm:$0xff] }
 0x69f   :  { %2692 = vmatpush.msrb.mxu3 %v2641_v62  ;;  %v2631_v26 = vmul.f32 %v3606_v41, %v2622_v6  ;;  %3217 = vmatpush.msra.mxu2 %v1547_v27  ;;  %v1533_v27 = vld [vmem:[%s5976_s3 + $0x80] sm:$0xff] }
 0x6a1   :  { %v2640_v17 = vadd.f32 %v3607_v10, %v2631_v26  ;;  %3218 = vmatpush.msra.mxu2 %v1546_v31 }
 0x6a3   :  { %2693 = vmatpush.msrb.mxu3 %v2640_v17  ;;  %v1539_v17 = vld [vmem:[%s5976_s3 + $0xb0] sm:$0xff] }
 0x6a4   :  { %3175 = vmatpush.msra.mxu1 %v1539_v17 }
 0x6a5   :  { %2694 = vmatpush.msrb.mxu3 %v2639_v35 }
 0x6a6   :  { %3547 = vmatmul.msk.f32.vlgmr.msrb.gmra.mxu3 %vm2167_vm5, %v2647_v63  ;;  %3176 = vmatpush.msra.mxu1 %v1538_v19 }
 0x6ae   :  { %3548 = vmatmul.msk.f32.gmra.mxu3 %vm2167_vm5, %v2648_v48 }
 0x6b6   :  { %3549 = vmatmul.msk.f32.gmra.mxu3 %vm2167_vm5, %v2649_v34 }
 0x6be   :  { %3550 = vmatmul.msk.f32.gmra.mxu3 %vm2167_vm5, %v2650_v2  ;;  %v1545_v2 = vld [vmem:[%s5976_s3 + $0xe0] sm:$0xff] }
 0x6bf   :  { %3219 = vmatpush.msra.mxu2 %v1545_v2 }
 0x6c6   :  { %3551 = vmatmul.msk.f32.gmra.mxu3 %vm2167_vm5, %v2651_v7 }
 0x6ce   :  { %3552 = vmatmul.msk.f32.gmra.mxu3 %vm2167_vm5, %v2652_v32 }
 0x6d6   :  { %3553 = vmatmul.msk.f32.gmra.mxu3 %vm2167_vm5, %v2653_v60  ;;  %v1544_v60 = vld [vmem:[%s5976_s3 + $0xd8] sm:$0xff] }
 0x6d7   :  { %3220 = vmatpush.msra.mxu2 %v1544_v60 }
 0x6de   :  { %3554 = vmatmul.msk.f32.gmra.mxu3 %vm2167_vm5, %v2654_v40 }
 0x729   :  { %v2696_v0 = vpop.f32.mrf.mxu3 }
 0x72a   :  { %3555 = vmatmul.msk.f32.vlgmr.msra.gmra.mxu0 %vm37_vm0, %v2696_v0 }
 0x731   :  { %v2699_v41 = vpop.f32.mrf.mxu3 }
 0x732   :  { %3556 = vmatmul.msk.f32.gmra.mxu0 %vm37_vm0, %v2699_v41  ;;  %v1537_v41 = vld [vmem:[%s5976_s3 + $0xa0] sm:$0xff] }
 0x733   :  { %3177 = vmatpush.msra.mxu1 %v1537_v41 }
 0x739   :  { %v2702_v5 = vpop.f32.mrf.mxu3 }
 0x73a   :  { %3557 = vmatmul.msk.f32.gmra.mxu0 %vm37_vm0, %v2702_v5 }
 0x741   :  { %v2705_v50 = vpop.f32.mrf.mxu3 }
 0x742   :  { %3558 = vmatmul.msk.f32.gmra.mxu0 %vm37_vm0, %v2705_v50 }
 0x749   :  { %v2708_v54 = vpop.f32.mrf.mxu3 }
 0x74a   :  { %3559 = vmatmul.msk.f32.gmra.mxu0 %vm37_vm0, %v2708_v54 }
 0x751   :  { %v2711_v57 = vpop.f32.mrf.mxu3 }
 0x752   :  { %3560 = vmatmul.msk.f32.gmra.mxu0 %vm37_vm0, %v2711_v57  ;;  %v1536_v57 = vld [vmem:[%s5976_s3 + $0x98] sm:$0xff] }
 0x753   :  { %3178 = vmatpush.msra.mxu1 %v1536_v57 }
 0x759   :  { %v2714_v1 = vpop.f32.mrf.mxu3 }
 0x75a   :  { %3561 = vmatmul.msk.f32.gmra.mxu0 %vm37_vm0, %v2714_v1 }
 0x761   :  { %v2717_v10 = vpop.f32.mrf.mxu3 }
 0x762   :  { %3562 = vmatmul.msk.f32.gmra.mxu0 %vm37_vm0, %v2717_v10 }
 0x7a7   :  { %v2765_v25 = vpop.f32.mrf.mxu0 }
 0x7a8   :  { %v5600_v14 = vadd.f32 %v5597_v55, %v2765_v25 }
 0x7aa   :  { %v5603_v44 = vmul.f32 0.70710677, %v5600_v14 }
 0x7ac   :  { %v2805_v12 = vmul.f32 %v5603_v44, %v5603_v44 }
 0x7ae   :  { %v5607_v20 = vmin.f32 %v2805_v12, 16.0 }
 0x7af   :  { %v2768_v51 = vpop.f32.mrf.mxu0 }
 0x7b0   :  { %v2807_v43 = vmul.f32 2.1237322e-06, %v5607_v20  ;;  %v2818_v29 = vmul.f32 3.8918573e-05, %v5607_v20  ;;  %v5612_v18 = vadd.f32 %v5597_v55, %v2768_v51 }
 0x7b2   :  { %v2808_v28 = vadd.f32 0.00028619796, %v2807_v43  ;;  %v2819_v37 = vadd.f32 0.001143296, %v2818_v29  ;;  %v5615_v36 = vmul.f32 0.70710677, %v5612_v18 }
 0x7b3   :  { %v1543_v29 = vld [vmem:[%s5976_s3 + $0xd0] sm:$0xff] }
 0x7b4   :  { %v2809_v23 = vmul.f32 %v2808_v28, %v5607_v20  ;;  %v2820_v42 = vmul.f32 %v2819_v37, %v5607_v20  ;;  %v2845_v52 = vmul.f32 %v5615_v36, %v5615_v36  ;;  %v1535_v28 = vld [vmem:[%s5976_s3 + $0x90] sm:$0xff]  ;;  %3221 = vmatpush.msra.mxu2 %v1543_v29 }
 0x7b5   :  { %3179 = vmatpush.msra.mxu1 %v1535_v28 }
 0x7b6   :  { %v2810_v45 = vadd.f32 0.0036580483, %v2809_v23  ;;  %v2821_v61 = vadd.f32 0.014752088, %v2820_v42  ;;  %v5624_v46 = vmin.f32 %v2845_v52, 16.0  ;;  %3222 = vmatpush.msra.mxu2 %v1542_v24 }
 0x7b7   :  { %v2771_v11 = vpop.f32.mrf.mxu0 }
 0x7b8   :  { %v2822_v56 = vmul.f32 %v2821_v61, %v5607_v20  ;;  %v5631_v9 = vadd.f32 %v5597_v55, %v2771_v11  ;;  %v2811_v15 = vmul.f32 %v2810_v45, %v5607_v20  ;;  %v2847_v22 = vmul.f32 2.1237322e-06, %v5624_v46  ;;  %v1534_v61 = vld [vmem:[%s5976_s3 + $0x88] sm:$0xff] }
 0x7b9   :  { %v2858_v30 = vmul.f32 3.8918573e-05, %v5624_v46  ;;  %3180 = vmatpush.msra.mxu1 %v1534_v61 }
 0x7ba   :  { %v2823_v13 = vadd.f32 0.112945676, %v2822_v56  ;;  %v2848_v47 = vadd.f32 0.00028619796, %v2847_v22  ;;  %v5640_v6 = vmul.f32 0.70710677, %v5631_v9 }
 0x7bb   :  { %v2859_v62 = vadd.f32 0.001143296, %v2858_v30  ;;  %v2812_v35 = vadd.f32 0.05243302, %v2811_v15  ;;  %3181 = vmatpush.msra.mxu1 %v1533_v27 }
 0x7bc   :  { %v2824_v26 = vmul.f32 %v2823_v13, %v5607_v20  ;;  %v2849_v63 = vmul.f32 %v2848_v47, %v5624_v46  ;;  %v2885_v34 = vmul.f32 %v5640_v6, %v5640_v6  ;;  %v1541_v13 = vld [vmem:[%s5976_s3 + $0xc0] sm:$0xff] }
 0x7bd   :  { %v2860_v48 = vmul.f32 %v2859_v62, %v5624_v46  ;;  %v2813_v5 = vmul.f32 %v2812_v35, %v5607_v20  ;;  %3223 = vmatpush.msra.mxu2 %v1541_v13 }
 0x7be   :  { %v2825_v59 = vadd.f32 0.4994258, %v2824_v26  ;;  %v2850_v16 = vadd.f32 0.0036580483, %v2849_v63  ;;  %v5659_v7 = vmin.f32 %v2885_v34, 16.0 }
 0x7bf   :  { %v2861_v33 = vadd.f32 0.014752088, %v2860_v48  ;;  %v2774_v32 = vpop.f32.mrf.mxu0  ;;  %v2814_v37 = vadd.f32 0.18741608, %v2813_v5 }
 0x7c0   :  { %v2826_v40 = vmul.f32 %v2825_v59, %v5607_v20  ;;  %v5666_v0 = vadd.f32 %v5597_v55, %v2774_v32  ;;  %v2887_v54 = vmul.f32 2.1237322e-06, %v5659_v7  ;;  %v2898_v10 = vmul.f32 3.8918573e-05, %v5659_v7 }
 0x7c1   :  { %v2862_v50 = vmul.f32 %v2861_v33, %v5624_v46  ;;  %v2851_v12 = vmul.f32 %v2850_v16, %v5624_v46  ;;  %v2815_v47 = vmul.f32 %v2814_v37, %v5607_v20 }
 0x7c2   :  { %v5677_v1 = vadd.f32 1.0, %v2826_v40  ;;  %v5681_v25 = vmul.f32 0.70710677, %v5666_v0  ;;  %v2888_v43 = vadd.f32 0.00028619796, %v2887_v54 }
 0x7c3   :  { %v2863_v51 = vadd.f32 0.112945676, %v2862_v50  ;;  %v2899_v52 = vadd.f32 0.001143296, %v2898_v10  ;;  %v2852_v11 = vadd.f32 0.05243302, %v2851_v12 }
 0x7c4   :  { %3773 = vrcp.f32 %v5677_v1  ;;  %v2889_v42 = vmul.f32 %v2888_v43, %v5659_v7  ;;  %v2925_v45 = vmul.f32 %v5681_v25, %v5681_v25  ;;  %v2816_v33 = vadd.f32 1.1283791, %v2815_v47 }
 0x7c5   :  { %v2864_v23 = vmul.f32 %v2863_v51, %v5624_v46  ;;  %v2900_v15 = vmul.f32 %v2899_v52, %v5659_v7  ;;  %v2853_v34 = vmul.f32 %v2852_v11, %v5624_v46  ;;  %v2837_v40 = vand.u32 2147483647, %v5677_v1 }
 0x7c6   :  { %v2890_v56 = vadd.f32 0.0036580483, %v2889_v42  ;;  %v5702_v22 = vmin.f32 %v2925_v45, 16.0  ;;  %v2839_v41 = vand.u32 2147483648, %v5677_v1  ;;  %vm2833_vm7 = vweird.f32 %v5677_v1 }
 0x7c7   :  { %v2865_v49 = vadd.f32 0.4994258, %v2864_v23  ;;  %v2777_v30 = vpop.f32.mrf.mxu0  ;;  %v2901_v17 = vadd.f32 0.014752088, %v2900_v15  ;;  %v2854_v10 = vadd.f32 0.18741608, %v2853_v34  ;;  %v2817_v23 = vmul.f32 %v2816_v33, %v5603_v44 }
 0x7c8   :  { %v2891_v31 = vmul.f32 %v2890_v56, %v5659_v7  ;;  %v2927_v35 = vmul.f32 2.1237322e-06, %v5702_v22  ;;  %v2938_v63 = vmul.f32 3.8918573e-05, %v5702_v22  ;;  %v5722_v60 = vadd.f32 %v5597_v55, %v2777_v30 }
 0x7c9   :  { %v2866_v62 = vmul.f32 %v2865_v49, %v5624_v46  ;;  %v2902_v20 = vmul.f32 %v2901_v17, %v5659_v7  ;;  %vm2838_vm14 = vcmp.eq.f32.partialorder %v2837_v40, 8.507059e+37  ;;  %v2840_v42 = vor.u32 1.1754944e-38, %v2839_v41 }
 0x7ca   :  { %v3774_v26 = vpop.eup %3773  ;;  %v2892_v19 = vadd.f32 0.05243302, %v2891_v31  ;;  %v2928_v59 = vadd.f32 0.00028619796, %v2927_v35  ;;  %v2939_v16 = vadd.f32 0.001143296, %v2938_v63  ;;  %v2855_v15 = vmul.f32 %v2854_v10, %v5624_v46 }
 0x7cb   :  { %v2829_v48 = vmul.f32 %v3774_v26, %v5677_v1  ;;  %v5717_v2 = vadd.f32 1.0, %v2866_v62  ;;  %v2903_v5 = vadd.f32 0.112945676, %v2902_v20  ;;  %vm2834_vm6 = vweird.f32 %v3774_v26 }
 0x7cc   :  { %v2929_v54 = vmul.f32 %v2928_v59, %v5702_v22  ;;  %v2940_v57 = vmul.f32 %v2939_v16, %v5702_v22  ;;  %v2893_v12 = vmul.f32 %v2892_v19, %v5659_v7  ;;  %v5732_v37 = vmul.f32 0.70710677, %v5722_v60  ;;  %vm2835_vm8 = vmor %vm2833_vm7, %vm2834_vm6 }
 0x7cd   :  { %v2830_v32 = vsub.f32 1.0, %v2829_v48  ;;  %3775 = vrcp.f32 %v5717_v2  ;;  %v2904_v51 = vmul.f32 %v2903_v5, %v5659_v7  ;;  %v2789_v35 = vmul.f32 0.5, %v5600_v14 }
 0x7ce   :  { %v2930_v29 = vadd.f32 0.0036580483, %v2929_v54  ;;  %v2941_v28 = vadd.f32 0.014752088, %v2940_v57  ;;  %v2965_v49 = vmul.f32 %v5732_v37, %v5732_v37  ;;  %v2894_v30 = vadd.f32 0.18741608, %v2893_v12 }
 0x7cf   :  { %v2831_v50 = vmul.f32 %v3774_v26, %v2830_v32  ;;  %v2905_v52 = vadd.f32 0.4994258, %v2904_v51  ;;  %v2780_v45 = vpop.f32.mrf.mxu0  ;;  %v2856_v33 = vadd.f32 1.1283791, %v2855_v15  ;;  %vm2873_vm11 = vweird.f32 %v5717_v2 }
 0x7d0   :  { %v2931_v24 = vmul.f32 %v2930_v29, %v5702_v22  ;;  %v2942_v11 = vmul.f32 %v2941_v28, %v5702_v22  ;;  %v5746_v62 = vadd.f32 %v5597_v55, %v2780_v45  ;;  %v5748_v17 = vmin.f32 %v2965_v49, 16.0 }
 0x7d1   :  { %v2832_v43 = vadd.f32 %v3774_v26, %v2831_v50  ;;  %v2906_v13 = vmul.f32 %v2905_v52, %v5659_v7  ;;  %v2895_v19 = vmul.f32 %v2894_v30, %v5659_v7  ;;  %v2879_v7 = vand.u32 2147483648, %v5717_v2 }
 0x7d2   :  { %v2943_v47 = vadd.f32 0.112945676, %v2942_v11  ;;  %v2932_v31 = vadd.f32 0.05243302, %v2931_v24  ;;  %v2967_v20 = vmul.f32 2.1237322e-06, %v5748_v17  ;;  %v2857_v51 = vmul.f32 %v2856_v33, %v5615_v36 }
 0x7d3   :  { %v5735_v61 = vpop.eup %3775  ;;  %v2836_v1 = vsel %vm2835_vm8, %v3774_v26, %v2832_v43  ;;  %v5751_v48 = vadd.f32 1.0, %v2906_v13  ;;  %v2978_v59 = vmul.f32 3.8918573e-05, %v5748_v17  ;;  %v5760_v32 = vmul.f32 0.70710677, %v5746_v62 }
 0x7d4   :  { %v2841_v56 = vsel %vm2838_vm14, %v2840_v42, %v2836_v1  ;;  %v2869_v44 = vmul.f32 %v5735_v61, %v5717_v2  ;;  %v2944_v46 = vmul.f32 %v2943_v47, %v5702_v22  ;;  %vm2874_vm10 = vweird.f32 %v5735_v61 }
 0x7d5   :  { %v2842_v27 = vmul.f32 %v2841_v56, %v2817_v23  ;;  %3777 = vrcp.f32 %v5751_v48  ;;  %v2933_v40 = vmul.f32 %v2932_v31, %v5702_v22  ;;  %v2968_v50 = vadd.f32 0.00028619796, %v2967_v20  ;;  %vm5770_vm12 = vmor %vm2873_vm11, %vm2874_vm10 }
 0x7d6   :  { %v2870_v26 = vsub.f32 1.0, %v2869_v44  ;;  %v2945_v41 = vadd.f32 0.4994258, %v2944_v46  ;;  %v2979_v54 = vadd.f32 0.001143296, %v2978_v59  ;;  %v3005_v23 = vmul.f32 %v5760_v32, %v5760_v32 }
 0x7d7   :  { %v3563_v63 = vclamps-f32 %v2842_v27, 1.0  ;;  %v2877_v57 = vand.u32 2147483647, %v5717_v2  ;;  %v2896_v10 = vadd.f32 1.1283791, %v2895_v19  ;;  %v2969_v29 = vmul.f32 %v2968_v50, %v5748_v17  ;;  %v2783_v45 = vpop.f32.mrf.mxu0 }
 0x7d8   :  { %v2871_v34 = vmul.f32 %v5735_v61, %v2870_v26  ;;  %v2946_v12 = vmul.f32 %v2945_v41, %v5702_v22  ;;  %v2980_v28 = vmul.f32 %v2979_v54, %v5748_v17  ;;  %v2917_v42 = vand.u32 2147483647, %v5751_v48 }
 0x7d9   :  { %v3125_v16 = vadd.f32 1.0, %v3563_v63  ;;  %v2934_v36 = vadd.f32 0.18741608, %v2933_v40  ;;  %v2880_v24 = vor.u32 1.1754944e-38, %v2879_v7  ;;  %v2970_v11 = vadd.f32 0.0036580483, %v2969_v29 }
 0x7da   :  { %v2872_v14 = vadd.f32 %v5735_v61, %v2871_v34  ;;  %v5783_v52 = vadd.f32 1.0, %v2946_v12  ;;  %v2981_v49 = vadd.f32 0.014752088, %v2980_v28  ;;  %v5786_v56 = vmin.f32 %v3005_v23, 16.0 }
 0x7db   :  { %v3133_v5 = vmul.f32 %v3125_v16, %v2789_v35  ;;  %v3778_v1 = vpop.eup %3777  ;;  %vm2878_vm9 = vcmp.eq.f32.partialorder %v2877_v57, 8.507059e+37  ;;  %v2897_v15 = vmul.f32 %v2896_v10, %v5640_v6  ;;  %v2919_v30 = vand.u32 2147483648, %v5751_v48 }
 0x7dc   :  { %v2876_v2 = vsel %vm5770_vm12, %v5735_v61, %v2872_v14  ;;  %v2909_v44 = vmul.f32 %v3778_v1, %v5751_v48  ;;  %3779 = vrcp.f32 %v5783_v52  ;;  %v2971_v27 = vmul.f32 %v2970_v11, %v5748_v17 }
 0x7dd   :  { %3571 = vmatmul.msk.f32.vlgmr.msra.gmra.mxu1 %vm2167_vm5, %v3133_v5  ;;  %3579 = vmatmul.msk.f32.vlgmr.msra.gmra.mxu2 %vm2167_vm5, %v3133_v5  ;;  %v2881_v61 = vsel %vm2878_vm9, %v2880_v24, %v2876_v2  ;;  %v5794_v13 = vadd.f32 %v5597_v55, %v2783_v45  ;;  %v2982_v26 = vmul.f32 %v2981_v49, %v5748_v17  ;;  %v3007_v31 = vmul.f32 2.1237322e-06, %v5786_v56 }
 0x7de   :  { %v2910_v47 = vsub.f32 1.0, %v2909_v44  ;;  %v3018_v35 = vmul.f32 3.8918573e-05, %v5786_v56  ;;  %vm2913_vm13 = vweird.f32 %v5751_v48  ;;  %vm2914_vm15 = vweird.f32 %v3778_v1 }
 0x7df   :  { %vm5800_vm1 = vcmp.eq.f32.partialorder %v2917_v42, 8.507059e+37  ;;  %v2935_v63 = vmul.f32 %v2934_v36, %v5702_v22  ;;  %v2983_v34 = vadd.f32 0.112945676, %v2982_v26  ;;  %v3008_v19 = vadd.f32 0.00028619796, %v3007_v31  ;;  %vm2915_vm2 = vmor %vm2913_vm13, %vm2914_vm15  ;;  %v2786_v44 = vpop.f32.mrf.mxu0 }
 0x7e0   :  { %v2911_v46 = vmul.f32 %v3778_v1, %v2910_v47  ;;  %v3019_v20 = vadd.f32 0.001143296, %v3018_v35  ;;  %v2882_v59 = vmul.f32 %v2881_v61, %v2857_v51  ;;  %v2920_v16 = vor.u32 1.1754944e-38, %v2919_v30 }
 0x7e1   :  { %v2972_v33 = vadd.f32 0.05243302, %v2971_v27  ;;  %v5806_v14 = vmul.f32 0.70710677, %v5794_v13  ;;  %v2984_v5 = vmul.f32 %v2983_v34, %v5748_v17  ;;  %v3009_v7 = vmul.f32 %v3008_v19, %v5786_v56 }
 0x7e2   :  { %v3780_v40 = vpop.eup %3779  ;;  %v2912_v41 = vadd.f32 %v3778_v1, %v2911_v46  ;;  %v3020_v50 = vmul.f32 %v3019_v20, %v5786_v56  ;;  %v2936_v22 = vadd.f32 1.1283791, %v2935_v63  ;;  %v2959_v57 = vand.u32 2147483648, %v5783_v52 }
 0x7e3   :  { %v2949_v54 = vmul.f32 %v3780_v40, %v5783_v52  ;;  %v3045_v10 = vmul.f32 %v5806_v14, %v5806_v14  ;;  %v2985_v51 = vadd.f32 0.4994258, %v2984_v5  ;;  %v3010_v43 = vadd.f32 0.0036580483, %v3009_v7 }
 0x7e4   :  { %v2916_v12 = vsel %vm2915_vm2, %v3778_v1, %v2912_v41  ;;  %v3021_v29 = vadd.f32 0.014752088, %v3020_v50  ;;  %v2957_v23 = vand.u32 2147483647, %v5783_v52  ;;  %v2973_v2 = vmul.f32 %v2972_v33, %v5748_v17 }
 0x7e5   :  { %v2950_v28 = vsub.f32 1.0, %v2949_v54  ;;  %v5820_v42 = vmin.f32 %v3045_v10, 16.0  ;;  %v2921_v48 = vsel %vm5800_vm1, %v2920_v16, %v2916_v12  ;;  %vm2954_vm3 = vweird.f32 %v3780_v40 }
 0x7e6   :  { %v2986_v36 = vmul.f32 %v2985_v51, %v5748_v17  ;;  %v3022_v45 = vmul.f32 %v3021_v29, %v5786_v56  ;;  %v3011_v1 = vmul.f32 %v3010_v43, %v5786_v56  ;;  %vm2953_vm4 = vweird.f32 %v5783_v52 }
 0x7e7   :  { %v2951_v24 = vmul.f32 %v3780_v40, %v2950_v28  ;;  %v3047_v11 = vmul.f32 2.1237322e-06, %v5820_v42  ;;  %v3058_v49 = vmul.f32 3.8918573e-05, %v5820_v42  ;;  %v2960_v61 = vor.u32 1.1754944e-38, %v2959_v57  ;;  %vm2955_vm6 = vmor %vm2953_vm4, %vm2954_vm3 }
 0x7e8   :  { %v5830_v30 = vadd.f32 1.0, %v2986_v36  ;;  %v3023_v27 = vadd.f32 0.112945676, %v3022_v45  ;;  %v2974_v26 = vadd.f32 0.18741608, %v2973_v2  ;;  %v2922_v6 = vmul.f32 %v2921_v48, %v2897_v15 }
 0x7e9   :  { %v2952_v47 = vadd.f32 %v3780_v40, %v2951_v24  ;;  %v3048_v31 = vadd.f32 0.00028619796, %v3047_v11  ;;  %v3059_v35 = vadd.f32 0.001143296, %v3058_v49  ;;  %v5835_v63 = vadd.f32 %v5597_v55, %v2786_v44 }
 0x7ea   :  { %3781 = vrcp.f32 %v5830_v30  ;;  %v3564_v46 = vclamps-f32 %v2882_v59, 1.0  ;;  %vm2958_vm7 = vcmp.eq.f32.partialorder %v2957_v23, 8.507059e+37  ;;  %v3012_v52 = vadd.f32 0.05243302, %v3011_v1 }
 0x7eb   :  { %v2956_v34 = vsel %vm2955_vm6, %v3780_v40, %v2952_v47  ;;  %v3024_v19 = vmul.f32 %v3023_v27, %v5786_v56  ;;  %v3049_v16 = vmul.f32 %v3048_v31, %v5820_v42  ;;  %v3060_v33 = vmul.f32 %v3059_v35, %v5820_v42 }
 0x7ec   :  { %v2961_v20 = vsel %vm2958_vm7, %v2960_v61, %v2956_v34  ;;  %v2790_v15 = vmul.f32 0.5, %v5612_v18  ;;  %v2937_v41 = vmul.f32 %v2936_v22, %v5681_v25  ;;  %v2975_v5 = vmul.f32 %v2974_v26, %v5748_v17 }
 0x7ed   :  { %v3025_v7 = vadd.f32 0.4994258, %v3024_v19  ;;  %v3061_v55 = vadd.f32 0.014752088, %v3060_v33  ;;  %v5844_v59 = vmul.f32 0.70710677, %v5835_v63  ;;  %v3013_v57 = vmul.f32 %v3012_v52, %v5786_v56 }
 0x7ee   :  { %v3126_v40 = vadd.f32 1.0, %v3564_v46  ;;  %v3565_v50 = vclamps-f32 %v2922_v6, 1.0  ;;  %v2962_v54 = vmul.f32 %v2961_v20, %v2937_v41  ;;  %v3050_v51 = vadd.f32 0.0036580483, %v3049_v16 }
 0x7ef   :  { %v3026_v10 = vmul.f32 %v3025_v7, %v5786_v56  ;;  %v3062_v18 = vmul.f32 %v3061_v55, %v5820_v42  ;;  %v3085_v25 = vmul.f32 %v5844_v59, %v5844_v59  ;;  %v2791_v22 = vmul.f32 0.5, %v5631_v9 }
 0x7f0   :  { %v3782_v12 = vpop.eup %3781  ;;  %v3134_v17 = vmul.f32 %v3126_v40, %v2790_v15  ;;  %v2976_v28 = vadd.f32 1.1283791, %v2975_v5  ;;  %v3127_v48 = vadd.f32 1.0, %v3565_v50  ;;  %v2997_v45 = vand.u32 2147483647, %v5830_v30 }
 0x7f1   :  { %v2989_v43 = vmul.f32 %v3782_v12, %v5830_v30  ;;  %v5853_v29 = vadd.f32 1.0, %v3026_v10  ;;  %v3063_v23 = vadd.f32 0.112945676, %v3062_v18  ;;  %v5855_v2 = vmin.f32 %v3085_v25, 16.0 }
 0x7f2   :  { %3572 = vmatmul.msk.f32.gmra.mxu1 %vm2167_vm5, %v3134_v17  ;;  %3580 = vmatmul.msk.f32.gmra.mxu2 %vm2167_vm5, %v3134_v17  ;;  %v2999_v24 = vand.u32 2147483648, %v5830_v30  ;;  %v3014_v9 = vadd.f32 0.18741608, %v3013_v57  ;;  %v3051_v1 = vmul.f32 %v3050_v51, %v5820_v42  ;;  %v3566_v49 = vclamps-f32 %v2962_v54, 1.0 }
 0x7f3   :  { %v2990_v36 = vsub.f32 1.0, %v2989_v43  ;;  %3783 = vrcp.f32 %v5853_v29  ;;  %v3064_v11 = vmul.f32 %v3063_v23, %v5820_v42  ;;  %vm2994_vm8 = vweird.f32 %v3782_v12 }
 0x7f4   :  { %v3087_v61 = vmul.f32 2.1237322e-06, %v5855_v2  ;;  %v3098_v27 = vmul.f32 3.8918573e-05, %v5855_v2  ;;  %v2977_v47 = vmul.f32 %v2976_v28, %v5732_v37  ;;  %vm2993_vm14 = vweird.f32 %v5830_v30 }
 0x7f5   :  { %v2991_v44 = vmul.f32 %v3782_v12, %v2990_v36  ;;  %v3065_v26 = vadd.f32 0.4994258, %v3064_v11  ;;  %v3135_v31 = vmul.f32 %v3127_v48, %v2791_v22  ;;  %vm2998_vm10 = vcmp.eq.f32.partialorder %v2997_v45, 8.507059e+37  ;;  %vm2995_vm11 = vmor %vm2993_vm14, %vm2994_vm8 }
 0x7f6   :  { %v3088_v6 = vadd.f32 0.00028619796, %v3087_v61  ;;  %v3099_v46 = vadd.f32 0.001143296, %v3098_v27  ;;  %v3000_v34 = vor.u32 1.1754944e-38, %v2999_v24  ;;  %v3015_v52 = vmul.f32 %v3014_v9, %v5786_v56 }
 0x7f7   :  { %v2992_v35 = vadd.f32 %v3782_v12, %v2991_v44  ;;  %v3052_v19 = vadd.f32 0.05243302, %v3051_v1  ;;  %v3066_v20 = vmul.f32 %v3065_v26, %v5820_v42  ;;  %v3128_v30 = vadd.f32 1.0, %v3566_v49 }
 0x7f8   :  { %v3089_v15 = vmul.f32 %v3088_v6, %v5855_v2  ;;  %v3100_v37 = vmul.f32 %v3099_v46, %v5855_v2  ;;  %v2792_v7 = vmul.f32 0.5, %v5666_v0  ;;  %v3016_v50 = vadd.f32 1.1283791, %v3015_v52 }
 0x7f9   :  { %v3784_v16 = vpop.eup %3783  ;;  %v2996_v33 = vsel %vm2995_vm11, %v3782_v12, %v2992_v35  ;;  %v3067_v55 = vadd.f32 1.0, %v3066_v20  ;;  %v3037_v57 = vand.u32 2147483647, %v5853_v29  ;;  %v3053_v10 = vmul.f32 %v3052_v19, %v5820_v42 }
 0x7fa   :  { %v3001_v41 = vsel %vm2998_vm10, %v3000_v34, %v2996_v33  ;;  %v3029_v5 = vmul.f32 %v3784_v16, %v5853_v29  ;;  %3573 = vmatmul.msk.f32.gmra.mxu1 %vm2167_vm5, %v3135_v31  ;;  %3581 = vmatmul.msk.f32.gmra.mxu2 %vm2167_vm5, %v3135_v31  ;;  %v3101_v40 = vadd.f32 0.014752088, %v3100_v37  ;;  %v3039_v12 = vand.u32 2147483648, %v5853_v29 }
 0x7fb   :  { %v3002_v56 = vmul.f32 %v3001_v41, %v2977_v47  ;;  %3785 = vrcp.f32 %v3067_v55  ;;  %v3090_v51 = vadd.f32 0.0036580483, %v3089_v15  ;;  %v3136_v18 = vmul.f32 %v3128_v30, %v2792_v7 }
 0x7fc   :  { %v3030_v54 = vsub.f32 1.0, %v3029_v5  ;;  %vm3034_vm12 = vweird.f32 %v3784_v16  ;;  %v3102_v17 = vmul.f32 %v3101_v40, %v5855_v2  ;;  %vm3033_vm9 = vweird.f32 %v5853_v29 }
 0x7fd   :  { %v3567_v22 = vclamps-f32 %v3002_v56, 1.0  ;;  %v3054_v43 = vadd.f32 0.18741608, %v3053_v10  ;;  %v3017_v23 = vmul.f32 %v3016_v50, %v5760_v32  ;;  %vm3035_vm13 = vmor %vm3033_vm9, %vm3034_vm12  ;;  %v3040_v48 = vor.u32 1.1754944e-38, %v3039_v12 }
 0x7fe   :  { %v3031_v25 = vmul.f32 %v3784_v16, %v3030_v54  ;;  %v3103_v28 = vadd.f32 0.112945676, %v3102_v17  ;;  %v3091_v36 = vmul.f32 %v3090_v51, %v5855_v2  ;;  %vm3038_vm15 = vcmp.eq.f32.partialorder %v3037_v57, 8.507059e+37 }
 0x7ff   :  { %v3129_v9 = vadd.f32 1.0, %v3567_v22  ;;  %v2793_v29 = vmul.f32 0.5, %v5722_v60  ;;  %v3055_v32 = vmul.f32 %v3054_v43, %v5820_v42  ;;  %v3079_v35 = vand.u32 2147483648, %v3067_v55 }
 0x800   :  { %v3032_v0 = vadd.f32 %v3784_v16, %v3031_v25  ;;  %v3104_v24 = vmul.f32 %v3103_v28, %v5855_v2  ;;  %v3092_v61 = vadd.f32 0.05243302, %v3091_v36  ;;  %v3077_v52 = vand.u32 2147483647, %v3067_v55 }
 0x801   :  { %v3786_v1 = vpop.eup %3785  ;;  %v3137_v26 = vmul.f32 %v3129_v9, %v2793_v29  ;;  %v3056_v46 = vadd.f32 1.1283791, %v3055_v32  ;;  %vm3073_vm2 = vweird.f32 %v3067_v55  ;;  %v2794_v33 = vmul.f32 0.5, %v5746_v62 }
 0x802   :  { %v3036_v45 = vsel %vm3035_vm13, %v3784_v16, %v3032_v0  ;;  %3574 = vmatmul.msk.f32.gmra.mxu1 %vm2167_vm5, %v3136_v18  ;;  %3582 = vmatmul.msk.f32.gmra.mxu2 %vm2167_vm5, %v3136_v18  ;;  %v3069_v44 = vmul.f32 %v3786_v1, %v3067_v55  ;;  %v3105_v27 = vadd.f32 0.4994258, %v3104_v24  ;;  %vm3074_vm1 = vweird.f32 %v3786_v1 }
 0x803   :  { %v3041_v11 = vsel %vm3038_vm15, %v3040_v48, %v3036_v45  ;;  %v3093_v19 = vmul.f32 %v3092_v61, %v5855_v2  ;;  %vm3075_vm3 = vmor %vm3073_vm2, %vm3074_vm1  ;;  %v3080_v16 = vor.u32 1.1754944e-38, %v3079_v35  ;;  %v3057_v15 = vmul.f32 %v3056_v46, %v5806_v14 }
 0x804   :  { %v3042_v49 = vmul.f32 %v3041_v11, %v3017_v23  ;;  %v3070_v47 = vsub.f32 1.0, %v3069_v44  ;;  %v3106_v6 = vmul.f32 %v3105_v27, %v5855_v2  ;;  %vm3078_vm4 = vcmp.eq.f32.partialorder %v3077_v52, 8.507059e+37 }
 0x805   :  { %v3094_v41 = vadd.f32 0.18741608, %v3093_v19  ;;  %v2795_v62 = vmul.f32 0.5, %v5794_v13  ;;  %v2796_v28 = vmul.f32 0.5, %v5835_v63 }
 0x806   :  { %v3568_v31 = vclamps-f32 %v3042_v49, 1.0  ;;  %v3071_v34 = vmul.f32 %v3786_v1, %v3070_v47  ;;  %v3107_v20 = vadd.f32 1.0, %v3106_v6  ;;  %v5914_v47 = vld [vmem:[%s5977_s4 + $0x7] ss:$0 sm:$0xff] }
 0x807   :  { %v3095_v40 = vmul.f32 %v3094_v41, %v5855_v2 }
 0x808   :  { %v3072_v60 = vadd.f32 %v3786_v1, %v3071_v34  ;;  %v3130_v42 = vadd.f32 1.0, %v3568_v31  ;;  %3787 = vrcp.f32 %v3107_v20  ;;  %v3119_v10 = vand.u32 2147483648, %v3107_v20 }
 0x809   :  { %v3096_v14 = vadd.f32 1.1283791, %v3095_v40  ;;  %v3117_v51 = vand.u32 2147483647, %v3107_v20  ;;  %vm3113_vm7 = vweird.f32 %v3107_v20 }
 0x80a   :  { %3575 = vmatmul.msk.f32.gmra.mxu1 %vm2167_vm5, %v3137_v26  ;;  %3583 = vmatmul.msk.f32.gmra.mxu2 %vm2167_vm5, %v3137_v26  ;;  %v3076_v37 = vsel %vm3075_vm3, %v3786_v1, %v3072_v60  ;;  %v3138_v7 = vmul.f32 %v3130_v42, %v2794_v33  ;;  %v3120_v17 = vor.u32 1.1754944e-38, %v3119_v10 }
 0x80b   :  { %v3081_v30 = vsel %vm3078_vm4, %v3080_v16, %v3076_v37  ;;  %v3097_v2 = vmul.f32 %v3096_v14, %v5844_v59  ;;  %vm3118_vm14 = vcmp.eq.f32.partialorder %v3117_v51, 8.507059e+37  ;;  %v5907_v59 = vld [vmem:[%s5977_s4 + $0x8] ss:$0 sm:$0xff]  ;;  %s3858_s4 = smov [#allocation2]  }
 0x80c   :  { %v3082_v5 = vmul.f32 %v3081_v30, %v3057_v15  ;;  %s3437_s14 = sshll.u32 %s3858_s4, 4  ;;  %s3438_s14 = int_to_ptr.vmem [resolvable:$true] %s3437_s14 }
 0x80e   :  { %v3569_v56 = vclamps-f32 %v3082_v5, 1.0  ;;  %v3788_v55 = vpop.eup %3787 }
 0x80f   :  { %v3109_v50 = vmul.f32 %v3788_v55, %v3107_v20  ;;  %vm3114_vm6 = vweird.f32 %v3788_v55 }
 0x810   :  { %v3131_v54 = vadd.f32 1.0, %v3569_v56  ;;  %vm3115_vm8 = vmor %vm3113_vm7, %vm3114_vm6 }
 0x811   :  { %v3110_v57 = vsub.f32 1.0, %v3109_v50 }
 0x812   :  { %3576 = vmatmul.msk.f32.gmra.mxu1 %vm2167_vm5, %v3138_v7  ;;  %3584 = vmatmul.msk.f32.gmra.mxu2 %vm2167_vm5, %v3138_v7  ;;  %v3139_v18 = vmul.f32 %v3131_v54, %v2795_v62 }
 0x813   :  { %v3111_v12 = vmul.f32 %v3788_v55, %v3110_v57 }
 0x815   :  { %v3112_v25 = vadd.f32 %v3788_v55, %v3111_v12 }
 0x817   :  { %v3116_v22 = vsel %vm3115_vm8, %v3788_v55, %v3112_v25 }
 0x818   :  { %v3121_v13 = vsel %vm3118_vm14, %v3120_v17, %v3116_v22 }
 0x819   :  { %v3122_v0 = vmul.f32 %v3121_v13, %v3097_v2 }
 0x81a   :  { %3577 = vmatmul.msk.f32.gmra.mxu1 %vm2167_vm5, %v3139_v18  ;;  %3585 = vmatmul.msk.f32.gmra.mxu2 %vm2167_vm5, %v3139_v18 }
 0x81b   :  { %v3570_v43 = vclamps-f32 %v3122_v0, 1.0 }
 0x81d   :  { %v3132_v23 = vadd.f32 1.0, %v3570_v43 }
 0x81f   :  { %v3140_v48 = vmul.f32 %v3132_v23, %v2796_v28 }
 0x822   :  { %3578 = vmatmul.msk.f32.gmra.mxu1 %vm2167_vm5, %v3140_v48  ;;  %3586 = vmatmul.msk.f32.gmra.mxu2 %vm2167_vm5, %v3140_v48 }
 0x85a   :  { %v3183_v35 = vpop.f32.mrf.mxu1 }
 0x85b   :  { %v3184_v52 = vadd.f32 %v5914_v47, %v3183_v35 }
 0x860   :  { %v3225_v36 = vpop.f32.mrf.mxu2 }
 0x861   :  { %v3226_v45 = vadd.f32 %v5907_v59, %v3225_v36 }
 0x863   :  { %v3587_v24 = vmul.f32 -1.442695, %v3226_v45 }
 0x865   :  { %3789 = vpow2.f32 %v3587_v24 }
 0x86b   :  { %v3790_v9 = vpop.eup %3789 }
 0x86c   :  { %v3273_v1 = vadd.f32 1.0, %v3790_v9 }
 0x86e   :  { %3791 = vrcp.f32 %v3273_v1  ;;  %v3292_v49 = vand.u32 2147483648, %v3273_v1  ;;  %v3290_v61 = vand.u32 2147483647, %v3273_v1  ;;  %vm3286_vm10 = vweird.f32 %v3273_v1 }
 0x86f   :  { %v3186_v5 = vpop.f32.mrf.mxu1 }
 0x870   :  { %v3293_v6 = vor.u32 1.1754944e-38, %v3292_v49  ;;  %vm3291_vm12 = vcmp.eq.f32.partialorder %v3290_v61, 8.507059e+37  ;;  %v3187_v28 = vadd.f32 %v5914_v47, %v3186_v5 }
 0x874   :  { %v3792_v63 = vpop.eup %3791 }
 0x875   :  { %v3282_v11 = vmul.f32 %v3792_v63, %v3273_v1  ;;  %v3228_v32 = vpop.f32.mrf.mxu2  ;;  %vm3287_vm5 = vweird.f32 %v3792_v63 }
 0x876   :  { %v3229_v27 = vadd.f32 %v5907_v59, %v3228_v32  ;;  %vm3288_vm11 = vmor %vm3286_vm10, %vm3287_vm5 }
 0x877   :  { %v3283_v29 = vsub.f32 1.0, %v3282_v11  ;;  %v3189_v2 = vpop.f32.mrf.mxu1 }
 0x878   :  { %v3588_v31 = vmul.f32 -1.442695, %v3229_v27 }
 0x879   :  { %v3284_v44 = vmul.f32 %v3792_v63, %v3283_v29 }
 0x87a   :  { %3793 = vpow2.f32 %v3588_v31 }
 0x87b   :  { %v3285_v26 = vadd.f32 %v3792_v63, %v3284_v44 }
 0x87d   :  { %v3289_v46 = vsel %vm3288_vm11, %v3792_v63, %v3285_v26  ;;  %v3231_v20 = vpop.f32.mrf.mxu2 }
 0x87e   :  { %v3294_v34 = vsel %vm3291_vm12, %v3293_v6, %v3289_v46  ;;  %v5918_v42 = vadd.f32 %v5907_v59, %v3231_v20  ;;  %v3190_v46 = vadd.f32 %v5914_v47, %v3189_v2 }
 0x87f   :  { %v3401_v19 = vmul.f32 %v3294_v34, %v3226_v45  ;;  %v3192_v6 = vpop.f32.mrf.mxu1 }
 0x880   :  { %v3794_v16 = vpop.eup %3793  ;;  %v3589_v15 = vmul.f32 -1.442695, %v5918_v42 }
 0x881   :  { %v3409_v60 = vmul.f32 %v3401_v19, %v3184_v52  ;;  %v3274_v37 = vadd.f32 1.0, %v3794_v16 }
 0x882   :  { %3795 = vpow2.f32 %v3589_v15 }
 0x883   :  { %v3417_v33 = vadd.f32 %v3409_v60, %v5366_v4  ;;  %3797 = vrcp.f32 %v3274_v37  ;;  %v3307_v54 = vand.u32 2147483648, %v3274_v37  ;;  %v3305_v14 = vand.u32 2147483647, %v3274_v37 }
 0x884   :  { %vm3301_vm13 = vweird.f32 %v3274_v37 }
 0x885   :  { %3425 = vst.msk [vmem:[#allocation2] sm:$0xff] %vm37_vm0, %v3417_v33  ;;  %v3234_v30 = vpop.f32.mrf.mxu2  ;;  %v3308_v17 = vor.u32 1.1754944e-38, %v3307_v54  ;;  %vm3306_vm1 = vcmp.eq.f32.partialorder %v3305_v14, 8.507059e+37 }
 0x886   :  { %v5924_v41 = vadd.f32 %v5907_v59, %v3234_v30 }
 0x888   :  { %v3796_v7 = vpop.eup %3795  ;;  %v3590_v56 = vmul.f32 -1.442695, %v5924_v41 }
 0x889   :  { %v3798_v55 = vpop.eup %3797  ;;  %v3275_v40 = vadd.f32 1.0, %v3796_v7 }
 0x88a   :  { %v3297_v50 = vmul.f32 %v3798_v55, %v3274_v37  ;;  %3799 = vpow2.f32 %v3590_v56  ;;  %vm3302_vm9 = vweird.f32 %v3798_v55 }
 0x88b   :  { %3801 = vrcp.f32 %v3275_v40  ;;  %vm3303_vm15 = vmor %vm3301_vm13, %vm3302_vm9  ;;  %v3320_v36 = vand.u32 2147483647, %v3275_v40  ;;  %v3322_v45 = vand.u32 2147483648, %v3275_v40  ;;  %vm3316_vm3 = vweird.f32 %v3275_v40 }
 0x88c   :  { %v3298_v4 = vsub.f32 1.0, %v3297_v50 }
 0x88d   :  { %v3237_v62 = vpop.f32.mrf.mxu2  ;;  %v3323_v61 = vor.u32 1.1754944e-38, %v3322_v45  ;;  %vm3321_vm6 = vcmp.eq.f32.partialorder %v3320_v36, 8.507059e+37 }
 0x88e   :  { %v3299_v57 = vmul.f32 %v3798_v55, %v3298_v4  ;;  %v5928_v10 = vadd.f32 %v5907_v59, %v3237_v62  ;;  %v3193_v4 = vadd.f32 %v5914_v47, %v3192_v6  ;;  %v3195_v62 = vpop.f32.mrf.mxu1 }
 0x890   :  { %v3800_v12 = vpop.eup %3799  ;;  %v3300_v51 = vadd.f32 %v3798_v55, %v3299_v57  ;;  %v3591_v18 = vmul.f32 -1.442695, %v5928_v10 }
 0x891   :  { %v3802_v25 = vpop.eup %3801  ;;  %v3276_v22 = vadd.f32 1.0, %v3800_v12 }
 0x892   :  { %v3304_v13 = vsel %vm3303_vm15, %v3798_v55, %v3300_v51  ;;  %v3312_v0 = vmul.f32 %v3802_v25, %v3275_v40  ;;  %3803 = vpow2.f32 %v3591_v18  ;;  %vm3317_vm2 = vweird.f32 %v3802_v25 }
 0x893   :  { %v3309_v43 = vsel %vm3306_vm1, %v3308_v17, %v3304_v13  ;;  %3805 = vrcp.f32 %v3276_v22  ;;  %vm3318_vm4 = vmor %vm3316_vm3, %vm3317_vm2  ;;  %v3335_v52 = vand.u32 2147483647, %v3276_v22  ;;  %v3337_v19 = vand.u32 2147483648, %v3276_v22 }
 0x894   :  { %v3402_v23 = vmul.f32 %v3309_v43, %v3229_v27  ;;  %v3313_v48 = vsub.f32 1.0, %v3312_v0  ;;  %vm3331_vm8 = vweird.f32 %v3276_v22 }
 0x895   :  { %v3240_v24 = vpop.f32.mrf.mxu2  ;;  %vm3336_vm5 = vcmp.eq.f32.partialorder %v3335_v52, 8.507059e+37 }
 0x896   :  { %v3410_v9 = vmul.f32 %v3402_v23, %v3187_v28  ;;  %v3314_v1 = vmul.f32 %v3802_v25, %v3313_v48  ;;  %v5933_v63 = vadd.f32 %v5907_v59, %v3240_v24 }
 0x898   :  { %v3804_v11 = vpop.eup %3803  ;;  %v3418_v29 = vadd.f32 %v3410_v9, %v5379_v39  ;;  %v3315_v49 = vadd.f32 %v3802_v25, %v3314_v1  ;;  %v3592_v32 = vmul.f32 -1.442695, %v5933_v63 }
 0x899   :  { %v3806_v44 = vpop.eup %3805  ;;  %v3277_v27 = vadd.f32 1.0, %v3804_v11  ;;  %v3198_v11 = vpop.f32.mrf.mxu1 }
 0x89a   :  { %3426 = vst.msk [vmem:[#allocation2 + $0x8] sm:$0xff] %vm37_vm0, %v3418_v29  ;;  %v3319_v26 = vsel %vm3318_vm4, %v3802_v25, %v3315_v49  ;;  %v3327_v31 = vmul.f32 %v3806_v44, %v3276_v22  ;;  %3807 = vpow2.f32 %v3592_v32  ;;  %vm3332_vm7 = vweird.f32 %v3806_v44 }
 0x89b   :  { %v3324_v35 = vsel %vm3321_vm6, %v3323_v61, %v3319_v26  ;;  %3809 = vrcp.f32 %v3277_v27  ;;  %vm3333_vm14 = vmor %vm3331_vm8, %vm3332_vm7  ;;  %v3352_v57 = vand.u32 2147483648, %v3277_v27  ;;  %v3350_v51 = vand.u32 2147483647, %v3277_v27 }
 0x89c   :  { %v3403_v39 = vmul.f32 %v3324_v35, %v5918_v42  ;;  %v3328_v34 = vsub.f32 1.0, %v3327_v31  ;;  %v3338_v42 = vor.u32 1.1754944e-38, %v3337_v19  ;;  %vm3346_vm11 = vweird.f32 %v3277_v27 }
 0x89d   :  { %v3243_v20 = vpop.f32.mrf.mxu2  ;;  %v3353_v0 = vor.u32 1.1754944e-38, %v3352_v57  ;;  %vm3351_vm9 = vcmp.eq.f32.partialorder %v3350_v51, 8.507059e+37  ;;  %v3199_v35 = vadd.f32 %v5914_v47, %v3198_v11 }
 0x89e   :  { %v3411_v60 = vmul.f32 %v3403_v39, %v3190_v46  ;;  %v3329_v16 = vmul.f32 %v3806_v44, %v3328_v34  ;;  %v5941_v33 = vadd.f32 %v5907_v59, %v3243_v20 }
 0x8a0   :  { %v3808_v15 = vpop.eup %3807  ;;  %v3419_v37 = vadd.f32 %v3411_v60, %v5330_v21  ;;  %v3330_v30 = vadd.f32 %v3806_v44, %v3329_v16  ;;  %v3593_v5 = vmul.f32 -1.442695, %v5941_v33 }
 0x8a1   :  { %v3810_v7 = vpop.eup %3809  ;;  %v3278_v56 = vadd.f32 1.0, %v3808_v15  ;;  %v3201_v60 = vpop.f32.mrf.mxu1 }
 0x8a2   :  { %3427 = vst.msk [vmem:[#allocation2 + $0x10] sm:$0xff] %vm37_vm0, %v3419_v37  ;;  %v3334_v55 = vsel %vm3333_vm14, %v3806_v44, %v3330_v30  ;;  %v3342_v40 = vmul.f32 %v3810_v7, %v3277_v27  ;;  %3811 = vpow2.f32 %v3593_v5  ;;  %vm3347_vm10 = vweird.f32 %v3810_v7 }
 0x8a3   :  { %v3339_v50 = vsel %vm3336_vm5, %v3338_v42, %v3334_v55  ;;  %3813 = vrcp.f32 %v3278_v56  ;;  %vm3348_vm12 = vmor %vm3346_vm11, %vm3347_vm10  ;;  %v3365_v1 = vand.u32 2147483647, %v3278_v56  ;;  %vm3361_vm15 = vweird.f32 %v3278_v56 }
 0x8a4   :  { %v3404_v21 = vmul.f32 %v3339_v50, %v5924_v41  ;;  %v3343_v54 = vsub.f32 1.0, %v3342_v40  ;;  %v3202_v30 = vadd.f32 %v5914_v47, %v3201_v60 }
 0x8a5   :  { %v3246_v18 = vpop.f32.mrf.mxu2  ;;  %vm3366_vm2 = vcmp.eq.f32.partialorder %v3365_v1, 8.507059e+37 }
 0x8a6   :  { %v3412_v14 = vmul.f32 %v3404_v21, %v3193_v4  ;;  %v3344_v12 = vmul.f32 %v3810_v7, %v3343_v54  ;;  %v5950_v22 = vadd.f32 %v5907_v59, %v3246_v18  ;;  %v3367_v59 = vand.u32 2147483648, %v3278_v56 }
 0x8a8   :  { %v3812_v25 = vpop.eup %3811  ;;  %v3420_v17 = vadd.f32 %v3412_v14, %v5352_v58  ;;  %v3345_v2 = vadd.f32 %v3810_v7, %v3344_v12  ;;  %v3594_v23 = vmul.f32 -1.442695, %v5950_v22  ;;  %v3196_v58 = vadd.f32 %v5914_v47, %v3195_v62 }
 0x8a9   :  { %v3814_v13 = vpop.eup %3813  ;;  %v3279_v41 = vadd.f32 1.0, %v3812_v25  ;;  %v3368_v44 = vor.u32 1.1754944e-38, %v3367_v59  ;;  %v3204_v21 = vpop.f32.mrf.mxu1 }
 0x8aa   :  { %3428 = vst.msk [vmem:[#allocation2 + $0x18] sm:$0xff] %vm37_vm0, %v3420_v17  ;;  %v3349_v43 = vsel %vm3348_vm12, %v3810_v7, %v3345_v2  ;;  %v3357_v28 = vmul.f32 %v3814_v13, %v3278_v56  ;;  %vm3362_vm13 = vweird.f32 %v3814_v13 }
 0x8ab   :  { %v3354_v48 = vsel %vm3351_vm9, %v3353_v0, %v3349_v43  ;;  %3815 = vrcp.f32 %v3279_v41  ;;  %vm3363_vm1 = vmor %vm3361_vm15, %vm3362_vm13  ;;  %v3382_v39 = vand.u32 2147483648, %v3279_v41  ;;  %v3380_v52 = vand.u32 2147483647, %v3279_v41 }
 0x8ac   :  { %v3405_v36 = vmul.f32 %v3354_v48, %v5928_v10  ;;  %v3358_v45 = vsub.f32 1.0, %v3357_v28  ;;  %3817 = vpow2.f32 %v3594_v23  ;;  %vm3376_vm4 = vweird.f32 %v3279_v41 }
 0x8ad   :  { %v3383_v16 = vor.u32 1.1754944e-38, %v3382_v39  ;;  %vm3381_vm7 = vcmp.eq.f32.partialorder %v3380_v52, 8.507059e+37 }
 0x8ae   :  { %v3413_v24 = vmul.f32 %v3405_v36, %v3196_v58  ;;  %v3359_v9 = vmul.f32 %v3814_v13, %v3358_v45 }
 0x8b0   :  { %v3421_v29 = vadd.f32 %v3413_v24, %v5373_v53  ;;  %v3360_v49 = vadd.f32 %v3814_v13, %v3359_v9 }
 0x8b1   :  { %v3816_v32 = vpop.eup %3815 }
 0x8b2   :  { %v3818_v61 = vpop.eup %3817  ;;  %3429 = vst.msk [vmem:[#allocation2 + $0x20] sm:$0xff] %vm37_vm0, %v3421_v29  ;;  %v3364_v27 = vsel %vm3363_vm1, %v3814_v13, %v3360_v49  ;;  %v3372_v10 = vmul.f32 %v3816_v32, %v3279_v41  ;;  %vm3377_vm3 = vweird.f32 %v3816_v32 }
 0x8b3   :  { %v3369_v26 = vsel %vm3366_vm2, %v3368_v44, %v3364_v27  ;;  %v3280_v31 = vadd.f32 1.0, %v3818_v61  ;;  %vm3378_vm6 = vmor %vm3376_vm4, %vm3377_vm3 }
 0x8b4   :  { %v3406_v6 = vmul.f32 %v3369_v26, %v5933_v63  ;;  %v3373_v46 = vsub.f32 1.0, %v3372_v10 }
 0x8b5   :  { %3819 = vrcp.f32 %v3280_v31  ;;  %v3397_v55 = vand.u32 2147483648, %v3280_v31  ;;  %v3395_v50 = vand.u32 2147483647, %v3280_v31  ;;  %vm3391_vm14 = vweird.f32 %v3280_v31 }
 0x8b6   :  { %v3414_v53 = vmul.f32 %v3406_v6, %v3199_v35  ;;  %v3374_v34 = vmul.f32 %v3816_v32, %v3373_v46 }
 0x8b7   :  { %v3398_v54 = vor.u32 1.1754944e-38, %v3397_v55  ;;  %vm3396_vm10 = vcmp.eq.f32.partialorder %v3395_v50, 8.507059e+37 }
 0x8b8   :  { %v3422_v19 = vadd.f32 %v3414_v53, %v5321_v38  ;;  %v3375_v20 = vadd.f32 %v3816_v32, %v3374_v34 }
 0x8ba   :  { %3430 = vst.msk [vmem:[#allocation2 + $0x28] sm:$0xff] %vm37_vm0, %v3422_v19  ;;  %v3379_v15 = vsel %vm3378_vm6, %v3816_v32, %v3375_v20 }
 0x8bb   :  { %v3820_v37 = vpop.eup %3819  ;;  %v3384_v63 = vsel %vm3381_vm7, %v3383_v16, %v3379_v15 }
 0x8bc   :  { %v3407_v5 = vmul.f32 %v3384_v63, %v5941_v33  ;;  %v3387_v7 = vmul.f32 %v3820_v37, %v3280_v31  ;;  %vm3392_vm8 = vweird.f32 %v3820_v37  ;;  %v3205_v33 = vadd.f32 %v5914_v47, %v3204_v21 }
 0x8bd   :  { %vm3393_vm5 = vmor %vm3391_vm14, %vm3392_vm8 }
 0x8be   :  { %v3415_v42 = vmul.f32 %v3407_v5, %v3202_v30  ;;  %v3388_v56 = vsub.f32 1.0, %v3387_v7 }
 0x8c0   :  { %v3423_v38 = vadd.f32 %v3415_v42, %v5337_v8  ;;  %v3389_v40 = vmul.f32 %v3820_v37, %v3388_v56 }
 0x8c2   :  { %3431 = vst.msk [vmem:[#allocation2 + $0x30] sm:$0xff] %vm37_vm0, %v3423_v38  ;;  %v3390_v4 = vadd.f32 %v3820_v37, %v3389_v40 }
 0x8c4   :  { %v3394_v62 = vsel %vm3393_vm5, %v3820_v37, %v3390_v4 }
 0x8c5   :  { %v3399_v57 = vsel %vm3396_vm10, %v3398_v54, %v3394_v62 }
 0x8c6   :  { %v3408_v14 = vmul.f32 %v3399_v57, %v5950_v22 }
 0x8c8   :  { %v3416_v8 = vmul.f32 %v3408_v14, %v3205_v33 }
 0x8ca   :  { %v3424_v12 = vadd.f32 %v3416_v8, %v5362_v3 }
 0x8cc   :  { %3432 = vst.msk [vmem:[#allocation2 + $0x38] sm:$0xff] %vm37_vm0, %v3424_v12 }
 0x8cd   :  { %3445 = dma.vmem_to_hbm [thread:$0]  %s3438_s14, 1024, %s3440_s17, [#allocation3], %s3859_s18, %s3859_s18, %s3860_s6  }
 0x8ce   :  { %3855 = dma.done.wait [#allocation3], 1024  }
 0x8cf   :  { %3856 = vsyncadd [#allocation3], 4294966272 }
 0x8d0   :  { %3450 = vsyncpa [#allocation3], 1 }

</bundles_post_ra>
